<compile_context>
chip_gen: v7x
topology: tpu7x:2x2x1
jax: 0.10.0
libtpu: 0.0.40
codegen_flags: <defaults>
</compile_context>

<pallas_src>
import jax
import jax.numpy as jnp
from jax.experimental import pallas as pl
from jax.experimental.pallas import tpu as pltpu

BN_EPS = 1e-5
LANE = 128


def _round_up(v, m):
    return ((v + m - 1) // m) * m


def _pad_axis(a, axis, target):
    pad = [(0, 0)] * a.ndim
    pad[axis] = (0, target - a.shape[axis])
    return jnp.pad(a, pad)


def _im2col_matmul(src_ref, w_ref, th, w_out):
    """3x3 'SAME' conv on a spatially padded, lane-padded VMEM tile.

    src_ref: (th+2, w_out+2, C_pad) bf16 VMEM scratch (borders & pad lanes = 0)
    w_ref  : (9*C_pad, Cout_pad)    bf16, taps fused into K ([dy, dx, c] order)
    returns: (th*w_out, Cout_pad)   f32
    """
    c_pad = src_ref.shape[-1]
    m = th * w_out
    taps = [src_ref[dy:dy + th, dx:dx + w_out, :].reshape(m, c_pad)
            for dy in range(3) for dx in range(3)]
    slab = jnp.concatenate(taps, axis=-1)                 # (m, 9*C_pad) bf16
    return jnp.dot(slab, w_ref[...], preferred_element_type=jnp.float32)


def conv1_stats_kernel(x_ref, w1_ref, b1_ref, y_ref, stats_ref, xc_ref):
    # x_ref    : (Hp, Wp, Cin) bf16 — full padded image, resident across h steps
    # y_ref    : (TH, W, Cout) bf16 — conv1+ReLU activations (pre-BN) for tile
    # stats_ref: (2, Cout)     f32  — per-tile [sum, sum-of-squares]
    # xc_ref   : (TH+2, Wp, Cin_pad) bf16 VMEM scratch (lane-padded window)
    th, w, cout = y_ref.shape
    cin = x_ref.shape[-1]
    row0 = pl.program_id(1) * th
    if th % 8 == 0:
        row0 = pl.multiple_of(row0, 8)

    # Stage the (TH+2)-row window into a zeroed, lane-padded VMEM tile.
    xc_ref[...] = jnp.zeros(xc_ref.shape, xc_ref.dtype)
    xc_ref[:, :, 0:cin] = x_ref[pl.ds(row0, th + 2), :, :]

    acc = _im2col_matmul(xc_ref, w1_ref, th, w)            # (m, Cout_pad) f32
    y = jnp.maximum(acc[:, 0:cout] + b1_ref[...], 0.0)     # (m, Cout) f32

    # One-pass partial BatchNorm statistics, finalized between the two calls.
    stats_ref[0:1, :] = jnp.sum(y, axis=0, keepdims=True)
    stats_ref[1:2, :] = jnp.sum(y * y, axis=0, keepdims=True)
    y_ref[...] = y.reshape(th, w, cout).astype(y_ref.dtype)


def conv2_kernel(y_ref, w2_ref, b2_ref, scale_ref, shift_ref, out_ref, yc_ref):
    # y_ref  : (H, W, Cout) bf16 — full pre-BN image, resident across h steps
    # out_ref: (TH, W, Cout) f32
    # yc_ref : (TH+2, W+2, Cout_pad) bf16 VMEM scratch (BN'd, padded tile)
    th, w, cout = out_ref.shape
    n_h = pl.num_programs(1)
    h = pl.program_id(1)
    row0 = h * th
    if th % 8 == 0:
        row0 = pl.multiple_of(row0, 8)

    scale = scale_ref[...]
    shift = shift_ref[...]

    def bn(rows):  # fused BatchNorm affine + bf16 cast
        return (rows.astype(jnp.float32) * scale + shift).astype(yc_ref.dtype)

    # Zero the padded tile (borders stay zero: conv2 pads the *BN output*),
    # then fill interior rows and the 1-row halos from neighbouring tiles.
    yc_ref[...] = jnp.zeros(yc_ref.shape, yc_ref.dtype)
    yc_ref[1:th + 1, 1:w + 1, 0:cout] = bn(y_ref[pl.ds(row0, th), :, :])

    @pl.when(h > 0)
    def _():
        yc_ref[0:1, 1:w + 1, 0:cout] = bn(y_ref[pl.ds(row0 - 1, 1), :, :])

    @pl.when(h < n_h - 1)
    def _():
        yc_ref[th + 1:th + 2, 1:w + 1, 0:cout] = bn(
            y_ref[pl.ds(row0 + th, 1), :, :])

    acc = _im2col_matmul(yc_ref, w2_ref, th, w)             # (m, Cout_pad) f32
    res = jnp.maximum(acc[:, 0:cout] + b2_ref[...], 0.0)
    out_ref[...] = res.reshape(th, w, cout).astype(out_ref.dtype)


def block_forward(x_nchw, params, *, tile_h=8):
    """Forward pass of `Block`. Input/output in NCHW (PyTorch convention)."""
    x = jnp.transpose(x_nchw, (0, 2, 3, 1)).astype(jnp.float32)   # NCHW -> NHWC
    n, h, w, cin = x.shape
    cout = params["w1"].shape[-1]
    cin_p = _round_up(cin, LANE)
    cout_p = _round_up(cout, LANE)
    th = tile_h if h % tile_h == 0 else h       # TH multiple of 8 when possible
    n_h = h // th
    hp, wp = h + 2, w + 2

    # Only the weights are pre-padded to lane width (taps fused into K).
    w1 = _pad_axis(_pad_axis(params["w1"], 2, cin_p), 3, cout_p)
    w1r = w1.reshape(9 * cin_p, cout_p).astype(jnp.bfloat16)
    w2 = _pad_axis(_pad_axis(params["w2"], 2, cout_p), 3, cout_p)
    w2r = w2.reshape(9 * cout_p, cout_p).astype(jnp.bfloat16)
    b1 = params["b1"].astype(jnp.float32)                          # (1, Cout)
    b2 = params["b2"].astype(jnp.float32)

    # Spatial zero-pad only (true Cin channels kept in HBM), bf16 for the MXU.
    xp = jnp.pad(x, ((0, 0), (1, 1), (1, 1), (0, 0))).astype(jnp.bfloat16)

    # Default scoped VMEM (16/32 MiB) is ample for these tile sizes on
    # v5e/v6e/v7x; for large H*W pick TH so the (TH*W, 9*128) bf16 slab plus
    # double-buffered blocks stay well under the per-generation limit.
    cp = pltpu.CompilerParams(dimension_semantics=("parallel", "arbitrary"))

    # --- call 1: conv1 + bias + ReLU + per-(image, h-tile) BN partials -------
    y1, stats = pl.pallas_call(
        conv1_stats_kernel,
        grid=(n, n_h),
        in_specs=[
            pl.BlockSpec((None, hp, wp, cin), lambda i, j: (i, 0, 0, 0)),
            pl.BlockSpec((9 * cin_p, cout_p), lambda i, j: (0, 0)),
            pl.BlockSpec((1, cout), lambda i, j: (0, 0)),
        ],
        out_specs=[
            pl.BlockSpec((None, th, w, cout), lambda i, j: (i, j, 0, 0)),
            pl.BlockSpec((None, None, 2, cout), lambda i, j: (i, j, 0, 0)),
        ],
        out_shape=[
            jax.ShapeDtypeStruct((n, h, w, cout), jnp.bfloat16),
            jax.ShapeDtypeStruct((n, n_h, 2, cout), jnp.float32),
        ],
        scratch_shapes=[pltpu.VMEM((th + 2, wp, cin_p), jnp.bfloat16)],
        compiler_params=cp,
    )(xp, w1r, b1)

    # --- BatchNorm2d finalize (training batch statistics), tiny XLA ops ------
    count = n * h * w
    total = jnp.sum(stats, axis=(0, 1))                            # (2, Cout)
    mean = total[0] / count
    var = jnp.maximum(total[1] / count - mean * mean, 0.0)         # biased var
    scale_v = params["gamma"][0] * jax.lax.rsqrt(var + BN_EPS)
    shift_v = params["beta"][0] - mean * scale_v
    scale = scale_v.reshape(1, cout).astype(jnp.float32)
    shift = shift_v.reshape(1, cout).astype(jnp.float32)

    # --- call 2: fused BN affine + pad + conv2 + bias + ReLU -----------------
    out = pl.pallas_call(
        conv2_kernel,
        grid=(n, n_h),
        in_specs=[
            pl.BlockSpec((None, h, w, cout), lambda i, j: (i, 0, 0, 0)),
            pl.BlockSpec((9 * cout_p, cout_p), lambda i, j: (0, 0)),
            pl.BlockSpec((1, cout), lambda i, j: (0, 0)),
            pl.BlockSpec((1, cout), lambda i, j: (0, 0)),
            pl.BlockSpec((1, cout), lambda i, j: (0, 0)),
        ],
        out_specs=pl.BlockSpec((None, th, w, cout), lambda i, j: (i, j, 0, 0)),
        out_shape=jax.ShapeDtypeStruct((n, h, w, cout), jnp.float32),
        scratch_shapes=[pltpu.VMEM((th + 2, wp, cout_p), jnp.bfloat16)],
        compiler_params=cp,
    )(y1, w2r, b2, scale, shift)

    return jnp.transpose(out, (0, 3, 1, 2))                        # NHWC -> NCHW


def block_reference(x_nchw, params):
    """Pure-JAX f32 reference (same math as the PyTorch module, training BN)."""
    x = jnp.transpose(x_nchw, (0, 2, 3, 1)).astype(jnp.float32)
    dn1 = jax.lax.conv_dimension_numbers(x.shape, params["w1"].shape,
                                         ("NHWC", "HWIO", "NHWC"))
    y = jax.lax.conv_general_dilated(x, params["w1"], (1, 1), "SAME",
                                     dimension_numbers=dn1) + params["b1"]
    y = jnp.maximum(y, 0.0)
    mean = jnp.mean(y, axis=(0, 1, 2), keepdims=True)
    var = jnp.mean((y - mean) ** 2, axis=(0, 1, 2), keepdims=True)
    y = (y - mean) / jnp.sqrt(var + BN_EPS) * params["gamma"] + params["beta"]
    dn2 = jax.lax.conv_dimension_numbers(y.shape, params["w2"].shape,
                                         ("NHWC", "HWIO", "NHWC"))
    y = jax.lax.conv_general_dilated(y, params["w2"], (1, 1), "SAME",
                                     dimension_numbers=dn2) + params["b2"]
    y = jnp.maximum(y, 0.0)
    return jnp.transpose(y, (0, 3, 1, 2))


def init_params(in_ch, out_ch, key):
    k1, k2, k3, k4 = jax.random.split(key, 4)
    return {
        "w1": jax.random.normal(k1, (3, 3, in_ch, out_ch), jnp.float32) * 0.1,
        "b1": jax.random.normal(k2, (1, out_ch), jnp.float32) * 0.1,
        "gamma": jnp.ones((1, out_ch), jnp.float32),   # BatchNorm2d weight init
        "beta": jnp.zeros((1, out_ch), jnp.float32),   # BatchNorm2d bias init
        "w2": jax.random.normal(k3, (3, 3, out_ch, out_ch), jnp.float32) * 0.1,
        "b2": jax.random.normal(k4, (1, out_ch), jnp.float32) * 0.1,
    }


if __name__ == "__main__":
    in_ch, out_ch = 4, 8
    N, H, W = 2, 16, 16

    root = jax.random.PRNGKey(0)
    kx, kp = jax.random.split(root)
    x = jax.random.normal(kx, (N, in_ch, H, W), jnp.float32)       # NCHW input
    params = init_params(in_ch, out_ch, kp)

    fwd = jax.jit(block_forward)
    out = jax.block_until_ready(fwd(x, params))
    ref = jax.block_until_ready(block_reference(x, params))

    assert out.shape == (N, out_ch, H, W), out.shape
    # Kernel uses bf16 matmul inputs / bf16 inter-stage activations (f32
    # accumulation & statistics); reference is pure f32.
    max_diff = float(jnp.max(jnp.abs(out - ref)))
    assert max_diff < 1e-1, f"mismatch vs reference: {max_diff}"
    print("KERNEL_OK")
</pallas_src>

<mosaic_0001>
module attributes {stable_mosaic.version = 11 : i64} {
  func.func @conv1_stats_kernel(%arg0: i32, %arg1: i32, %arg2: memref<1x18x18x4xbf16, #tpu.memory_space<vmem>>, %arg3: memref<1152x128xbf16, #tpu.memory_space<vmem>>, %arg4: memref<1x8xf32, #tpu.memory_space<vmem>>, %arg5: memref<1x8x16x8xbf16, #tpu.memory_space<vmem>>, %arg6: memref<1x1x2x8xf32, #tpu.memory_space<vmem>>, %arg7: memref<10x18x128xbf16, #tpu.memory_space<vmem>>) attributes {dimension_semantics = [#tpu.dimension_semantics<parallel>, #tpu.dimension_semantics<arbitrary>], iteration_bounds = array<i64: 2, 2>, scalar_prefetch = 0 : i64, scratch_operands = 1 : i64, tpu.core_type = #tpu.core_type<tc>, window_params = [{transform_indices = @transform_0, window_bounds = array<i64: 1, 18, 18, 4>}, {pipeline_mode = #tpu.pipeline_mode<synchronous>, transform_indices = @transform_1, window_bounds = array<i64: 1152, 128>}, {pipeline_mode = #tpu.pipeline_mode<synchronous>, transform_indices = @transform_2, window_bounds = array<i64: 1, 8>}, {transform_indices = @transform_3, window_bounds = array<i64: 1, 8, 16, 8>}, {transform_indices = @transform_4, window_bounds = array<i64: 1, 1, 2, 8>}]} {
    %c8_i32 = arith.constant 8 : i32
    %0 = arith.muli %arg1, %c8_i32 : i32
    %1 = tpu.assume_multiple %0, 8 : i32
    %cst = arith.constant 0.000000e+00 : bf16
    %2 = vector.broadcast %cst : bf16 to vector<10x18x128xbf16>
    %c0 = arith.constant 0 : index
    %c0_0 = arith.constant 0 : index
    %c0_1 = arith.constant 0 : index
    %3 = vector.load %arg7[%c0, %c0_0, %c0_1] : memref<10x18x128xbf16, #tpu.memory_space<vmem>>, vector<10x18x128xbf16>
    tpu.vector_store %arg7[%c0, %c0_0, %c0_1], %2 {strides = array<i32>} : memref<10x18x128xbf16, #tpu.memory_space<vmem>>, vector<10x18x128xbf16>,
    %c0_2 = arith.constant 0 : index
    %4 = arith.index_cast %1 : i32 to index
    %c0_3 = arith.constant 0 : index
    %c0_4 = arith.constant 0 : index
    %5 = vector.load %arg2[%c0_2, %4, %c0_3, %c0_4] : memref<1x18x18x4xbf16, #tpu.memory_space<vmem>>, vector<1x10x18x4xbf16>
    %6 = vector.shape_cast %5 : vector<1x10x18x4xbf16> to vector<10x18x4xbf16>
    %c0_5 = arith.constant 0 : index
    %c0_6 = arith.constant 0 : index
    %c0_7 = arith.constant 0 : index
    %7 = vector.load %arg7[%c0_5, %c0_6, %c0_7] : memref<10x18x128xbf16, #tpu.memory_space<vmem>>, vector<10x18x4xbf16>
    tpu.vector_store %arg7[%c0_5, %c0_6, %c0_7], %6 {strides = array<i32>} : memref<10x18x128xbf16, #tpu.memory_space<vmem>>, vector<10x18x4xbf16>,
    %c0_8 = arith.constant 0 : index
    %c0_9 = arith.constant 0 : index
    %c0_10 = arith.constant 0 : index
    %8 = vector.load %arg7[%c0_8, %c0_9, %c0_10] : memref<10x18x128xbf16, #tpu.memory_space<vmem>>, vector<8x16x128xbf16>
    %9 = vector.shape_cast %8 : vector<8x16x128xbf16> to vector<128x128xbf16>
    %c0_11 = arith.constant 0 : index
    %c1 = arith.constant 1 : index
    %c0_12 = arith.constant 0 : index
    %10 = vector.load %arg7[%c0_11, %c1, %c0_12] : memref<10x18x128xbf16, #tpu.memory_space<vmem>>, vector<8x16x128xbf16>
    %11 = vector.shape_cast %10 : vector<8x16x128xbf16> to vector<128x128xbf16>
    %c0_13 = arith.constant 0 : index
    %c2 = arith.constant 2 : index
    %c0_14 = arith.constant 0 : index
    %12 = vector.load %arg7[%c0_13, %c2, %c0_14] : memref<10x18x128xbf16, #tpu.memory_space<vmem>>, vector<8x16x128xbf16>
    %13 = vector.shape_cast %12 : vector<8x16x128xbf16> to vector<128x128xbf16>
    %c1_15 = arith.constant 1 : index
    %c0_16 = arith.constant 0 : index
    %c0_17 = arith.constant 0 : index
    %14 = vector.load %arg7[%c1_15, %c0_16, %c0_17] : memref<10x18x128xbf16, #tpu.memory_space<vmem>>, vector<8x16x128xbf16>
    %15 = vector.shape_cast %14 : vector<8x16x128xbf16> to vector<128x128xbf16>
    %c1_18 = arith.constant 1 : index
    %c1_19 = arith.constant 1 : index
    %c0_20 = arith.constant 0 : index
    %16 = vector.load %arg7[%c1_18, %c1_19, %c0_20] : memref<10x18x128xbf16, #tpu.memory_space<vmem>>, vector<8x16x128xbf16>
    %17 = vector.shape_cast %16 : vector<8x16x128xbf16> to vector<128x128xbf16>
    %c1_21 = arith.constant 1 : index
    %c2_22 = arith.constant 2 : index
    %c0_23 = arith.constant 0 : index
    %18 = vector.load %arg7[%c1_21, %c2_22, %c0_23] : memref<10x18x128xbf16, #tpu.memory_space<vmem>>, vector<8x16x128xbf16>
    %19 = vector.shape_cast %18 : vector<8x16x128xbf16> to vector<128x128xbf16>
    %c2_24 = arith.constant 2 : index
    %c0_25 = arith.constant 0 : index
    %c0_26 = arith.constant 0 : index
    %20 = vector.load %arg7[%c2_24, %c0_25, %c0_26] : memref<10x18x128xbf16, #tpu.memory_space<vmem>>, vector<8x16x128xbf16>
    %21 = vector.shape_cast %20 : vector<8x16x128xbf16> to vector<128x128xbf16>
    %c2_27 = arith.constant 2 : index
    %c1_28 = arith.constant 1 : index
    %c0_29 = arith.constant 0 : index
    %22 = vector.load %arg7[%c2_27, %c1_28, %c0_29] : memref<10x18x128xbf16, #tpu.memory_space<vmem>>, vector<8x16x128xbf16>
    %23 = vector.shape_cast %22 : vector<8x16x128xbf16> to vector<128x128xbf16>
    %c2_30 = arith.constant 2 : index
    %c2_31 = arith.constant 2 : index
    %c0_32 = arith.constant 0 : index
    %24 = vector.load %arg7[%c2_30, %c2_31, %c0_32] : memref<10x18x128xbf16, #tpu.memory_space<vmem>>, vector<8x16x128xbf16>
    %25 = vector.shape_cast %24 : vector<8x16x128xbf16> to vector<128x128xbf16>
    %26 = tpu.concatenate %9, %11, %13, %15, %17, %19, %21, %23, %25 in 1 : vector<128x128xbf16>, vector<128x128xbf16>, vector<128x128xbf16>, vector<128x128xbf16>, vector<128x128xbf16>, vector<128x128xbf16>, vector<128x128xbf16>, vector<128x128xbf16>, vector<128x128xbf16> -> vector<128x1152xbf16>
    %c0_33 = arith.constant 0 : index
    %c0_34 = arith.constant 0 : index
    %27 = vector.load %arg3[%c0_33, %c0_34] : memref<1152x128xbf16, #tpu.memory_space<vmem>>, vector<1152x128xbf16>
    %cst_35 = arith.constant dense<0.000000e+00> : vector<128x128xf32>
    %28 = tpu.matmul %26, %27, %cst_35 {dimension_numbers = #tpu.dot_dimension_numbers<[1], [0], [0], [1], [0, 0, 1, 1], [], []>} : vector<128x1152xbf16>, vector<1152x128xbf16>, vector<128x128xf32> -> vector<128x128xf32>
    %29 = vector.extract_strided_slice %28 {offsets = [0, 0], sizes = [128, 8], strides = [1, 1]} : vector<128x128xf32> to vector<128x8xf32>
    %c0_36 = arith.constant 0 : index
    %c0_37 = arith.constant 0 : index
    %30 = vector.load %arg4[%c0_36, %c0_37] : memref<1x8xf32, #tpu.memory_space<vmem>>, vector<1x8xf32>
    %31 = vector.broadcast %30 : vector<1x8xf32> to vector<128x8xf32>
    %32 = arith.addf %29, %31 : vector<128x8xf32>
    %cst_38 = arith.constant 0.000000e+00 : f32
    %33 = vector.broadcast %cst_38 : f32 to vector<128x8xf32>
    %34 = arith.maximumf %32, %33 : vector<128x8xf32>
    %cst_39 = arith.constant dense<0.000000e+00> : vector<8xf32>
    %35 = vector.multi_reduction <add>, %34, %cst_39 [0] : vector<128x8xf32> to vector<8xf32>
    %36 = vector.shape_cast %35 : vector<8xf32> to vector<1x8xf32>
    %c0_40 = arith.constant 0 : index
    %c0_41 = arith.constant 0 : index
    %c0_42 = arith.constant 0 : index
    %c0_43 = arith.constant 0 : index
    %37 = vector.load %arg6[%c0_40, %c0_41, %c0_42, %c0_43] : memref<1x1x2x8xf32, #tpu.memory_space<vmem>>, vector<1x1x1x8xf32>
    %38 = vector.shape_cast %37 : vector<1x1x1x8xf32> to vector<1x8xf32>
    %39 = vector.shape_cast %36 : vector<1x8xf32> to vector<1x1x1x8xf32>
    tpu.vector_store %arg6[%c0_40, %c0_41, %c0_42, %c0_43], %39 {strides = array<i32>} : memref<1x1x2x8xf32, #tpu.memory_space<vmem>>, vector<1x1x1x8xf32>,
    %40 = arith.mulf %34, %34 : vector<128x8xf32>
    %cst_44 = arith.constant dense<0.000000e+00> : vector<8xf32>
    %41 = vector.multi_reduction <add>, %40, %cst_44 [0] : vector<128x8xf32> to vector<8xf32>
    %42 = vector.shape_cast %41 : vector<8xf32> to vector<1x8xf32>
    %c0_45 = arith.constant 0 : index
    %c0_46 = arith.constant 0 : index
    %c1_47 = arith.constant 1 : index
    %c0_48 = arith.constant 0 : index
    %43 = vector.load %arg6[%c0_45, %c0_46, %c1_47, %c0_48] : memref<1x1x2x8xf32, #tpu.memory_space<vmem>>, vector<1x1x1x8xf32>
    %44 = vector.shape_cast %43 : vector<1x1x1x8xf32> to vector<1x8xf32>
    %45 = vector.shape_cast %42 : vector<1x8xf32> to vector<1x1x1x8xf32>
    tpu.vector_store %arg6[%c0_45, %c0_46, %c1_47, %c0_48], %45 {strides = array<i32>} : memref<1x1x2x8xf32, #tpu.memory_space<vmem>>, vector<1x1x1x8xf32>,
    %46 = vector.shape_cast %34 : vector<128x8xf32> to vector<8x16x8xf32>
    %47 = arith.truncf %46 : vector<8x16x8xf32> to vector<8x16x8xbf16>
    %c0_49 = arith.constant 0 : index
    %c0_50 = arith.constant 0 : index
    %c0_51 = arith.constant 0 : index
    %c0_52 = arith.constant 0 : index
    %48 = vector.load %arg5[%c0_49, %c0_50, %c0_51, %c0_52] : memref<1x8x16x8xbf16, #tpu.memory_space<vmem>>, vector<1x8x16x8xbf16>
    %49 = vector.shape_cast %48 : vector<1x8x16x8xbf16> to vector<8x16x8xbf16>
    %50 = vector.shape_cast %47 : vector<8x16x8xbf16> to vector<1x8x16x8xbf16>
    tpu.vector_store %arg5[%c0_49, %c0_50, %c0_51, %c0_52], %50 {strides = array<i32>} : memref<1x8x16x8xbf16, #tpu.memory_space<vmem>>, vector<1x8x16x8xbf16>,
    return
  }
  func.func @transform_0(%arg0: i32, %arg1: i32) -> (i32, i32, i32, i32) {
    %c0_i32 = arith.constant 0 : i32
    %c0_i32_0 = arith.constant 0 : i32
    %c0_i32_1 = arith.constant 0 : i32
    %c0_i32_2 = arith.constant 0 : i32
    return %arg0, %c0_i32, %c0_i32_0, %c0_i32_1 : i32, i32, i32, i32
  }
  func.func @transform_1(%arg0: i32, %arg1: i32) -> (i32, i32) {
    %c0_i32 = arith.constant 0 : i32
    %c0_i32_0 = arith.constant 0 : i32
    %c0_i32_1 = arith.constant 0 : i32
    return %c0_i32, %c0_i32_0 : i32, i32
  }
  func.func @transform_2(%arg0: i32, %arg1: i32) -> (i32, i32) {
    %c0_i32 = arith.constant 0 : i32
    %c0_i32_0 = arith.constant 0 : i32
    %c0_i32_1 = arith.constant 0 : i32
    return %c0_i32, %c0_i32_0 : i32, i32
  }
  func.func @transform_3(%arg0: i32, %arg1: i32) -> (i32, i32, i32, i32) {
    %c0_i32 = arith.constant 0 : i32
    %c0_i32_0 = arith.constant 0 : i32
    %c0_i32_1 = arith.constant 0 : i32
    return %arg0, %arg1, %c0_i32, %c0_i32_0 : i32, i32, i32, i32
  }
  func.func @transform_4(%arg0: i32, %arg1: i32) -> (i32, i32, i32, i32) {
    %c0_i32 = arith.constant 0 : i32
    %c0_i32_0 = arith.constant 0 : i32
    %c0_i32_1 = arith.constant 0 : i32
    return %arg0, %arg1, %c0_i32, %c0_i32_0 : i32, i32, i32, i32
  }
}

module attributes {stable_mosaic.version = 11 : i64} {
  func.func @conv2_kernel(%arg0: i32, %arg1: i32, %arg2: memref<1x16x16x8xbf16, #tpu.memory_space<vmem>>, %arg3: memref<1152x128xbf16, #tpu.memory_space<vmem>>, %arg4: memref<1x8xf32, #tpu.memory_space<vmem>>, %arg5: memref<1x8xf32, #tpu.memory_space<vmem>>, %arg6: memref<1x8xf32, #tpu.memory_space<vmem>>, %arg7: memref<1x8x16x8xf32, #tpu.memory_space<vmem>>, %arg8: memref<10x18x128xbf16, #tpu.memory_space<vmem>>) attributes {dimension_semantics = [#tpu.dimension_semantics<parallel>, #tpu.dimension_semantics<arbitrary>], iteration_bounds = array<i64: 2, 2>, scalar_prefetch = 0 : i64, scratch_operands = 1 : i64, tpu.core_type = #tpu.core_type<tc>, window_params = [{transform_indices = @transform_0, window_bounds = array<i64: 1, 16, 16, 8>}, {pipeline_mode = #tpu.pipeline_mode<synchronous>, transform_indices = @transform_1, window_bounds = array<i64: 1152, 128>}, {pipeline_mode = #tpu.pipeline_mode<synchronous>, transform_indices = @transform_2, window_bounds = array<i64: 1, 8>}, {pipeline_mode = #tpu.pipeline_mode<synchronous>, transform_indices = @transform_3, window_bounds = array<i64: 1, 8>}, {pipeline_mode = #tpu.pipeline_mode<synchronous>, transform_indices = @transform_4, window_bounds = array<i64: 1, 8>}, {transform_indices = @transform_5, window_bounds = array<i64: 1, 8, 16, 8>}]} {
    %c8_i32 = arith.constant 8 : i32
    %0 = arith.muli %arg1, %c8_i32 : i32
    %1 = tpu.assume_multiple %0, 8 : i32
    %c0 = arith.constant 0 : index
    %c0_0 = arith.constant 0 : index
    %2 = vector.load %arg5[%c0, %c0_0] : memref<1x8xf32, #tpu.memory_space<vmem>>, vector<1x8xf32>
    %c0_1 = arith.constant 0 : index
    %c0_2 = arith.constant 0 : index
    %3 = vector.load %arg6[%c0_1, %c0_2] : memref<1x8xf32, #tpu.memory_space<vmem>>, vector<1x8xf32>
    %cst = arith.constant 0.000000e+00 : bf16
    %4 = vector.broadcast %cst : bf16 to vector<10x18x128xbf16>
    %c0_3 = arith.constant 0 : index
    %c0_4 = arith.constant 0 : index
    %c0_5 = arith.constant 0 : index
    %5 = vector.load %arg8[%c0_3, %c0_4, %c0_5] : memref<10x18x128xbf16, #tpu.memory_space<vmem>>, vector<10x18x128xbf16>
    tpu.vector_store %arg8[%c0_3, %c0_4, %c0_5], %4 {strides = array<i32>} : memref<10x18x128xbf16, #tpu.memory_space<vmem>>, vector<10x18x128xbf16>,
    %c0_6 = arith.constant 0 : index
    %6 = arith.index_cast %1 : i32 to index
    %c0_7 = arith.constant 0 : index
    %c0_8 = arith.constant 0 : index
    %7 = vector.load %arg2[%c0_6, %6, %c0_7, %c0_8] : memref<1x16x16x8xbf16, #tpu.memory_space<vmem>>, vector<1x8x16x8xbf16>
    %8 = vector.shape_cast %7 : vector<1x8x16x8xbf16> to vector<8x16x8xbf16>
    %9 = arith.extf %8 : vector<8x16x8xbf16> to vector<8x16x8xf32>
    %10 = vector.shape_cast %2 : vector<1x8xf32> to vector<1x1x8xf32>
    %11 = vector.broadcast %10 : vector<1x1x8xf32> to vector<8x16x8xf32>
    %12 = arith.mulf %9, %11 : vector<8x16x8xf32>
    %13 = vector.shape_cast %3 : vector<1x8xf32> to vector<1x1x8xf32>
    %14 = vector.broadcast %13 : vector<1x1x8xf32> to vector<8x16x8xf32>
    %15 = arith.addf %12, %14 : vector<8x16x8xf32>
    %16 = arith.truncf %15 : vector<8x16x8xf32> to vector<8x16x8xbf16>
    %c1 = arith.constant 1 : index
    %c1_9 = arith.constant 1 : index
    %c0_10 = arith.constant 0 : index
    %17 = vector.load %arg8[%c1, %c1_9, %c0_10] : memref<10x18x128xbf16, #tpu.memory_space<vmem>>, vector<8x16x8xbf16>
    tpu.vector_store %arg8[%c1, %c1_9, %c0_10], %16 {strides = array<i32>} : memref<10x18x128xbf16, #tpu.memory_space<vmem>>, vector<8x16x8xbf16>,
    %c0_i32 = arith.constant 0 : i32
    %18 = arith.cmpi sgt, %arg1, %c0_i32 : i32
    %19 = arith.extui %18 : i1 to i32
    %c0_i32_11 = arith.constant 0 : i32
    %20 = arith.cmpi ne, %19, %c0_i32_11 : i32
    scf.if %20 {
      %c1_i32_49 = arith.constant 1 : i32
      %55 = arith.subi %1, %c1_i32_49 : i32
      %c0_50 = arith.constant 0 : index
      %56 = arith.index_cast %55 : i32 to index
      %c0_51 = arith.constant 0 : index
      %c0_52 = arith.constant 0 : index
      %57 = vector.load %arg2[%c0_50, %56, %c0_51, %c0_52] : memref<1x16x16x8xbf16, #tpu.memory_space<vmem>>, vector<1x1x16x8xbf16>
      %58 = vector.shape_cast %57 : vector<1x1x16x8xbf16> to vector<1x16x8xbf16>
      %59 = arith.extf %58 : vector<1x16x8xbf16> to vector<1x16x8xf32>
      %60 = vector.shape_cast %2 : vector<1x8xf32> to vector<1x1x8xf32>
      %61 = vector.broadcast %60 : vector<1x1x8xf32> to vector<1x16x8xf32>
      %62 = arith.mulf %59, %61 : vector<1x16x8xf32>
      %63 = vector.shape_cast %3 : vector<1x8xf32> to vector<1x1x8xf32>
      %64 = vector.broadcast %63 : vector<1x1x8xf32> to vector<1x16x8xf32>
      %65 = arith.addf %62, %64 : vector<1x16x8xf32>
      %66 = arith.truncf %65 : vector<1x16x8xf32> to vector<1x16x8xbf16>
      %c0_53 = arith.constant 0 : index
      %c1_54 = arith.constant 1 : index
      %c0_55 = arith.constant 0 : index
      %67 = vector.load %arg8[%c0_53, %c1_54, %c0_55] : memref<10x18x128xbf16, #tpu.memory_space<vmem>>, vector<1x16x8xbf16>
      tpu.vector_store %arg8[%c0_53, %c1_54, %c0_55], %66 {strides = array<i32>} : memref<10x18x128xbf16, #tpu.memory_space<vmem>>, vector<1x16x8xbf16>,
    } else {
    }
    %c1_i32 = arith.constant 1 : i32
    %21 = arith.cmpi slt, %arg1, %c1_i32 : i32
    %22 = arith.extui %21 : i1 to i32
    %c0_i32_12 = arith.constant 0 : i32
    %23 = arith.cmpi ne, %22, %c0_i32_12 : i32
    scf.if %23 {
      %c8_i32_49 = arith.constant 8 : i32
      %55 = arith.addi %1, %c8_i32_49 : i32
      %c0_50 = arith.constant 0 : index
      %56 = arith.index_cast %55 : i32 to index
      %c0_51 = arith.constant 0 : index
      %c0_52 = arith.constant 0 : index
      %57 = vector.load %arg2[%c0_50, %56, %c0_51, %c0_52] : memref<1x16x16x8xbf16, #tpu.memory_space<vmem>>, vector<1x1x16x8xbf16>
      %58 = vector.shape_cast %57 : vector<1x1x16x8xbf16> to vector<1x16x8xbf16>
      %59 = arith.extf %58 : vector<1x16x8xbf16> to vector<1x16x8xf32>
      %60 = vector.shape_cast %2 : vector<1x8xf32> to vector<1x1x8xf32>
      %61 = vector.broadcast %60 : vector<1x1x8xf32> to vector<1x16x8xf32>
      %62 = arith.mulf %59, %61 : vector<1x16x8xf32>
      %63 = vector.shape_cast %3 : vector<1x8xf32> to vector<1x1x8xf32>
      %64 = vector.broadcast %63 : vector<1x1x8xf32> to vector<1x16x8xf32>
      %65 = arith.addf %62, %64 : vector<1x16x8xf32>
      %66 = arith.truncf %65 : vector<1x16x8xf32> to vector<1x16x8xbf16>
      %c9 = arith.constant 9 : index
      %c1_53 = arith.constant 1 : index
      %c0_54 = arith.constant 0 : index
      %67 = vector.load %arg8[%c9, %c1_53, %c0_54] : memref<10x18x128xbf16, #tpu.memory_space<vmem>>, vector<1x16x8xbf16>
      tpu.vector_store %arg8[%c9, %c1_53, %c0_54], %66 {strides = array<i32>} : memref<10x18x128xbf16, #tpu.memory_space<vmem>>, vector<1x16x8xbf16>,
    } else {
    }
    %c0_13 = arith.constant 0 : index
    %c0_14 = arith.constant 0 : index
    %c0_15 = arith.constant 0 : index
    %24 = vector.load %arg8[%c0_13, %c0_14, %c0_15] : memref<10x18x128xbf16, #tpu.memory_space<vmem>>, vector<8x16x128xbf16>
    %25 = vector.shape_cast %24 : vector<8x16x128xbf16> to vector<128x128xbf16>
    %c0_16 = arith.constant 0 : index
    %c1_17 = arith.constant 1 : index
    %c0_18 = arith.constant 0 : index
    %26 = vector.load %arg8[%c0_16, %c1_17, %c0_18] : memref<10x18x128xbf16, #tpu.memory_space<vmem>>, vector<8x16x128xbf16>
    %27 = vector.shape_cast %26 : vector<8x16x128xbf16> to vector<128x128xbf16>
    %c0_19 = arith.constant 0 : index
    %c2 = arith.constant 2 : index
    %c0_20 = arith.constant 0 : index
    %28 = vector.load %arg8[%c0_19, %c2, %c0_20] : memref<10x18x128xbf16, #tpu.memory_space<vmem>>, vector<8x16x128xbf16>
    %29 = vector.shape_cast %28 : vector<8x16x128xbf16> to vector<128x128xbf16>
    %c1_21 = arith.constant 1 : index
    %c0_22 = arith.constant 0 : index
    %c0_23 = arith.constant 0 : index
    %30 = vector.load %arg8[%c1_21, %c0_22, %c0_23] : memref<10x18x128xbf16, #tpu.memory_space<vmem>>, vector<8x16x128xbf16>
    %31 = vector.shape_cast %30 : vector<8x16x128xbf16> to vector<128x128xbf16>
    %c1_24 = arith.constant 1 : index
    %c1_25 = arith.constant 1 : index
    %c0_26 = arith.constant 0 : index
    %32 = vector.load %arg8[%c1_24, %c1_25, %c0_26] : memref<10x18x128xbf16, #tpu.memory_space<vmem>>, vector<8x16x128xbf16>
    %33 = vector.shape_cast %32 : vector<8x16x128xbf16> to vector<128x128xbf16>
    %c1_27 = arith.constant 1 : index
    %c2_28 = arith.constant 2 : index
    %c0_29 = arith.constant 0 : index
    %34 = vector.load %arg8[%c1_27, %c2_28, %c0_29] : memref<10x18x128xbf16, #tpu.memory_space<vmem>>, vector<8x16x128xbf16>
    %35 = vector.shape_cast %34 : vector<8x16x128xbf16> to vector<128x128xbf16>
    %c2_30 = arith.constant 2 : index
    %c0_31 = arith.constant 0 : index
    %c0_32 = arith.constant 0 : index
    %36 = vector.load %arg8[%c2_30, %c0_31, %c0_32] : memref<10x18x128xbf16, #tpu.memory_space<vmem>>, vector<8x16x128xbf16>
    %37 = vector.shape_cast %36 : vector<8x16x128xbf16> to vector<128x128xbf16>
    %c2_33 = arith.constant 2 : index
    %c1_34 = arith.constant 1 : index
    %c0_35 = arith.constant 0 : index
    %38 = vector.load %arg8[%c2_33, %c1_34, %c0_35] : memref<10x18x128xbf16, #tpu.memory_space<vmem>>, vector<8x16x128xbf16>
    %39 = vector.shape_cast %38 : vector<8x16x128xbf16> to vector<128x128xbf16>
    %c2_36 = arith.constant 2 : index
    %c2_37 = arith.constant 2 : index
    %c0_38 = arith.constant 0 : index
    %40 = vector.load %arg8[%c2_36, %c2_37, %c0_38] : memref<10x18x128xbf16, #tpu.memory_space<vmem>>, vector<8x16x128xbf16>
    %41 = vector.shape_cast %40 : vector<8x16x128xbf16> to vector<128x128xbf16>
    %42 = tpu.concatenate %25, %27, %29, %31, %33, %35, %37, %39, %41 in 1 : vector<128x128xbf16>, vector<128x128xbf16>, vector<128x128xbf16>, vector<128x128xbf16>, vector<128x128xbf16>, vector<128x128xbf16>, vector<128x128xbf16>, vector<128x128xbf16>, vector<128x128xbf16> -> vector<128x1152xbf16>
    %c0_39 = arith.constant 0 : index
    %c0_40 = arith.constant 0 : index
    %43 = vector.load %arg3[%c0_39, %c0_40] : memref<1152x128xbf16, #tpu.memory_space<vmem>>, vector<1152x128xbf16>
    %cst_41 = arith.constant dense<0.000000e+00> : vector<128x128xf32>
    %44 = tpu.matmul %42, %43, %cst_41 {dimension_numbers = #tpu.dot_dimension_numbers<[1], [0], [0], [1], [0, 0, 1, 1], [], []>} : vector<128x1152xbf16>, vector<1152x128xbf16>, vector<128x128xf32> -> vector<128x128xf32>
    %45 = vector.extract_strided_slice %44 {offsets = [0, 0], sizes = [128, 8], strides = [1, 1]} : vector<128x128xf32> to vector<128x8xf32>
    %c0_42 = arith.constant 0 : index
    %c0_43 = arith.constant 0 : index
    %46 = vector.load %arg4[%c0_42, %c0_43] : memref<1x8xf32, #tpu.memory_space<vmem>>, vector<1x8xf32>
    %47 = vector.broadcast %46 : vector<1x8xf32> to vector<128x8xf32>
    %48 = arith.addf %45, %47 : vector<128x8xf32>
    %cst_44 = arith.constant 0.000000e+00 : f32
    %49 = vector.broadcast %cst_44 : f32 to vector<128x8xf32>
    %50 = arith.maximumf %48, %49 : vector<128x8xf32>
    %51 = vector.shape_cast %50 : vector<128x8xf32> to vector<8x16x8xf32>
    %c0_45 = arith.constant 0 : index
    %c0_46 = arith.constant 0 : index
    %c0_47 = arith.constant 0 : index
    %c0_48 = arith.constant 0 : index
    %52 = vector.load %arg7[%c0_45, %c0_46, %c0_47, %c0_48] : memref<1x8x16x8xf32, #tpu.memory_space<vmem>>, vector<1x8x16x8xf32>
    %53 = vector.shape_cast %52 : vector<1x8x16x8xf32> to vector<8x16x8xf32>
    %54 = vector.shape_cast %51 : vector<8x16x8xf32> to vector<1x8x16x8xf32>
    tpu.vector_store %arg7[%c0_45, %c0_46, %c0_47, %c0_48], %54 {strides = array<i32>} : memref<1x8x16x8xf32, #tpu.memory_space<vmem>>, vector<1x8x16x8xf32>,
    return
  }
  func.func @transform_0(%arg0: i32, %arg1: i32) -> (i32, i32, i32, i32) {
    %c0_i32 = arith.constant 0 : i32
    %c0_i32_0 = arith.constant 0 : i32
    %c0_i32_1 = arith.constant 0 : i32
    %c0_i32_2 = arith.constant 0 : i32
    return %arg0, %c0_i32, %c0_i32_0, %c0_i32_1 : i32, i32, i32, i32
  }
  func.func @transform_1(%arg0: i32, %arg1: i32) -> (i32, i32) {
    %c0_i32 = arith.constant 0 : i32
    %c0_i32_0 = arith.constant 0 : i32
    %c0_i32_1 = arith.constant 0 : i32
    return %c0_i32, %c0_i32_0 : i32, i32
  }
  func.func @transform_2(%arg0: i32, %arg1: i32) -> (i32, i32) {
    %c0_i32 = arith.constant 0 : i32
    %c0_i32_0 = arith.constant 0 : i32
    %c0_i32_1 = arith.constant 0 : i32
    return %c0_i32, %c0_i32_0 : i32, i32
  }
  func.func @transform_3(%arg0: i32, %arg1: i32) -> (i32, i32) {
    %c0_i32 = arith.constant 0 : i32
    %c0_i32_0 = arith.constant 0 : i32
    %c0_i32_1 = arith.constant 0 : i32
    return %c0_i32, %c0_i32_0 : i32, i32
  }
  func.func @transform_4(%arg0: i32, %arg1: i32) -> (i32, i32) {
    %c0_i32 = arith.constant 0 : i32
    %c0_i32_0 = arith.constant 0 : i32
    %c0_i32_1 = arith.constant 0 : i32
    return %c0_i32, %c0_i32_0 : i32, i32
  }
  func.func @transform_5(%arg0: i32, %arg1: i32) -> (i32, i32, i32, i32) {
    %c0_i32 = arith.constant 0 : i32
    %c0_i32_0 = arith.constant 0 : i32
    %c0_i32_1 = arith.constant 0 : i32
    return %arg0, %arg1, %c0_i32, %c0_i32_0 : i32, i32, i32, i32
  }
}

</mosaic_0001>

<bundles_post_ra>
// kernel: block_forward.2
= control target key start
LH: loop header
LB: loop body
LE: loop exit
PB: predicated region body
PF: predicated region fallthrough
CT: control target
= control target key end

     0   :  { %s3723_s15 = smov 0   ;;  %s3725_s16 = smov 0   ;;  %s4921_s0 = inlined_call_operand.vmem [shape: bf16[2,18,18,4], index: 0, kind: input, shape index: {}]   ;;  %s4922_s1 = inlined_call_operand.vmem [shape: bf16[1152,128], index: 1, kind: input, shape index: {}]   ;;  %s4923_s2 = inlined_call_operand.vmem [shape: f32[1,8], index: 2, kind: input, shape index: {}]   ;;  %s4924_s3 = inlined_call_operand.vmem [shape: bf16[2,16,16,8], index: 3, kind: output, shape index: {0}]   ;;  %s4925_s4 = inlined_call_operand.vmem [shape: f32[2,2,2,8], index: 4, kind: output, shape index: {1}]  }
   0x1   :  { %s3727_s17 = smov 0   ;;  %s3729_s18 = smov 0  }
   0x2   :  { %s3731_s19 = smov 0  }
   0x3 LB: > { %s24_s20 = sadd.s32 1, %s3687_s17  ;;  %s27_s21 = sadd.s32 1, %s3691_s18  ;;  %s3695_s19 = sphi %s3731_s19, %s15_s19   ;;  %s3691_s18 = sphi %s3729_s18, %s4936_s18   ;;  %s3687_s17 = sphi %s3727_s17, %s4935_s17   ;;  %s3683_s16 = sphi %s3725_s16, %s4934_s16   ;;  %s3679_s15 = sphi %s3723_s15, %s4933_s15  }
   0x4   : > { %p25_p0 = scmp.ge.s32.totalorder %s24_s20, 2  ;;  %p2991_p1 = scmp.ge.s32.totalorder %s3695_s19, 1 }
   0x5   : > { %p181_p2 = scmp.lt.s32.totalorder %s3695_s19, 5 }
   0x6   : > { %s4938_s20 = smov (%p25_p0, %s24_s20), 0  ;;  %s4940_s21 = smov (!%p25_p0, %s27_s21), %s3691_s18 }
   0x7   : > { %p182_p3 = pnand %p2991_p1, %p181_p2  ;;  %p29_p4 = scmp.ge.s32.totalorder %s4940_s21, 2 }
   0x8   : > { %v3568_v0 = vld [vmem:[%s4922_s1 + $0x40] sm:$0xff] (!%p182_p3)   ;;  %v3697_v3 = vmov (!%p182_p3), 0   ;;  %v3572_v5 = vld [vmem:[%s4922_s1 + $0x48] sm:$0xff] (!%p182_p3)   ;;  %v3576_v9 = vld [vmem:[%s4922_s1 + $0x50] sm:$0xff] (!%p182_p3)   ;;  %p220_p5 = scmp.lt.s32.totalorder (!%p182_p3), %s3683_s16, 1  ;;  %s3189_s11 = smul.u32 (!%p182_p3), 96, %s3679_s15 }
   0x9   : > { %s4942_s21 = smov (%p29_p4, %s4940_s21), 0  ;;  %185 = sbr.rel (%p182_p3) target bundleno = 460 (0x1cc), region = 32 }
   0xa   : > { %v3569_v1 = vld [vmem:[%s4922_s1 + $0xc0] sm:$0xff] (!%p182_p3)   ;;  %3206 = vmatprep.subr.bf16.mxu0 (!%p182_p3), %v3568_v0  ;;  %246 = vst [vmem:[#allocation2] sm:$0xf] (!%p182_p3), %v3697_v3  ;;  %247 = vst [vmem:[#allocation2 + $0x4] sm:$0xf] (!%p182_p3), %v3697_v3  ;;  %v3573_v6 = vld [vmem:[%s4922_s1 + $0xc8] sm:$0xff] (!%p182_p3)  }
   0xb   : > { %v3570_v2 = vld [vmem:[%s4922_s1] sm:$0xff] (!%p182_p3)   ;;  %248 = vst [vmem:[#allocation2 + $0x8] sm:$0x1] (!%p182_p3), %v3697_v3  ;;  %249 = vst [vmem:[#allocation2 + $0xc] sm:$0xf] (!%p182_p3), %v3697_v3  ;;  %3270 = vmatprep.subr.bf16.mxu1 (!%p182_p3), %v3569_v1  ;;  %v3574_v7 = vld [vmem:[%s4922_s1 + $0x8] sm:$0xff] (!%p182_p3)  }
   0xc   : > { %250 = vst [vmem:[#allocation2 + $0x10] sm:$0xf] (!%p182_p3), %v3697_v3  ;;  %251 = vst [vmem:[#allocation2 + $0x14] sm:$0x1] (!%p182_p3), %v3697_v3  ;;  %v3571_v4 = vld [vmem:[%s4922_s1 + $0x80] sm:$0xff] (!%p182_p3)   ;;  %3207 = vmatpush3.bf16.msra.mxu0 (!%p182_p3), %v3570_v2  ;;  %v3575_v8 = vld [vmem:[%s4922_s1 + $0x88] sm:$0xff] (!%p182_p3)  }
   0xd   : > { %252 = vst [vmem:[#allocation2 + $0x18] sm:$0xf] (!%p182_p3), %v3697_v3  ;;  %253 = vst [vmem:[#allocation2 + $0x1c] sm:$0xf] (!%p182_p3), %v3697_v3  ;;  %3271 = vmatpush3.bf16.msra.mxu1 (!%p182_p3), %v3571_v4  ;;  %3208 = vmatprep.subr.bf16.mxu0 (!%p182_p3), %v3572_v5  ;;  %v3577_v10 = vld [vmem:[%s4922_s1 + $0xd0] sm:$0xff] (!%p182_p3)   ;;  %v3580_v13 = vld [vmem:[%s4922_s1 + $0x58] sm:$0xff] (!%p182_p3)  }
   0xe   : > { %254 = vst [vmem:[#allocation2 + $0x20] sm:$0x1] (!%p182_p3), %v3697_v3  ;;  %255 = vst [vmem:[#allocation2 + $0x24] sm:$0xf] (!%p182_p3), %v3697_v3  ;;  %3272 = vmatprep.subr.bf16.mxu1 (!%p182_p3), %v3573_v6  ;;  %v3578_v11 = vld [vmem:[%s4922_s1 + $0x10] sm:$0xff] (!%p182_p3)   ;;  %v3581_v14 = vld [vmem:[%s4922_s1 + $0xd8] sm:$0xff] (!%p182_p3)  }
   0xf   : > { %256 = vst [vmem:[#allocation2 + $0x28] sm:$0xf] (!%p182_p3), %v3697_v3  ;;  %257 = vst [vmem:[#allocation2 + $0x2c] sm:$0x1] (!%p182_p3), %v3697_v3  ;;  %v3579_v12 = vld [vmem:[%s4922_s1 + $0x90] sm:$0xff] (!%p182_p3)   ;;  %v3582_v15 = vld [vmem:[%s4922_s1 + $0x18] sm:$0xff] (!%p182_p3)  }
  0x10   : > { %258 = vst [vmem:[#allocation2 + $0x30] sm:$0xf] %v3697_v3  ;;  %259 = vst [vmem:[#allocation2 + $0x34] sm:$0xf] %v3697_v3  ;;  %3209 = vmatpush3.bf16.msra.mxu0 %v3574_v7  ;;  %v3583_v16 = vld [vmem:[%s4922_s1 + $0x98] sm:$0xff]   ;;  %v3584_v17 = vld [vmem:[%s4922_s1 + $0x60] sm:$0xff]  }
  0x11   : > { %260 = vst [vmem:[#allocation2 + $0x38] sm:$0x1] %v3697_v3  ;;  %261 = vst [vmem:[#allocation2 + $0x3c] sm:$0xf] %v3697_v3  ;;  %3273 = vmatpush3.bf16.msra.mxu1 %v3575_v8  ;;  %3210 = vmatprep.subr.bf16.mxu0 %v3576_v9  ;;  %v3585_v18 = vld [vmem:[%s4922_s1 + $0xe0] sm:$0xff]   ;;  %s4944_s16 = smov (!%p220_p5, %s3683_s16), 1 }
  0x12   : > { %262 = vst [vmem:[#allocation2 + $0x40] sm:$0xf] %v3697_v3  ;;  %263 = vst [vmem:[#allocation2 + $0x44] sm:$0x1] %v3697_v3  ;;  %3274 = vmatprep.subr.bf16.mxu1 %v3577_v10  ;;  %v3586_v19 = vld [vmem:[%s4922_s1 + $0x20] sm:$0xff]   ;;  %v3588_v21 = vld [vmem:[%s4922_s1 + $0x68] sm:$0xff]  }
  0x13   : > { %264 = vst [vmem:[#allocation2 + $0x48] sm:$0xf] %v3697_v3  ;;  %265 = vst [vmem:[#allocation2 + $0x4c] sm:$0xf] %v3697_v3  ;;  %v3587_v20 = vld [vmem:[%s4922_s1 + $0xa0] sm:$0xff]   ;;  %v3589_v22 = vld [vmem:[%s4922_s1 + $0xe8] sm:$0xff]  }
  0x14   : > { %266 = vst [vmem:[#allocation2 + $0x50] sm:$0x1] %v3697_v3  ;;  %267 = vst [vmem:[#allocation2 + $0x54] sm:$0xf] %v3697_v3  ;;  %3211 = vmatpush3.bf16.msra.mxu0 %v3578_v11  ;;  %v3590_v23 = vld [vmem:[%s4922_s1 + $0x28] sm:$0xff]   ;;  %s3526_s30 = smul.u32 216, %s4944_s16 }
  0x15   : > { %268 = vst [vmem:[#allocation2 + $0x58] sm:$0xf] %v3697_v3  ;;  %269 = vst [vmem:[#allocation2 + $0x5c] sm:$0x1] %v3697_v3  ;;  %3275 = vmatpush3.bf16.msra.mxu1 %v3579_v12  ;;  %3212 = vmatprep.subr.bf16.mxu0 %v3580_v13  ;;  %v3591_v24 = vld [vmem:[%s4922_s1 + $0xa8] sm:$0xff]   ;;  %v3592_v25 = vld [vmem:[%s4922_s1 + $0x70] sm:$0xff]  }
  0x16   : > { %270 = vst [vmem:[#allocation2 + $0x60] sm:$0xf] %v3697_v3  ;;  %271 = vst [vmem:[#allocation2 + $0x64] sm:$0xf] %v3697_v3  ;;  %3276 = vmatprep.subr.bf16.mxu1 %v3581_v14  ;;  %v3593_v26 = vld [vmem:[%s4922_s1 + $0xf0] sm:$0xff]   ;;  %s224_s23 = scalar_lea.vmem %s4921_s0, %s3526_s30  ;;  %v3596_v29 = vld [vmem:[%s4922_s1 + $0x78] sm:$0xff]  }
  0x17   : > { %272 = vst [vmem:[#allocation2 + $0x68] sm:$0x1] %v3697_v3  ;;  %273 = vst [vmem:[#allocation2 + $0x6c] sm:$0xf] %v3697_v3  ;;  %v3594_v27 = vld [vmem:[%s4922_s1 + $0x30] sm:$0xff]   ;;  %v3597_v30 = vld [vmem:[%s4922_s1 + $0xf8] sm:$0xff]   ;;  %s3856_s5 = scalar_lea.vmem %s224_s23, %s3189_s11 }
  0x18   : > { %274 = vst [vmem:[#allocation2 + $0x70] sm:$0xf] %v3697_v3  ;;  %275 = vst [vmem:[#allocation2 + $0x74] sm:$0x1] %v3697_v3  ;;  %3213 = vmatpush3.bf16.msra.mxu0 %v3582_v15  ;;  %v3595_v28 = vld [vmem:[%s4922_s1 + $0xb0] sm:$0xff]   ;;  %vm309_vm0 = vcmask 27648  }
  0x19   : > { %3277 = vmatpush3.bf16.msra.mxu1 %v3583_v16  ;;  %3214 = vmatprep.subr.bf16.mxu0 %v3584_v17  ;;  %v3598_v31 = vld [vmem:[%s4922_s1 + $0x38] sm:$0xff]   ;;  %vm312_vm1 = vcmask 24576   ;;  %v279_v33 = vld [vmem:[%s3856_s5] sm:$0xf]  ;;  %v280_v34 = vld [vmem:[%s3856_s5 + $0x4] sm:$0xf] }
  0x1a   : > { %3278 = vmatprep.subr.bf16.mxu1 %v3585_v18  ;;  %v3599_v32 = vld [vmem:[%s4922_s1 + $0xb8] sm:$0xff]   ;;  %v281_v35 = vld [vmem:[%s3856_s5 + $0x8] sm:$0x1]  ;;  %310 = vst.msk [vmem:[#allocation2] sm:$0xf] %vm309_vm0, %v279_v33  ;;  %v3601_v38 = vld [vmem:[%s4922_s1 + $0x140] sm:$0xff]  }
  0x1b   : > { %311 = vst.msk [vmem:[#allocation2 + $0x4] sm:$0xf] %vm309_vm0, %v280_v34  ;;  %v282_v36 = vld [vmem:[%s3856_s5 + $0xc] sm:$0xf]  ;;  %v283_v37 = vld [vmem:[%s3856_s5 + $0x10] sm:$0xf] }
  0x1c   : > { %3215 = vmatpush3.bf16.msra.mxu0 %v3586_v19  ;;  %313 = vst.msk [vmem:[#allocation2 + $0x8] sm:$0x1] %vm312_vm1, %v281_v35  ;;  %vm592_vm2 = vcmask 1042432   ;;  %vm593_vm3 = vcmask 1046532   ;;  %v284_v39 = vld [vmem:[%s3856_s5 + $0x14] sm:$0x1] }
  0x1d   : > { %3279 = vmatpush3.bf16.msra.mxu1 %v3587_v20  ;;  %3216 = vmatprep.subr.bf16.mxu0 %v3588_v21  ;;  %314 = vst.msk [vmem:[#allocation2 + $0xc] sm:$0xf] %vm309_vm0, %v282_v36  ;;  %315 = vst.msk [vmem:[#allocation2 + $0x10] sm:$0xf] %vm309_vm0, %v283_v37  ;;  %v285_v40 = vld [vmem:[%s3856_s5 + $0x18] sm:$0xf] }
  0x1e   : > { %3280 = vmatprep.subr.bf16.mxu1 %v3589_v22  ;;  %316 = vst.msk [vmem:[#allocation2 + $0x14] sm:$0x1] %vm312_vm1, %v284_v39  ;;  %v286_v41 = vld [vmem:[%s3856_s5 + $0x1c] sm:$0xf]  ;;  %vm365_vm4 = vsmask.f32 3328  ;;  %vm3919_vm7 = vmor %vm592_vm2, %vm593_vm3 }
  0x1f   : > { %317 = vst.msk [vmem:[#allocation2 + $0x18] sm:$0xf] %vm309_vm0, %v285_v40  ;;  %318 = vst.msk [vmem:[#allocation2 + $0x1c] sm:$0xf] %vm309_vm0, %v286_v41  ;;  %vm366_vm5 = vsmask.f32 7440 }
  0x20   : > { %3217 = vmatpush3.bf16.msra.mxu0 %v3590_v23  ;;  %v287_v42 = vld [vmem:[%s3856_s5 + $0x20] sm:$0x1]  ;;  %vm3906_vm6 = vmor %vm365_vm4, %vm366_vm5  ;;  %v3604_v35 = vld [vmem:[%s4922_s1 + $0x148] sm:$0xff]   ;;  %s2995_s25 = sshll.u32 %s4944_s16, 5  ;;  %vm2831_vm8 = vcmask 60416   ;;  %vm2673_vm9 = vcmask 64512  }
  0x21   : > { %3281 = vmatpush3.bf16.msra.mxu1 %v3591_v24  ;;  %3218 = vmatprep.subr.bf16.mxu0 %v3592_v25  ;;  %v3884_v43 = vld [vmem:[#allocation2] sm:$0xf]  ;;  %319 = vst.msk [vmem:[#allocation2 + $0x20] sm:$0x1] %vm312_vm1, %v287_v42  ;;  %v288_v36 = vld [vmem:[%s3856_s5 + $0x24] sm:$0xf] }
  0x22   : > { %3282 = vmatprep.subr.bf16.mxu1 %v3593_v26  ;;  %v3886_v44 = vld [vmem:[#allocation2 + $0x4] sm:$0xf]  ;;  %v369_v46 = vshrl.u32 %v3884_v43, 16  ;;  %v372_v47 = vshll.u32 %v3884_v43, 16  ;;  %v560_v0 = vld [vmem:[#allocation2] sm:$0xe] }
  0x23   : > { %v3888_v45 = vld [vmem:[#allocation2 + $0x8] sm:$0x1]  ;;  %v378_v48 = vshll.u32 %v3886_v44, 16  ;;  %v382_v49 = vshrl.u32 %v3886_v44, 16  ;;  %v3026_v10 = vcombine.low %v3884_v43, %v3886_v44  ;;  %v3002_v16 = vrot.slane %v560_v0, 9  ;;  %v3602_v19 = vld [vmem:[%s4922_s1 + $0x100] sm:$0xff]  }
  0x24   : > { %3219 = vmatpush3.bf16.msra.mxu0 %v3594_v27  ;;  %v652_v50 = vld [vmem:[#allocation2 + $0xc] sm:$0xf]  ;;  %v388_v51 = vshll.u32 %v3888_v45, 16  ;;  %v600_v52 = vrot.slane %v3888_v45, 5  ;;  %v371_v55 = vrot.slane %v369_v46, 4  ;;  %v374_v56 = vrot.slane %v372_v47, 5 }
  0x25   : > { %3283 = vmatpush3.bf16.msra.mxu1 %v3595_v28  ;;  %3220 = vmatprep.subr.bf16.mxu0 %v3596_v29  ;;  %v677_v53 = vshrl.u32 %v652_v50, 16  ;;  %v680_v54 = vshll.u32 %v652_v50, 16  ;;  %v380_v57 = vrot.slane %v378_v48, 5  ;;  %v384_v58 = vrot.slane %v382_v49, 4  ;;  %v3897_v59 = vld [vmem:[#allocation2 + $0x10] sm:$0xf] }
  0x26   : > { %3284 = vmatprep.subr.bf16.mxu1 %v3597_v30  ;;  %v390_v60 = vrot.slane %v388_v51, 5  ;;  %v686_v63 = vshll.u32 %v3897_v59, 16  ;;  %v375_v1 = vor.u32 %v374_v56, %v371_v55  ;;  %v690_v3 = vshrl.u32 %v3897_v59, 16  ;;  %v3902_v5 = vld [vmem:[#allocation2 + $0xc] sm:$0xf]  ;;  %v3608_v29 = vld [vmem:[%s4922_s1 + $0x1c0] sm:$0xff]  }
  0x27   : > { %v679_v61 = vrot.slane %v677_v53, 4  ;;  %v682_v62 = vrot.slane %v680_v54, 5  ;;  %v385_v2 = vor.u32 %v384_v58, %v380_v57  ;;  %v902_v4 = vrot.slane %v3897_v59, 5  ;;  %v3915_v11 = vld [vmem:[#allocation2 + $0x10] sm:$0xf]  ;;  %v3605_v47 = vld [vmem:[%s4922_s1 + $0x108] sm:$0xff]  }
  0x28   : > { %3221 = vmatpush3.bf16.msra.mxu0 %v3598_v31  ;;  %v3910_v8 = vrot.slane %v686_v63, 5  ;;  %v3050_v9 = vcombine.low %v652_v50, %v3897_v59  ;;  %v376_v12 = vrot.slane %v375_v1, 4  ;;  %v692_v14 = vrot.slane %v690_v3, 4  ;;  %v3929_v20 = vld [vmem:[#allocation2 + $0x14] sm:$0x1]  ;;  %v3610_v49 = vld [vmem:[%s4922_s1 + $0x180] sm:$0xff]  }
  0x29   : > { %3285 = vmatpush3.bf16.msra.mxu1 %v3599_v32  ;;  %3334 = vmatprep.subr.bf16.mxu0 %v3601_v38  ;;  %v683_v7 = vor.u32 %v682_v62, %v679_v61  ;;  %v386_v13 = vrot.slane %v385_v2, 4  ;;  %v597_v18 = vrot.slane %v3886_v44, 5  ;;  %v393_v21 = vshrl.u32 %v3902_v5, 16  ;;  %v654_v27 = vld [vmem:[#allocation2 + $0x18] sm:$0xf]  ;;  %v3613_v1 = vld [vmem:[%s4922_s1 + $0x1c8] sm:$0xff]  }
  0x2a   : > { %2278 = vmatprep.mubr.bf16.mxu1 %v3050_v9  ;;  %v396_v22 = vshll.u32 %v3902_v5, 16  ;;  %v381_v23 = vsel %vm3906_vm6, %v376_v12, %v380_v57  ;;  %v693_v25 = vor.u32 %v692_v14, %v3910_v8  ;;  %v402_v26 = vshll.u32 %v3915_v11, 16  ;;  %v3939_v28 = vld [vmem:[#allocation2 + $0x1c] sm:$0xf]  ;;  %v561_v34 = vld [vmem:[#allocation2 + $0xc] sm:$0xe]  ;;  %3398 = vmatprep.subr.bf16.mxu1 %v3608_v29 }
  0x2b   : > { %v3923_v17 = vrot.slane %v683_v7, 4  ;;  %v391_v24 = vsel %vm3906_vm6, %v386_v13, %v390_v60  ;;  %v598_v32 = vsel %vm3919_vm7, %v3002_v16, %v597_v18  ;;  %v599_v33 = vrot.slane %v597_v18, 4  ;;  %v289_v37 = vld [vmem:[%s3856_s5 + $0x28] sm:$0xf]  ;;  %v3959_v42 = vld [vmem:[#allocation2 + $0x18] sm:$0xf] }
  0x2c   : > { %v3034_v30 = vcombine.low %v381_v23, %v391_v24  ;;  %v3955_v38 = vrot.slane %v693_v25, 4  ;;  %v395_v39 = vrot.slane %v393_v21, 4  ;;  %v398_v40 = vrot.slane %v396_v22, 5  ;;  %320 = vst.msk [vmem:[#allocation2 + $0x24] sm:$0xf] %vm309_vm0, %v288_v36  ;;  %v3607_v60 = vld [vmem:[%s4922_s1 + $0x150] sm:$0xff]  }
  0x2d   : > { %v689_v31 = vsel %vm3906_vm6, %v3923_v17, %v3910_v8  ;;  %v3957_v41 = vrot.slane %v402_v26, 5  ;;  %321 = vst.msk [vmem:[#allocation2 + $0x28] sm:$0xf] %vm309_vm0, %v289_v37  ;;  %v601_v43 = vsel %vm3919_vm7, %v599_v33, %v600_v52  ;;  %v406_v44 = vshrl.u32 %v3915_v11, 16  ;;  %v3970_v48 = vld [vmem:[#allocation2 + $0x1c] sm:$0xf] }
  0x2e   : > { %2181 = vmatprep.mubr.bf16.mxu0 %v3034_v30  ;;  %v412_v45 = vshll.u32 %v3929_v20, 16  ;;  %v701_v46 = vshrl.u32 %v654_v27, 16  ;;  %v3042_v50 = vcombine.low %v598_v32, %v601_v43  ;;  %v399_v51 = vor.u32 %v398_v40, %v395_v39  ;;  %v3979_v58 = vld [vmem:[#allocation2 + $0x20] sm:$0x1]  ;;  %v3612_v22 = vld [vmem:[%s4922_s1 + $0x158] sm:$0xff]   ;;  %p238_p7 = scmp.lt.s32.totalorder %s3679_s15, 1 }
  0x2f   : > { %2182 = vmatmul.mubr.bf16.vlgmr.msra.gmra.mrb[0].mxu0 %v3026_v10  ;;  %v704_v53 = vshll.u32 %v654_v27, 16  ;;  %v714_v52 = vshrl.u32 %v3939_v28, 16  ;;  %v408_v54 = vrot.slane %v406_v44, 4  ;;  %v3051_v57 = vcombine.low %v654_v27, %v3939_v28  ;;  %v3609_v10 = vld [vmem:[%s4922_s1 + $0x110] sm:$0xff]   ;;  %v562_v29 = vld [vmem:[#allocation2 + $0x18] sm:$0xe] }
  0x30   : > { %3335 = vmatpush3.bf16.msra.mxu0 %v3602_v19  ;;  %v414_v55 = vrot.slane %v412_v45, 5  ;;  %v3976_v56 = vrot.slane %v701_v46, 4  ;;  %2279 = vmatmul.mubr.bf16.vlgmr.msra.gmra.mrb[0].mxu1 %v3042_v50  ;;  %v400_v61 = vrot.slane %v399_v51, 4  ;;  %v3027_v63 = vcombine.low %v3902_v5, %v3915_v11  ;;  %v3614_v36 = vld [vmem:[%s4922_s1 + $0x118] sm:$0xff]   ;;  %v291_v45 = vld [vmem:[%s3856_s5 + $0x30] sm:$0xf] }
  0x31   : > { %v3984_v62 = vrot.slane %v704_v53, 5  ;;  %v3003_v0 = vrot.slane %v561_v34, 9  ;;  %3336 = vmatprep.subr.bf16.mxu0 %v3604_v35  ;;  %v409_v2 = vor.u32 %v408_v54, %v3957_v41  ;;  %2286 = vmatprep.mubr.bf16.mxu1 %v3051_v57  ;;  %v604_v3 = vrot.slane %v3915_v11, 5  ;;  %v3615_v11 = vld [vmem:[%s4922_s1 + $0x188] sm:$0xff]   ;;  %v3617_v46 = vld [vmem:[%s4922_s1 + $0x160] sm:$0xff]   ;;  %s2997_s8 = sshll.u32 %s4944_s16, 1 }
  0x32   : > { %v607_v7 = vrot.slane %v3929_v20, 5  ;;  %v417_v9 = vshrl.u32 %v3959_v42, 16  ;;  %3399 = vmatpush3.bf16.msra.mxu1 %v3610_v49  ;;  %v405_v5 = vsel %vm3906_vm6, %v400_v61, %v3957_v41  ;;  %v420_v12 = vshll.u32 %v3959_v42, 16  ;;  %v290_v35 = vld [vmem:[%s3856_s5 + $0x2c] sm:$0x1] }
  0x33   : > { %v426_v13 = vshll.u32 %v3970_v48, 16  ;;  %v430_v14 = vshrl.u32 %v3970_v48, 16  ;;  %3400 = vmatprep.subr.bf16.mxu1 %v3613_v1  ;;  %v410_v16 = vrot.slane %v409_v2, 4  ;;  %v605_v18 = vsel %vm3919_vm7, %v3003_v0, %v604_v3  ;;  %v656_v21 = vld [vmem:[#allocation2 + $0x24] sm:$0xf] }
  0x34   : > { %v606_v19 = vrot.slane %v604_v3, 4  ;;  %3337 = vmatpush3.bf16.msra.mxu0 %v3605_v47  ;;  %v419_v20 = vrot.slane %v417_v9, 4  ;;  %v422_v23 = vrot.slane %v420_v12, 5  ;;  %v436_v26 = vshll.u32 %v3979_v58, 16  ;;  %v4013_v27 = vld [vmem:[#allocation2 + $0x28] sm:$0xf] }
  0x35   : > { %v428_v24 = vrot.slane %v426_v13, 5  ;;  %v432_v25 = vrot.slane %v430_v14, 4  ;;  %3338 = vmatprep.subr.bf16.mxu0 %v3607_v60  ;;  %v415_v30 = vsel %vm3906_vm6, %v410_v16, %v414_v55  ;;  %v725_v33 = vshrl.u32 %v656_v21, 16  ;;  %322 = vst.msk [vmem:[#allocation2 + $0x2c] sm:$0x1] %vm312_vm1, %v290_v35  ;;  %v3618_v16 = vld [vmem:[%s4922_s1 + $0x1d0] sm:$0xff]  }
  0x36   : > { %v608_v32 = vsel %vm3919_vm7, %v606_v19, %v607_v7  ;;  %v728_v34 = vshll.u32 %v656_v21, 16  ;;  %3401 = vmatpush3.bf16.msra.mxu1 %v3615_v11  ;;  %v3035_v37 = vcombine.low %v405_v5, %v415_v30  ;;  %v423_v40 = vor.u32 %v422_v23, %v419_v20  ;;  %v4024_v43 = vld [vmem:[#allocation2 + $0x24] sm:$0xf]  ;;  %v4026_v44 = vld [vmem:[#allocation2 + $0x28] sm:$0xf] }
  0x37   : > { %v3043_v39 = vcombine.low %v605_v18, %v608_v32  ;;  %v433_v41 = vor.u32 %v432_v25, %v428_v24  ;;  %v438_v47 = vrot.slane %v436_v26, 5  ;;  %v4032_v49 = vrot.slane %v725_v33, 4  ;;  %v292_v53 = vld [vmem:[%s3856_s5 + $0x34] sm:$0xf]  ;;  %323 = vst.msk [vmem:[#allocation2 + $0x30] sm:$0xf] %vm309_vm0, %v291_v45  ;;  %3402 = vmatprep.subr.bf16.mxu1 %v3618_v16 }
  0x38   : > { %v4034_v50 = vrot.slane %v728_v34, 5  ;;  %v738_v51 = vshrl.u32 %v4013_v27, 16  ;;  %3339 = vmatpush3.bf16.msra.mxu0 %v3609_v10  ;;  %2189 = vmatprep.mubr.bf16.mxu0 %v3035_v37  ;;  %v424_v54 = vrot.slane %v423_v40, 4  ;;  %v3052_v57 = vcombine.low %v656_v21, %v4013_v27  ;;  %324 = vst.msk [vmem:[#allocation2 + $0x34] sm:$0xf] %vm309_vm0, %v292_v53  ;;  %v3619_v35 = vld [vmem:[%s4922_s1 + $0x120] sm:$0xff]  }
  0x39   : > { %2287 = vmatmul.mubr.bf16.gmra.mrb[4].mxu1 %v3043_v39  ;;  %v434_v55 = vrot.slane %v433_v41, 4  ;;  %v563_v60 = vld [vmem:[#allocation2 + $0x24] sm:$0xe]  ;;  %2190 = vmatmul.mubr.bf16.gmra.mrb[4].mxu0 %v3027_v63  ;;  %v3004_v61 = vrot.slane %v562_v29, 9  ;;  %v611_v0 = vrot.slane %v3970_v48, 5  ;;  %v614_v1 = vrot.slane %v3979_v58, 5 }
  0x3a   : > { %v441_v2 = vshrl.u32 %v4024_v43, 16  ;;  %3340 = vmatprep.subr.bf16.mxu0 %v3612_v22  ;;  %v429_v3 = vsel %vm3906_vm6, %v424_v54, %v428_v24  ;;  %2294 = vmatprep.mubr.bf16.mxu1 %v3052_v57  ;;  %v444_v9 = vshll.u32 %v4024_v43, 16  ;;  %v450_v10 = vshll.u32 %v4026_v44, 16  ;;  %v293_v30 = vld [vmem:[%s3856_s5 + $0x38] sm:$0x1]  ;;  %v3620_v45 = vld [vmem:[%s4922_s1 + $0x190] sm:$0xff]  }
  0x3b   : > { %v439_v7 = vsel %vm3906_vm6, %v434_v55, %v438_v47  ;;  %v612_v5 = vsel %vm3919_vm7, %v3004_v61, %v611_v0  ;;  %v613_v12 = vrot.slane %v611_v0, 4  ;;  %v454_v11 = vshrl.u32 %v4026_v44, 16  ;;  %325 = vst.msk [vmem:[#allocation2 + $0x38] sm:$0x1] %vm312_vm1, %v293_v30  ;;  %v3622_v57 = vld [vmem:[%s4922_s1 + $0x168] sm:$0xff]   ;;  %3403 = vmatpush3.bf16.msra.mxu1 %v3620_v45 }
  0x3c   : > { %v3036_v63 = vcombine.low %v429_v3, %v439_v7  ;;  %v443_v58 = vrot.slane %v441_v2, 4  ;;  %3341 = vmatpush3.bf16.msra.mxu0 %v3614_v36  ;;  %v446_v13 = vrot.slane %v444_v9, 5  ;;  %v452_v14 = vrot.slane %v450_v10, 5  ;;  %v360_v20 = vld [vmem:[#allocation2 + $0x2c] sm:$0x1]  ;;  %v3623_v3 = vld [vmem:[%s4922_s1 + $0x1d8] sm:$0xff]  }
  0x3d   : > { %3342 = vmatprep.subr.bf16.mxu0 %v3617_v46  ;;  %v3028_v18 = vcombine.low %v3959_v42, %v3970_v48  ;;  %v615_v19 = vsel %vm3919_vm7, %v613_v12, %v614_v1  ;;  %v3005_v21 = vrot.slane %v563_v60, 9  ;;  %v618_v22 = vrot.slane %v4026_v44, 5  ;;  %v294_v2 = vld [vmem:[%s3856_s5 + $0x3c] sm:$0xf]  ;;  %3404 = vmatprep.subr.bf16.mxu1 %v3623_v3 }
  0x3e   : > { %2197 = vmatprep.mubr.bf16.mxu0 %v3036_v63  ;;  %v3044_v23 = vcombine.low %v612_v5, %v615_v19  ;;  %v447_v24 = vor.u32 %v446_v13, %v443_v58  ;;  %v456_v25 = vrot.slane %v454_v11, 4  ;;  %v460_v26 = vshll.u32 %v360_v20, 16  ;;  %v658_v29 = vld [vmem:[#allocation2 + $0x30] sm:$0xf]  ;;  %v295_v5 = vld [vmem:[%s3856_s5 + $0x40] sm:$0xf] }
  0x3f   : > { %v4062_v32 = vld [vmem:[#allocation2 + $0x34] sm:$0xf]  ;;  %v749_v33 = vshrl.u32 %v658_v29, 16  ;;  %v752_v34 = vshll.u32 %v658_v29, 16  ;;  %v619_v42 = vsel %vm3919_vm7, %v3005_v21, %v618_v22  ;;  %v620_v48 = vrot.slane %v618_v22, 4  ;;  %v3624_v19 = vld [vmem:[%s4922_s1 + $0x128] sm:$0xff]  }
  0x40   : > { %v448_v36 = vrot.slane %v447_v24, 4  ;;  %v457_v37 = vor.u32 %v456_v25, %v452_v14  ;;  %v462_v39 = vrot.slane %v460_v26, 5  ;;  %v762_v40 = vshrl.u32 %v4062_v32, 16  ;;  %v4071_v41 = vld [vmem:[#allocation2 + $0x30] sm:$0xf]  ;;  %3343 = vmatpush3.bf16.msra.mxu0 %v3619_v35 }
  0x41   : > { %2295 = vmatmul.mubr.bf16.gmra.mrb[8].mxu1 %v3044_v23  ;;  %2198 = vmatmul.mubr.bf16.gmra.mrb[8].mxu0 %v3028_v18  ;;  %v4076_v46 = vrot.slane %v749_v33, 4  ;;  %v4078_v47 = vrot.slane %v752_v34, 5  ;;  %v3053_v53 = vcombine.low %v658_v29, %v4062_v32  ;;  %v621_v54 = vrot.slane %v360_v20, 5  ;;  %v4081_v55 = vld [vmem:[#allocation2 + $0x34] sm:$0xf]  ;;  %v3625_v23 = vld [vmem:[%s4922_s1 + $0x198] sm:$0xff]  }
  0x42   : > { %v453_v60 = vsel %vm3906_vm6, %v448_v36, %v452_v14  ;;  %v458_v61 = vrot.slane %v457_v37, 4  ;;  %v465_v0 = vshrl.u32 %v4071_v41, 16  ;;  %v468_v1 = vshll.u32 %v4071_v41, 16  ;;  %326 = vst.msk [vmem:[#allocation2 + $0x3c] sm:$0xf] %vm309_vm0, %v294_v2  ;;  %3344 = vmatprep.subr.bf16.mxu0 %v3622_v57  ;;  %3405 = vmatpush3.bf16.msra.mxu1 %v3625_v23 }
  0x43   : > { %2302 = vmatprep.mubr.bf16.mxu1 %v3053_v53  ;;  %v3029_v7 = vcombine.low %v4024_v43, %v4026_v44  ;;  %v622_v9 = vsel %vm3919_vm7, %v620_v48, %v621_v54  ;;  %v474_v10 = vshll.u32 %v4081_v55, 16  ;;  %v478_v63 = vshrl.u32 %v4081_v55, 16  ;;  %v564_v12 = vld [vmem:[#allocation2 + $0x30] sm:$0xe]  ;;  %327 = vst.msk [vmem:[#allocation2 + $0x40] sm:$0xf] %vm309_vm0, %v295_v5 }
  0x44   : > { %v463_v58 = vsel %vm3906_vm6, %v458_v61, %v462_v39  ;;  %v3045_v13 = vcombine.low %v619_v42, %v622_v9  ;;  %v467_v14 = vrot.slane %v465_v0, 4  ;;  %v470_v11 = vrot.slane %v468_v1, 5  ;;  %v361_v20 = vld [vmem:[#allocation2 + $0x38] sm:$0x1]  ;;  %3345 = vmatpush3.bf16.msra.mxu0 %v3624_v19  ;;  %v296_v48 = vld [vmem:[%s3856_s5 + $0x44] sm:$0x1] }
  0x45   : > { %v3037_v43 = vcombine.low %v453_v60, %v463_v58  ;;  %v476_v44 = vrot.slane %v474_v10, 5  ;;  %v480_v16 = vrot.slane %v478_v63, 4  ;;  %v3006_v18 = vrot.slane %v564_v12, 9  ;;  %v297_v35 = vld [vmem:[%s3856_s5 + $0x48] sm:$0xf] }
  0x46   : > { %v471_v21 = vor.u32 %v470_v11, %v467_v14  ;;  %v625_v22 = vrot.slane %v4081_v55, 5  ;;  %v484_v25 = vshll.u32 %v361_v20, 16  ;;  %v628_v26 = vrot.slane %v361_v20, 5  ;;  %328 = vst.msk [vmem:[#allocation2 + $0x44] sm:$0x1] %vm312_vm1, %v296_v48  ;;  %v3627_v11 = vld [vmem:[%s4922_s1 + $0x170] sm:$0xff]  }
  0x47   : > { %2205 = vmatprep.mubr.bf16.mxu0 %v3037_v43  ;;  %v481_v24 = vor.u32 %v480_v16, %v476_v44  ;;  %v3030_v39 = vcombine.low %v4071_v41, %v4081_v55  ;;  %v298_v54 = vld [vmem:[%s3856_s5 + $0x4c] sm:$0xf]  ;;  %329 = vst.msk [vmem:[#allocation2 + $0x48] sm:$0xf] %vm309_vm0, %v297_v35  ;;  %3346 = vmatprep.subr.bf16.mxu0 %v3627_v11  ;;  %v3629_v20 = vld [vmem:[%s4922_s1 + $0x130] sm:$0xff]   ;;  %vm2711_vm10 = vcmask 57344  }
  0x48   : > { %v472_v29 = vrot.slane %v471_v21, 4  ;;  %v626_v30 = vsel %vm3919_vm7, %v3006_v18, %v625_v22  ;;  %v627_v33 = vrot.slane %v625_v22, 4  ;;  %v486_v42 = vrot.slane %v484_v25, 5  ;;  %330 = vst.msk [vmem:[#allocation2 + $0x4c] sm:$0xf] %vm309_vm0, %v298_v54  ;;  %v3628_v18 = vld [vmem:[%s4922_s1 + $0x1e0] sm:$0xff]   ;;  %3347 = vmatpush3.bf16.msra.mxu0 %v3629_v20 }
  0x49   : > { %2303 = vmatmul.mubr.bf16.gmra.mrb[12].mxu1 %v3045_v13  ;;  %2206 = vmatmul.mubr.bf16.gmra.mrb[12].mxu0 %v3029_v7  ;;  %v482_v34 = vrot.slane %v481_v24, 4  ;;  %v660_v37 = vld [vmem:[#allocation2 + $0x3c] sm:$0xf]  ;;  %v3631_v48 = vld [vmem:[%s4922_s1 + $0x1e8] sm:$0xff]   ;;  %v300_v11 = vld [vmem:[%s3856_s5 + $0x54] sm:$0xf] }
  0x4a   : > { %v477_v36 = vsel %vm3906_vm6, %v472_v29, %v476_v44  ;;  %v629_v45 = vsel %vm3919_vm7, %v627_v33, %v628_v26  ;;  %v4123_v53 = vld [vmem:[#allocation2 + $0x3c] sm:$0xf]  ;;  %v4129_v60 = vld [vmem:[#allocation2 + $0x40] sm:$0xf]  ;;  %v773_v61 = vshrl.u32 %v660_v37, 16  ;;  %v776_v0 = vshll.u32 %v660_v37, 16  ;;  %3406 = vmatprep.subr.bf16.mxu1 %v3628_v18 }
  0x4b   : > { %v487_v57 = vsel %vm3906_vm6, %v482_v34, %v486_v42  ;;  %v3046_v1 = vcombine.low %v626_v30, %v629_v45  ;;  %v4131_v2 = vld [vmem:[#allocation2 + $0x40] sm:$0xf]  ;;  %v786_v55 = vshrl.u32 %v4129_v60, 16  ;;  %v3054_v3 = vcombine.low %v660_v37, %v4129_v60  ;;  %v565_v9 = vld [vmem:[#allocation2 + $0x3c] sm:$0xe]  ;;  %v3632_v45 = vld [vmem:[%s4922_s1 + $0x1a8] sm:$0xff]  }
  0x4c   : > { %v3038_v41 = vcombine.low %v477_v36, %v487_v57  ;;  %v489_v7 = vshrl.u32 %v4123_v53, 16  ;;  %v4137_v10 = vrot.slane %v773_v61, 4  ;;  %v4139_v63 = vrot.slane %v776_v0, 5  ;;  %v3630_v26 = vld [vmem:[%s4922_s1 + $0x1a0] sm:$0xff]   ;;  %332 = vst.msk [vmem:[#allocation2 + $0x54] sm:$0xf] %vm309_vm0, %v300_v11 }
  0x4d   : > { %v492_v5 = vshll.u32 %v4123_v53, 16  ;;  %v498_v12 = vshll.u32 %v4131_v2, 16  ;;  %2310 = vmatprep.mubr.bf16.mxu1 %v3054_v3  ;;  %v502_v13 = vshrl.u32 %v4131_v2, 16  ;;  %v3007_v14 = vrot.slane %v565_v9, 9  ;;  %v362_v21 = vld [vmem:[#allocation2 + $0x44] sm:$0x1]  ;;  %3407 = vmatpush3.bf16.msra.mxu1 %v3630_v26 }
  0x4e   : > { %2213 = vmatprep.mubr.bf16.mxu0 %v3038_v41  ;;  %v491_v58 = vrot.slane %v489_v7, 4  ;;  %v632_v16 = vrot.slane %v4131_v2, 5  ;;  %v662_v23 = vld [vmem:[#allocation2 + $0x48] sm:$0xf]  ;;  %v508_v30 = vshll.u32 %v362_v21, 16  ;;  %3408 = vmatprep.subr.bf16.mxu1 %v3631_v48  ;;  %v3031_v41 = vcombine.low %v4123_v53, %v4131_v2  ;;  %v3634_v26 = vld [vmem:[%s4922_s1 + $0x178] sm:$0xff]  }
  0x4f   : > { %v494_v43 = vrot.slane %v492_v5, 5  ;;  %v500_v44 = vrot.slane %v498_v12, 5  ;;  %v504_v19 = vrot.slane %v502_v13, 4  ;;  %v4159_v33 = vld [vmem:[#allocation2 + $0x4c] sm:$0xf]  ;;  %v797_v34 = vshrl.u32 %v662_v23, 16  ;;  %3348 = vmatprep.subr.bf16.mxu0 %v3634_v26 }
  0x50   : > { %v633_v24 = vsel %vm3919_vm7, %v3007_v14, %v632_v16  ;;  %v634_v25 = vrot.slane %v632_v16, 4  ;;  %v800_v42 = vshll.u32 %v662_v23, 16  ;;  %v810_v36 = vshrl.u32 %v4159_v33, 16  ;;  %v299_v7 = vld [vmem:[%s3856_s5 + $0x50] sm:$0x1]  ;;  %v4248_v26 = vld [vmem:[%s4922_s1 + $0x200] sm:$0xff]  }
  0x51   : > { %2311 = vmatmul.mubr.bf16.gmra.mrb[16].mxu1 %v3046_v1  ;;  %2214 = vmatmul.mubr.bf16.gmra.mrb[16].mxu0 %v3030_v39  ;;  %v495_v22 = vor.u32 %v494_v43, %v491_v58  ;;  %v505_v29 = vor.u32 %v504_v19, %v500_v44  ;;  %v3055_v37 = vcombine.low %v662_v23, %v4159_v33  ;;  %v635_v39 = vrot.slane %v362_v21, 5  ;;  %v4180_v9 = vld [vmem:[#allocation2 + $0x48] sm:$0xf]  ;;  %v4182_v5 = vld [vmem:[#allocation2 + $0x4c] sm:$0xf] }
  0x52   : > { %v510_v57 = vrot.slane %v508_v30, 5  ;;  %v4169_v61 = vrot.slane %v797_v34, 4  ;;  %v4171_v0 = vrot.slane %v800_v42, 5  ;;  %331 = vst.msk [vmem:[#allocation2 + $0x50] sm:$0x1] %vm312_vm1, %v299_v7  ;;  %v513_v13 = vshrl.u32 %v4180_v9, 16  ;;  %3409 = vmatpush3.bf16.msra.mxu1 %v3632_v45 }
  0x53   : > { %v496_v35 = vrot.slane %v495_v22, 4  ;;  %v506_v54 = vrot.slane %v505_v29, 4  ;;  %2318 = vmatprep.mubr.bf16.mxu1 %v3055_v37  ;;  %v636_v3 = vsel %vm3919_vm7, %v634_v25, %v635_v39  ;;  %v516_v14 = vshll.u32 %v4180_v9, 16  ;;  %v301_v53 = vld [vmem:[%s3856_s5 + $0x58] sm:$0xf]  ;;  %v3635_v34 = vld [vmem:[%s4922_s1 + $0x1f0] sm:$0xff]  }
  0x54   : > { %v3047_v58 = vcombine.low %v633_v24, %v636_v3  ;;  %v522_v43 = vshll.u32 %v4182_v5, 16  ;;  %333 = vst.msk [vmem:[#allocation2 + $0x58] sm:$0xf] %vm309_vm0, %v301_v53  ;;  %v566_v16 = vld [vmem:[#allocation2 + $0x48] sm:$0xe]  ;;  %v515_v18 = vrot.slane %v513_v13, 4  ;;  %3410 = vmatprep.subr.bf16.mxu1 %v3635_v34  ;;  %v3032_v11 = vcombine.low %v4180_v9, %v4182_v5 }
  0x55   : > { %v501_v1 = vsel %vm3906_vm6, %v496_v35, %v500_v44  ;;  %v511_v12 = vsel %vm3906_vm6, %v506_v54, %v510_v57  ;;  %v526_v44 = vshrl.u32 %v4182_v5, 16  ;;  %v518_v19 = vrot.slane %v516_v14, 5  ;;  %v3636_v35 = vld [vmem:[%s4922_s1 + $0x138] sm:$0xff]   ;;  %v664_v39 = vld [vmem:[#allocation2 + $0x54] sm:$0xf] }
  0x56   : > { %v3039_v2 = vcombine.low %v501_v1, %v511_v12  ;;  %v3008_v20 = vrot.slane %v566_v16, 9  ;;  %v639_v21 = vrot.slane %v4182_v5, 5  ;;  %v524_v22 = vrot.slane %v522_v43, 5  ;;  %v302_v12 = vld [vmem:[%s3856_s5 + $0x5c] sm:$0x1]  ;;  %3349 = vmatpush3.bf16.msra.mxu0 %v3636_v35 }
  0x57   : > { %v528_v23 = vrot.slane %v526_v44, 4  ;;  %v519_v24 = vor.u32 %v518_v19, %v515_v18  ;;  %v821_v1 = vshrl.u32 %v664_v39, 16  ;;  %334 = vst.msk [vmem:[#allocation2 + $0x5c] sm:$0x1] %vm312_vm1, %v302_v12  ;;  %v3638_v44 = vld [vmem:[%s4922_s1 + $0x1f8] sm:$0xff]   ;;  %3478 = vmatprep.subr.bf16.mxu0 %v4248_v26  ;;  %v707_v12 = vor.u32 %v3984_v62, %v3976_v56 }
  0x58   : > { %2221 = vmatprep.mubr.bf16.mxu0 %v3039_v2  ;;  %v641_v25 = vrot.slane %v639_v21, 4  ;;  %v640_v54 = vsel %vm3919_vm7, %v3008_v20, %v639_v21  ;;  %v4222_v2 = vld [vmem:[#allocation2 + $0x54] sm:$0xf]  ;;  %v303_v19 = vld [vmem:[%s3856_s5 + $0x60] sm:$0xf]  ;;  %v3639_v20 = vld [vmem:[%s4922_s1 + $0x1b8] sm:$0xff]  }
  0x59   : > { %2319 = vmatmul.mubr.bf16.gmra.mrb[20].mxu1 %v3047_v58  ;;  %2222 = vmatmul.mubr.bf16.gmra.mrb[20].mxu0 %v3031_v41  ;;  %v529_v29 = vor.u32 %v528_v23, %v524_v22  ;;  %v520_v30 = vrot.slane %v519_v24, 4  ;;  %v363_v42 = vld [vmem:[#allocation2 + $0x50] sm:$0x1]  ;;  %v824_v41 = vshll.u32 %v664_v39, 16  ;;  %v4229_v16 = vrot.slane %v821_v1, 4 }
  0x5a   : > { %v532_v37 = vshll.u32 %v363_v42, 16  ;;  %v642_v57 = vrot.slane %v363_v42, 5  ;;  %v3637_v58 = vld [vmem:[%s4922_s1 + $0x1b0] sm:$0xff]   ;;  %v537_v5 = vshrl.u32 %v4222_v2, 16  ;;  %335 = vst.msk [vmem:[#allocation2 + $0x60] sm:$0xf] %vm309_vm0, %v303_v19 }
  0x5b   : > { %v530_v48 = vrot.slane %v529_v29, 4  ;;  %v4205_v45 = vld [vmem:[#allocation2 + $0x58] sm:$0xf]  ;;  %v525_v13 = vsel %vm3906_vm6, %v520_v30, %v524_v22  ;;  %v4231_v18 = vrot.slane %v824_v41, 5  ;;  %3411 = vmatpush3.bf16.msra.mxu1 %v3637_v58  ;;  %v540_v22 = vshll.u32 %v4222_v2, 16 }
  0x5c   : > { %v3056_v7 = vcombine.low %v664_v39, %v4205_v45  ;;  %v534_v14 = vrot.slane %v532_v37, 5  ;;  %v643_v53 = vsel %vm3919_vm7, %v641_v25, %v642_v57  ;;  %v4224_v43 = vld [vmem:[#allocation2 + $0x58] sm:$0xf]  ;;  %v304_v25 = vld [vmem:[%s3856_s5 + $0x64] sm:$0xf]  ;;  %3412 = vmatprep.subr.bf16.mxu1 %v3638_v44  ;;  %v539_v30 = vrot.slane %v537_v5, 4 }
  0x5d   : > { %v3048_v9 = vcombine.low %v640_v54, %v643_v53  ;;  %v546_v23 = vshll.u32 %v4224_v43, 16  ;;  %v550_v24 = vshrl.u32 %v4224_v43, 16  ;;  %336 = vst.msk [vmem:[#allocation2 + $0x64] sm:$0xf] %vm309_vm0, %v304_v25  ;;  %v567_v34 = vld [vmem:[#allocation2 + $0x54] sm:$0xe]  ;;  %v731_v58 = vor.u32 %v4034_v50, %v4032_v49 }
  0x5e   : > { %2326 = vmatprep.mubr.bf16.mxu1 %v3056_v7  ;;  %v535_v21 = vsel %vm3906_vm6, %v530_v48, %v534_v14  ;;  %v646_v42 = vrot.slane %v4224_v43, 5  ;;  %v542_v48 = vrot.slane %v540_v22, 5  ;;  %v3009_v39 = vrot.slane %v567_v34, 9  ;;  %v364_v7 = vld [vmem:[#allocation2 + $0x5c] sm:$0x1] }
  0x5f   : > { %v3040_v29 = vcombine.low %v525_v13, %v535_v21  ;;  %v548_v35 = vrot.slane %v546_v23, 5  ;;  %v552_v37 = vrot.slane %v550_v24, 4  ;;  %3413 = vmatpush3.bf16.msra.mxu1 %v3639_v20  ;;  %v904_v57 = vrot.slane %v902_v4, 4  ;;  %v4291_v34 = vld [vmem:[#allocation2 + $0x20] sm:$0x1] }
  0x60   : > { %v648_v54 = vrot.slane %v646_v42, 4  ;;  %v543_v1 = vor.u32 %v542_v48, %v539_v30  ;;  %3510 = vmatprep.subr.bf16.mxu1 %v4248_v26  ;;  %v755_v13 = vor.u32 %v4078_v47, %v4076_v46  ;;  %v779_v14 = vor.u32 %v4139_v63, %v4137_v10  ;;  %v868_v48 = vld [vmem:[#allocation2 + $0xc] sm:$0xe]  ;;  %v869_v22 = vld [vmem:[#allocation2 + $0x18] sm:$0xe] }
  0x61   : > { %2327 = vmatmul.mubr.bf16.gmra.mrb[24].mxu1 %v3048_v9  ;;  %2229 = vmatprep.mubr.bf16.mxu0 %v3040_v29  ;;  %v553_v41 = vor.u32 %v552_v37, %v548_v35  ;;  %v649_v9 = vrot.slane %v364_v7, 5  ;;  %v666_v5 = vld [vmem:[#allocation2 + $0x60] sm:$0xf]  ;;  %v3033_v19 = vcombine.low %v4222_v2, %v4224_v43  ;;  %v647_v20 = vsel %vm3919_vm7, %v3009_v39, %v646_v42  ;;  %v668_v42 = vld [vmem:[#allocation2 + $0x14] sm:$0x1] }
  0x62   : > { %2230 = vmatmul.mubr.bf16.gmra.mrb[24].mxu0 %v3032_v11  ;;  %v544_v53 = vrot.slane %v543_v1, 4  ;;  %v556_v11 = vshll.u32 %v364_v7, 16  ;;  %v803_v21 = vor.u32 %v4171_v0, %v4169_v61  ;;  %v845_v29 = vshrl.u32 %v666_v5, 16  ;;  %v4287_v7 = vld [vmem:[#allocation2 + $0x18] sm:$0xf] }
  0x63   : > { %v554_v44 = vrot.slane %v553_v41, 4  ;;  %v848_v30 = vshll.u32 %v666_v5, 16  ;;  %v650_v43 = vsel %vm3919_vm7, %v648_v54, %v649_v9  ;;  %v909_v37 = vrot.slane %v3939_v28, 5  ;;  %v4446_v46 = vld [vmem:[#allocation2 + $0x48] sm:$0xf] }
  0x64   : > { %v549_v23 = vsel %vm3906_vm6, %v544_v53, %v548_v35  ;;  %v558_v24 = vrot.slane %v556_v11, 5  ;;  %v4274_v25 = vld [vmem:[#allocation2 + $0x64] sm:$0xf]  ;;  %v4283_v35 = vrot.slane %v845_v29, 4  ;;  %v3049_v41 = vcombine.low %v647_v20, %v650_v43  ;;  %v4289_v53 = vld [vmem:[#allocation2 + $0x1c] sm:$0xf] }
  0x65   : > { %v3057_v2 = vcombine.low %v666_v5, %v4274_v25  ;;  %v4285_v1 = vrot.slane %v848_v30, 5  ;;  %v696_v5 = vshll.u32 %v668_v42, 16  ;;  %v3010_v54 = vrot.slane %v868_v48, 9  ;;  %v4304_v43 = vld [vmem:[#allocation2 + $0x20] sm:$0x1] }
  0x66   : > { %v559_v39 = vsel %vm3906_vm6, %v554_v44, %v558_v24  ;;  %v905_v9 = vrot.slane %v668_v42, 5  ;;  %v982_v3 = vshrl.u32 %v4287_v7, 16  ;;  %v985_v44 = vshll.u32 %v4287_v7, 16  ;;  %v4505_v63 = vld [vmem:[#allocation2 + $0x50] sm:$0x1] }
  0x67   : > { %v3041_v11 = vcombine.low %v549_v23, %v559_v39  ;;  %2334 = vmatprep.mubr.bf16.mxu1 %v3057_v2  ;;  %v991_v24 = vshll.u32 %v4289_v53, 16  ;;  %v995_v20 = vshrl.u32 %v4289_v53, 16  ;;  %v698_v29 = vrot.slane %v696_v5, 5 }
  0x68   : > { %v903_v23 = vsel %vm3919_vm7, %v3010_v54, %v902_v4  ;;  %v906_v30 = vsel %vm3919_vm7, %v904_v57, %v905_v9  ;;  %v1001_v2 = vshll.u32 %v4291_v34, 16  ;;  %v984_v48 = vrot.slane %v982_v3, 4  ;;  %v4311_v57 = vld [vmem:[#allocation2 + $0x24] sm:$0xf]  ;;  %v4313_v54 = vld [vmem:[#allocation2 + $0x28] sm:$0xf] }
  0x69   : > { %2335 = vmatmul.mubr.bf16.gmra.mrb[28].mxu1 %v3049_v41  ;;  %2237 = vmatprep.mubr.bf16.mxu0 %v3041_v11  ;;  %v3066_v42 = vcombine.low %v903_v23, %v906_v30  ;;  %v987_v39 = vrot.slane %v985_v44, 5  ;;  %v993_v41 = vrot.slane %v991_v24, 5  ;;  %v997_v11 = vrot.slane %v995_v20, 4  ;;  %v4325_v30 = vld [vmem:[#allocation2 + $0x2c] sm:$0x1] }
  0x6a   : > { %2238 = vmatmul.mubr.bf16.gmra.mrb[28].mxu0 %v3033_v19  ;;  %v1003_v5 = vrot.slane %v1001_v2, 5  ;;  %v699_v59 = vsel %vm3906_vm6, %v3955_v38, %v698_v29  ;;  %v3074_v4 = vcombine.low %v4287_v7, %v4289_v53  ;;  %v3011_v9 = vrot.slane %v869_v22, 9 }
  0x6b   : > { %2375 = vmatprep.mubr.bf16.mxu0 %v3066_v42  ;;  %v988_v19 = vor.u32 %v987_v39, %v984_v48  ;;  %v3058_v3 = vcombine.low %v689_v31, %v699_v59  ;;  %v911_v44 = vrot.slane %v909_v37, 4  ;;  %v998_v24 = vor.u32 %v997_v11, %v993_v41 }
  0x6c   : > { %v912_v38 = vrot.slane %v4304_v43, 5  ;;  %v1006_v20 = vshrl.u32 %v4311_v57, 16  ;;  %v1009_v7 = vshll.u32 %v4311_v57, 16  ;;  %v910_v23 = vsel %vm3919_vm7, %v3011_v9, %v909_v37  ;;  %v3643_v37 = vld [vmem:[%s4922_s1 + $0x208] sm:$0xff]  }
  0x6d   : > { %v989_v29 = vrot.slane %v988_v19, 4  ;;  %v1015_v2 = vshll.u32 %v4313_v54, 16  ;;  %v1019_v8 = vshrl.u32 %v4313_v54, 16  ;;  %v999_v17 = vrot.slane %v998_v24, 4 }
  0x6e   : > { %v913_v31 = vsel %vm3919_vm7, %v911_v44, %v912_v38  ;;  %v1008_v22 = vrot.slane %v1006_v20, 4  ;;  %v1011_v42 = vrot.slane %v1009_v7, 5  ;;  %v1025_v24 = vshll.u32 %v4325_v30, 16  ;;  %v870_v38 = vld [vmem:[#allocation2 + $0x24] sm:$0xe] }
  0x6f   : > { %v994_v48 = vsel %vm3906_vm6, %v989_v29, %v993_v41  ;;  %v3067_v39 = vcombine.low %v910_v23, %v913_v31  ;;  %v1017_v11 = vrot.slane %v1015_v2, 5  ;;  %v1021_v59 = vrot.slane %v1019_v8, 4  ;;  %v3656_v29 = vld [vmem:[#allocation2 + $0x1c] sm:$0xf]  ;;  %v4343_v2 = vld [vmem:[#allocation2 + $0x2c] sm:$0x1] }
  0x70   : > { %v1004_v19 = vsel %vm3906_vm6, %v999_v17, %v1003_v5  ;;  %v1012_v9 = vor.u32 %v1011_v42, %v1008_v22  ;;  %v1217_v44 = vrot.slane %v4325_v30, 5  ;;  %v708_v41 = vrot.slane %v707_v12, 4  ;;  %v3645_v42 = vld [vmem:[%s4922_s1 + $0x210] sm:$0xff]  }
  0x71   : > { %v3082_v20 = vcombine.low %v994_v48, %v1004_v19  ;;  %v1022_v7 = vor.u32 %v1021_v59, %v1017_v11  ;;  %v710_v23 = vshll.u32 %v3656_v29, 16  ;;  %v1027_v8 = vrot.slane %v1025_v24, 5 }
  0x72   : > { %2376 = vmatmul.mubr.bf16.vlgmr.msra.gmra.mrb[32].mxu0 %v3058_v3  ;;  %v1013_v5 = vrot.slane %v1012_v9, 4  ;;  %v716_v17 = vrot.slane %v714_v52, 4  ;;  %v720_v31 = vshll.u32 %v4304_v43, 16  ;;  %v4349_v3 = vld [vmem:[#allocation2 + $0x30] sm:$0xf]  ;;  %v3075_v62 = vcombine.low %v4311_v57, %v4313_v54 }
  0x73   : > { %3479 = vmatpush3.bf16.msra.mxu0 %v4248_v26  ;;  %2383 = vmatprep.mubr.bf16.mxu0 %v3067_v39  ;;  %v1023_v22 = vrot.slane %v1022_v7, 4  ;;  %v712_v56 = vrot.slane %v710_v23, 5  ;;  %v3012_v12 = vrot.slane %v870_v38, 9  ;;  %v916_v43 = vrot.slane %v4013_v27, 5  ;;  %v4360_v39 = vld [vmem:[#allocation2 + $0x34] sm:$0xf] }
  0x74   : > { %2472 = vmatprep.mubr.bf16.mxu1 %v3082_v20  ;;  %3480 = vmatprep.subr.bf16.mxu0 %v3643_v37  ;;  %v1018_v28 = vsel %vm3906_vm6, %v1013_v5, %v1017_v11  ;;  %v722_v52 = vrot.slane %v720_v31, 5  ;;  %v919_v48 = vrot.slane %v4343_v2, 5  ;;  %v4366_v9 = vld [vmem:[#allocation2 + $0x38] sm:$0x1]  ;;  %v1033_v20 = vshll.u32 %v4349_v3, 16 }
  0x75   : > { %2473 = vmatmul.mubr.bf16.vlgmr.msra.gmra.mrb[32].mxu1 %v3074_v4  ;;  %v1028_v57 = vsel %vm3906_vm6, %v1023_v22, %v1027_v8  ;;  %v713_v59 = vsel %vm3906_vm6, %v708_v41, %v712_v56  ;;  %v717_v19 = vor.u32 %v716_v17, %v712_v56  ;;  %v1030_v4 = vshrl.u32 %v4349_v3, 16  ;;  %v4386_v22 = vld [vmem:[#allocation2 + $0x38] sm:$0x1] }
  0x76   : > { %3518 = vmatpush3.bf16.msra.mxu1 %v4248_v26  ;;  %v3083_v11 = vcombine.low %v1018_v28, %v1028_v57  ;;  %v917_v24 = vsel %vm3919_vm7, %v3012_v12, %v916_v43  ;;  %v918_v38 = vrot.slane %v916_v43, 4  ;;  %v1039_v41 = vshll.u32 %v4360_v39, 16  ;;  %v3647_v26 = vld [vmem:[%s4922_s1 + $0x218] sm:$0xff]   ;;  %v871_v57 = vld [vmem:[#allocation2 + $0x30] sm:$0xe] }
  0x77   : > { %3481 = vmatpush3.bf16.msra.mxu0 %v3643_v37  ;;  %3511 = vmatprep.subr.bf16.mxu1 %v3643_v37  ;;  %v718_v7 = vrot.slane %v717_v19, 4  ;;  %v1032_v29 = vrot.slane %v1030_v4, 4  ;;  %v1043_v23 = vshrl.u32 %v4360_v39, 16  ;;  %v1035_v8 = vrot.slane %v1033_v20, 5  ;;  %v4390_v19 = vld [vmem:[#allocation2 + $0x3c] sm:$0xf] }
  0x78   : > { %3482 = vmatprep.subr.bf16.mxu0 %v3645_v42  ;;  %2480 = vmatprep.mubr.bf16.mxu1 %v3083_v11  ;;  %v920_v5 = vsel %vm3919_vm7, %v918_v38, %v919_v48  ;;  %v1049_v17 = vshll.u32 %v4366_v9, 16  ;;  %v4384_v31 = vrot.slane %v731_v58, 4  ;;  %v1041_v28 = vrot.slane %v1039_v41, 5 }
  0x79   : > { %v723_v56 = vsel %vm3906_vm6, %v718_v7, %v722_v52  ;;  %v3068_v12 = vcombine.low %v917_v24, %v920_v5  ;;  %v1045_v43 = vrot.slane %v1043_v23, 4  ;;  %v1036_v4 = vor.u32 %v1035_v8, %v1032_v29  ;;  %v4405_v29 = vld [vmem:[#allocation2 + $0x40] sm:$0xf]  ;;  %v4415_v8 = vld [vmem:[#allocation2 + $0x44] sm:$0x1] }
  0x7a   : > { %3519 = vmatpush3.bf16.msra.mxu1 %v3643_v37  ;;  %v3059_v48 = vcombine.low %v713_v59, %v723_v56  ;;  %v1051_v11 = vrot.slane %v1049_v17, 5  ;;  %v734_v38 = vshll.u32 %v4013_v27, 16  ;;  %v740_v50 = vrot.slane %v738_v51, 4  ;;  %v4401_v37 = vld [vmem:[%s4922_s1 + $0x220] sm:$0xff]  }
  0x7b   : > { %3483 = vmatpush3.bf16.msra.mxu0 %v3645_v42  ;;  %3512 = vmatprep.subr.bf16.mxu1 %v3645_v42  ;;  %v1046_v49 = vor.u32 %v1045_v43, %v1041_v28  ;;  %v744_v58 = vshll.u32 %v4343_v2, 16  ;;  %v3076_v52 = vcombine.low %v4349_v3, %v4360_v39  ;;  %v1037_v59 = vrot.slane %v1036_v4, 4 }
  0x7c   : > { %3484 = vmatprep.subr.bf16.mxu0 %v3647_v26  ;;  %2384 = vmatmul.mubr.bf16.gmra.mrb[36].mxu0 %v3059_v48  ;;  %v736_v24 = vrot.slane %v734_v38, 5  ;;  %v3013_v20 = vrot.slane %v871_v57, 9  ;;  %v923_v7 = vrot.slane %v4062_v32, 5  ;;  %v926_v2 = vrot.slane %v4386_v22, 5 }
  0x7d   : > { %2481 = vmatmul.mubr.bf16.gmra.mrb[36].mxu1 %v3075_v62  ;;  %2391 = vmatprep.mubr.bf16.mxu0 %v3068_v12  ;;  %v1047_v27 = vrot.slane %v1046_v49, 4  ;;  %v746_v51 = vrot.slane %v744_v58, 5  ;;  %v1054_v3 = vshrl.u32 %v4390_v19, 16  ;;  %v1042_v41 = vsel %vm3906_vm6, %v1037_v59, %v1041_v28  ;;  %v305_v58 = vld [vmem:[%s3856_s5 + $0x68] sm:$0x1]  ;;  %v4442_v59 = vld [vmem:[%s4922_s1 + $0x230] sm:$0xff]  }
  0x7e   : > { %3520 = vmatpush3.bf16.msra.mxu1 %v3645_v42  ;;  %v737_v62 = vsel %vm3906_vm6, %v4384_v31, %v736_v24  ;;  %v741_v23 = vor.u32 %v740_v50, %v736_v24  ;;  %v924_v5 = vsel %vm3919_vm7, %v3013_v20, %v923_v7  ;;  %v925_v56 = vrot.slane %v923_v7, 4  ;;  %v4424_v31 = vld [vmem:[%s4922_s1 + $0x228] sm:$0xff]   ;;  %v4436_v50 = vld [vmem:[#allocation2 + $0x44] sm:$0x1]  ;;  %337 = vst.msk [vmem:[#allocation2 + $0x68] sm:$0x1] %vm312_vm1, %v305_v58 }
  0x7f   : > { %3485 = vmatpush3.bf16.msra.mxu0 %v3647_v26  ;;  %v1052_v17 = vsel %vm3906_vm6, %v1047_v27, %v1051_v11  ;;  %v1056_v42 = vrot.slane %v1054_v3, 4  ;;  %v1057_v12 = vshll.u32 %v4390_v19, 16  ;;  %3513 = vmatprep.subr.bf16.mxu1 %v3647_v26  ;;  %v1063_v57 = vshll.u32 %v4405_v29, 16 }
  0x80   : > { %3486 = vmatprep.subr.bf16.mxu0 %v4401_v37  ;;  %v3084_v28 = vcombine.low %v1042_v41, %v1052_v17  ;;  %v742_v43 = vrot.slane %v741_v23, 4  ;;  %v1067_v48 = vshrl.u32 %v4405_v29, 16  ;;  %v927_v4 = vsel %vm3919_vm7, %v925_v56, %v926_v2  ;;  %v872_v2 = vld [vmem:[#allocation2 + $0x3c] sm:$0xe]  ;;  %v306_v17 = vld [vmem:[%s3856_s5 + $0x6c] sm:$0xf] }
  0x81   : > { %v1059_v11 = vrot.slane %v1057_v12, 5  ;;  %v1073_v38 = vshll.u32 %v4415_v8, 16  ;;  %v4434_v49 = vrot.slane %v755_v13, 4  ;;  %v3069_v20 = vcombine.low %v924_v5, %v927_v4  ;;  %338 = vst.msk [vmem:[#allocation2 + $0x6c] sm:$0xf] %vm309_vm0, %v306_v17 }
  0x82   : > { %3521 = vmatpush3.bf16.msra.mxu1 %v3647_v26  ;;  %2488 = vmatprep.mubr.bf16.mxu1 %v3084_v28  ;;  %v747_v24 = vsel %vm3906_vm6, %v742_v43, %v746_v51  ;;  %v1065_v7 = vrot.slane %v1063_v57, 5  ;;  %v1069_v27 = vrot.slane %v1067_v48, 4  ;;  %v758_v3 = vshll.u32 %v4062_v32, 16  ;;  %v4468_v32 = vld [vmem:[%s4922_s1 + $0x238] sm:$0xff]   ;;  %v308_v57 = vld [vmem:[%s3856_s5 + $0x74] sm:$0x1] }
  0x83   : > { %3487 = vmatpush3.bf16.msra.mxu0 %v4401_v37  ;;  %v3060_v47 = vcombine.low %v737_v62, %v747_v24  ;;  %v1060_v13 = vor.u32 %v1059_v11, %v1056_v42  ;;  %v1075_v26 = vrot.slane %v1073_v38, 5  ;;  %3514 = vmatprep.subr.bf16.mxu1 %v4401_v37  ;;  %v764_v41 = vrot.slane %v762_v40, 4  ;;  %v4458_v62 = vld [vmem:[#allocation2 + $0x4c] sm:$0xf]  ;;  %v4482_v38 = vld [vmem:[#allocation2 + $0x50] sm:$0x1] }
  0x84   : > { %3488 = vmatprep.subr.bf16.mxu0 %v4424_v31  ;;  %v1070_v51 = vor.u32 %v1069_v27, %v1065_v7  ;;  %v768_v23 = vshll.u32 %v4386_v22, 16  ;;  %v3077_v5 = vcombine.low %v4390_v19, %v4405_v29  ;;  %v760_v42 = vrot.slane %v758_v3, 5  ;;  %340 = vst.msk [vmem:[#allocation2 + $0x74] sm:$0x1] %vm312_vm1, %v308_v57 }
  0x85   : > { %2489 = vmatmul.mubr.bf16.gmra.mrb[40].mxu1 %v3076_v52  ;;  %2392 = vmatmul.mubr.bf16.gmra.mrb[40].mxu0 %v3060_v47  ;;  %v1061_v56 = vrot.slane %v1060_v13, 4  ;;  %v3014_v12 = vrot.slane %v872_v2, 9  ;;  %v930_v28 = vrot.slane %v4129_v60, 5  ;;  %v307_v52 = vld [vmem:[%s3856_s5 + $0x70] sm:$0xf]  ;;  %v933_v19 = vrot.slane %v4436_v50, 5 }
  0x86   : > { %3522 = vmatpush3.bf16.msra.mxu1 %v4401_v37  ;;  %2399 = vmatprep.mubr.bf16.mxu0 %v3069_v20  ;;  %v1071_v40 = vrot.slane %v1070_v51, 4  ;;  %v770_v22 = vrot.slane %v768_v23, 5  ;;  %v1078_v43 = vshrl.u32 %v4446_v46, 16  ;;  %339 = vst.msk [vmem:[#allocation2 + $0x70] sm:$0xf] %vm309_vm0, %v307_v52  ;;  %v761_v48 = vsel %vm3906_vm6, %v4434_v49, %v760_v42  ;;  %s2993_s5 = sshll.u32 %s3679_s15, 3 }
  0x87   : > { %3489 = vmatpush3.bf16.msra.mxu0 %v4424_v31  ;;  %v1066_v37 = vsel %vm3906_vm6, %v1061_v56, %v1065_v7  ;;  %v765_v4 = vor.u32 %v764_v41, %v760_v42  ;;  %v931_v11 = vsel %vm3919_vm7, %v3014_v12, %v930_v28  ;;  %v932_v24 = vrot.slane %v930_v28, 4  ;;  %3515 = vmatprep.subr.bf16.mxu1 %v4424_v31  ;;  %v873_v56 = vld [vmem:[#allocation2 + $0x48] sm:$0xe]  ;;  %p228_p6 = scmp.lt.s32.totalorder %s2993_s5, 15  ;;  %s4948_s15 = smov (!%p238_p7, %s3679_s15), 1 }
  0x88   : > { %3490 = vmatprep.subr.bf16.mxu0 %v4442_v59  ;;  %v1076_v58 = vsel %vm3906_vm6, %v1071_v40, %v1075_v26  ;;  %v1080_v20 = vrot.slane %v1078_v43, 4  ;;  %v1081_v7 = vshll.u32 %v4446_v46, 16  ;;  %v1087_v2 = vshll.u32 %v4458_v62, 16  ;;  %s241_s9 = sadd.s32 %s2997_s8, %s4948_s15 }
  0x89   : > { %v3085_v49 = vcombine.low %v1066_v37, %v1076_v58  ;;  %v766_v27 = vrot.slane %v765_v4, 4  ;;  %v1091_v47 = vshrl.u32 %v4458_v62, 16  ;;  %v934_v13 = vsel %vm3919_vm7, %v932_v24, %v933_v19  ;;  %v4528_v24 = vld [vmem:[#allocation2 + $0x5c] sm:$0x1]  ;;  %s4946_s5 = smov (!%p228_p6, %s2993_s5), 15  ;;  %s2998_s10 = sshll.u32 %s241_s9, 1 }
  0x8a   : > { %3523 = vmatpush3.bf16.msra.mxu1 %v4424_v31  ;;  %v1083_v3 = vrot.slane %v1081_v7, 5  ;;  %v1097_v26 = vshll.u32 %v4482_v38, 16  ;;  %v780_v51 = vrot.slane %v779_v14, 4  ;;  %v3070_v23 = vcombine.low %v931_v11, %v934_v13  ;;  %v4507_v14 = vld [vmem:[#allocation2 + $0x54] sm:$0xf]  ;;  %s2994_s24 = sshll.u32 %s4946_s5, 1  ;;  %s243_s13 = scalar_lea.vmem %s4925_s4, %s2998_s10 }
  0x8b   : > { %3491 = vmatpush3.bf16.msra.mxu0 %v4442_v59  ;;  %3516 = vmatprep.subr.bf16.mxu1 %v4442_v59  ;;  %v771_v41 = vsel %vm3906_vm6, %v766_v27, %v770_v22  ;;  %v1089_v31 = vrot.slane %v1087_v2, 5  ;;  %v1093_v17 = vrot.slane %v1091_v47, 4  ;;  %v782_v10 = vshll.u32 %v4129_v60, 16  ;;  %s232_s26 = sadd.s32 %s2995_s25, %s2994_s24 }
  0x8c   : > { %2496 = vmatprep.mubr.bf16.mxu1 %v3085_v49  ;;  %3492 = vmatprep.subr.bf16.mxu0 %v4468_v32  ;;  %v3061_v42 = vcombine.low %v761_v48, %v771_v41  ;;  %v1084_v12 = vor.u32 %v1083_v3, %v1080_v20  ;;  %v1099_v28 = vrot.slane %v1097_v26, 5  ;;  %v788_v40 = vrot.slane %v786_v55, 4  ;;  %v4518_v55 = vld [vmem:[#allocation2 + $0x58] sm:$0xf]  ;;  %s2996_s29 = sshll.u32 %s232_s26, 2 }
  0x8d   : > { %2497 = vmatmul.mubr.bf16.gmra.mrb[44].mxu1 %v3077_v5  ;;  %v1094_v52 = vor.u32 %v1093_v17, %v1089_v31  ;;  %v792_v22 = vshll.u32 %v4436_v50, 16  ;;  %v3078_v19 = vcombine.low %v4446_v46, %v4458_v62  ;;  %v784_v43 = vrot.slane %v782_v10, 5  ;;  %s4763_s7 = scalar_lea.vmem %s4924_s3, %s2996_s29 }
  0x8e   : > { %3524 = vmatpush3.bf16.msra.mxu1 %v4442_v59  ;;  %2400 = vmatmul.mubr.bf16.gmra.mrb[44].mxu0 %v3061_v42  ;;  %v1085_v5 = vrot.slane %v1084_v12, 4  ;;  %v3015_v57 = vrot.slane %v873_v56, 9  ;;  %v937_v37 = vrot.slane %v4159_v33, 5  ;;  %v940_v60 = vrot.slane %v4505_v63, 5  ;;  %v874_v42 = vld [vmem:[#allocation2 + $0x54] sm:$0xe] }
  0x8f   : > { %3517 = vmatprep.subr.bf16.mxu1 %v4468_v32  ;;  %2407 = vmatprep.mubr.bf16.mxu0 %v3070_v23  ;;  %v1095_v48 = vrot.slane %v1094_v52, 4  ;;  %v794_v4 = vrot.slane %v792_v22, 5  ;;  %v1102_v50 = vshrl.u32 %v4507_v14, 16  ;;  %v785_v46 = vsel %vm3906_vm6, %v780_v51, %v784_v43 }
  0x90   : > { %3493 = vmatpush3.bf16.msra.mxu0 %v4468_v32  ;;  %v1090_v59 = vsel %vm3906_vm6, %v1085_v5, %v1089_v31  ;;  %v789_v11 = vor.u32 %v788_v40, %v784_v43  ;;  %v938_v58 = vsel %vm3919_vm7, %v3015_v57, %v937_v37  ;;  %v939_v7 = vrot.slane %v937_v37, 4  ;;  %v674_v40 = vld [vmem:[#allocation2 + $0x5c] sm:$0x1]  ;;  %v4549_v37 = vld [vmem:[#allocation2 + $0x60] sm:$0xf] }
  0x91   : > { %v1100_v20 = vsel %vm3906_vm6, %v1095_v48, %v1099_v28  ;;  %v1104_v49 = vrot.slane %v1102_v50, 4  ;;  %v1105_v27 = vshll.u32 %v4507_v14, 16  ;;  %v1111_v13 = vshll.u32 %v4518_v55, 16 }
  0x92   : > { %3525 = vmatpush3.bf16.msra.mxu1 %v4468_v32  ;;  %v3086_v2 = vcombine.low %v1090_v59, %v1100_v20  ;;  %v790_v47 = vrot.slane %v789_v11, 4  ;;  %v1115_v3 = vshrl.u32 %v4518_v55, 16  ;;  %v941_v26 = vsel %vm3919_vm7, %v939_v7, %v940_v60  ;;  %v4554_v59 = vld [vmem:[#allocation2 + $0x64] sm:$0xf]  ;;  %v4565_v20 = vld [vmem:[#allocation2 + $0x68] sm:$0x1] }
  0x93   : > { %v1107_v51 = vrot.slane %v1105_v27, 5  ;;  %v1121_v41 = vshll.u32 %v4528_v24, 16  ;;  %v1245_v23 = vrot.slane %v4528_v24, 5  ;;  %v3071_v17 = vcombine.low %v938_v58, %v941_v26 }
  0x94   : > { %2504 = vmatprep.mubr.bf16.mxu1 %v3086_v2  ;;  %v795_v31 = vsel %vm3906_vm6, %v790_v47, %v794_v4  ;;  %v1113_v32 = vrot.slane %v1111_v13, 5  ;;  %v1117_v56 = vrot.slane %v1115_v3, 4  ;;  %v804_v52 = vrot.slane %v803_v21, 4 }
  0x95   : > { %v3062_v12 = vcombine.low %v785_v46, %v795_v31  ;;  %2505 = vmatmul.mubr.bf16.gmra.mrb[48].mxu1 %v3078_v19  ;;  %v1108_v28 = vor.u32 %v1107_v51, %v1104_v49  ;;  %v1123_v10 = vrot.slane %v1121_v41, 5  ;;  %v806_v5 = vshll.u32 %v4159_v33, 16 }
  0x96   : > { %v1118_v22 = vor.u32 %v1117_v56, %v1113_v32  ;;  %v812_v43 = vrot.slane %v810_v36, 4  ;;  %v816_v57 = vshll.u32 %v4505_v63, 16  ;;  %v3079_v19 = vcombine.low %v4507_v14, %v4518_v55 }
  0x97   : > { %2408 = vmatmul.mubr.bf16.gmra.mrb[48].mxu0 %v3062_v12  ;;  %v1109_v48 = vrot.slane %v1108_v28, 4  ;;  %v3016_v4 = vrot.slane %v874_v42, 9  ;;  %v944_v61 = vrot.slane %v4205_v45, 5  ;;  %v808_v21 = vrot.slane %v806_v5, 5  ;;  %v875_v42 = vld [vmem:[#allocation2 + $0x60] sm:$0xe] }
  0x98   : > { %2415 = vmatprep.mubr.bf16.mxu0 %v3071_v17  ;;  %v1119_v0 = vrot.slane %v1118_v22, 4  ;;  %v818_v60 = vrot.slane %v816_v57, 5  ;;  %v947_v50 = vrot.slane %v674_v40, 5  ;;  %v1126_v46 = vshrl.u32 %v4549_v37, 16  ;;  %v675_v5 = vld [vmem:[#allocation2 + $0x68] sm:$0x1] }
  0x99   : > { %v1114_v33 = vsel %vm3906_vm6, %v1109_v48, %v1113_v32  ;;  %v945_v36 = vsel %vm3919_vm7, %v3016_v4, %v944_v61  ;;  %v946_v63 = vrot.slane %v944_v61, 4  ;;  %v809_v11 = vsel %vm3906_vm6, %v804_v52, %v808_v21  ;;  %v4581_v61 = vld [vmem:[#allocation2 + $0x6c] sm:$0xf] }
  0x9a   : > { %v1124_v14 = vsel %vm3906_vm6, %v1119_v0, %v1123_v10  ;;  %v813_v58 = vor.u32 %v812_v43, %v808_v21  ;;  %v1129_v7 = vshll.u32 %v4549_v37, 16  ;;  %v1128_v2 = vrot.slane %v1126_v46, 4 }
  0x9b   : > { %v3087_v49 = vcombine.low %v1114_v33, %v1124_v14  ;;  %v948_v27 = vsel %vm3919_vm7, %v946_v63, %v947_v50  ;;  %v1135_v47 = vshll.u32 %v4554_v59, 16  ;;  %v1139_v51 = vshrl.u32 %v4554_v59, 16  ;;  %v4588_v33 = vld [vmem:[#allocation2 + $0x70] sm:$0xf] }
  0x9c   : > { %v814_v13 = vrot.slane %v813_v58, 4  ;;  %v3072_v3 = vcombine.low %v945_v36, %v948_v27  ;;  %v1131_v26 = vrot.slane %v1129_v7, 5  ;;  %v1145_v31 = vshll.u32 %v4565_v20, 16 }
  0x9d   : > { %2512 = vmatprep.mubr.bf16.mxu1 %v3087_v49  ;;  %v1137_v41 = vrot.slane %v1135_v47, 5  ;;  %v4930_v17 = vor.u32 %v4231_v18, %v4229_v16  ;;  %v830_v56 = vshll.u32 %v4205_v45, 16  ;;  %v1141_v10 = vrot.slane %v1139_v51, 4  ;;  %v4598_v49 = vld [vmem:[#allocation2 + $0x74] sm:$0x1] }
  0x9e   : > { %v819_v12 = vsel %vm3906_vm6, %v814_v13, %v818_v60  ;;  %2513 = vmatmul.mubr.bf16.gmra.mrb[52].mxu1 %v3079_v19  ;;  %v1132_v28 = vor.u32 %v1131_v26, %v1128_v2  ;;  %v4931_v52 = vshrl.u32 %v4205_v45, 16  ;;  %v1147_v57 = vrot.slane %v1145_v31, 5 }
  0x9f   : > { %v828_v32 = vrot.slane %v4930_v17, 4  ;;  %v3063_v43 = vcombine.low %v809_v11, %v819_v12  ;;  %v832_v48 = vrot.slane %v830_v56, 5  ;;  %v840_v4 = vshll.u32 %v674_v40, 16 }
  0xa0   : > { %v836_v22 = vrot.slane %v4931_v52, 4  ;;  %v1133_v16 = vrot.slane %v1132_v28, 4  ;;  %v1142_v18 = vor.u32 %v1141_v10, %v1137_v41  ;;  %v3080_v0 = vcombine.low %v4549_v37, %v4554_v59  ;;  %v1173_v10 = vld [vmem:[#allocation2 + $0x18] sm:$0xe] }
  0xa1   : > { %v3017_v21 = vrot.slane %v875_v42, 9  ;;  %2416 = vmatmul.mubr.bf16.gmra.mrb[52].mxu0 %v3063_v43  ;;  %v833_v19 = vsel %vm3906_vm6, %v828_v32, %v832_v48  ;;  %v842_v45 = vrot.slane %v840_v4, 5  ;;  %v951_v50 = vrot.slane %v4274_v25, 5 }
  0xa2   : > { %v837_v60 = vor.u32 %v836_v22, %v832_v48  ;;  %2423 = vmatprep.mubr.bf16.mxu0 %v3072_v3  ;;  %v1138_v40 = vsel %vm3906_vm6, %v1133_v16, %v1137_v41  ;;  %v1143_v36 = vrot.slane %v1142_v18, 4  ;;  %v954_v63 = vrot.slane %v675_v5, 5 }
  0xa3   : > { %v1150_v46 = vshrl.u32 %v4581_v61, 16  ;;  %v952_v14 = vsel %vm3919_vm7, %v3017_v21, %v951_v50  ;;  %v953_v11 = vrot.slane %v951_v50, 4  ;;  %v1153_v58 = vshll.u32 %v4581_v61, 16  ;;  %v1174_v50 = vld [vmem:[#allocation2 + $0x24] sm:$0xe] }
  0xa4   : > { %v838_v37 = vrot.slane %v837_v60, 4  ;;  %v1148_v7 = vsel %vm3906_vm6, %v1143_v36, %v1147_v57  ;;  %v1159_v2 = vshll.u32 %v4588_v33, 16  ;;  %v1163_v47 = vshrl.u32 %v4588_v33, 16 }
  0xa5   : > { %v1152_v27 = vrot.slane %v1150_v46, 4  ;;  %v3088_v13 = vcombine.low %v1138_v40, %v1148_v7  ;;  %v955_v26 = vsel %vm3919_vm7, %v953_v11, %v954_v63  ;;  %v1155_v51 = vrot.slane %v1153_v58, 5  ;;  %v1178_v40 = vld [vmem:[#allocation2 + $0x54] sm:$0xe] }
  0xa6   : > { %v843_v3 = vsel %vm3906_vm6, %v838_v37, %v842_v45  ;;  %v3073_v31 = vcombine.low %v952_v14, %v955_v26  ;;  %v1161_v17 = vrot.slane %v1159_v2, 5  ;;  %v1165_v32 = vrot.slane %v1163_v47, 4  ;;  %v1175_v47 = vld [vmem:[#allocation2 + $0x30] sm:$0xe] }
  0xa7   : > { %v3064_v41 = vcombine.low %v833_v19, %v843_v3  ;;  %2520 = vmatprep.mubr.bf16.mxu1 %v3088_v13  ;;  %v1156_v56 = vor.u32 %v1155_v51, %v1152_v27  ;;  %v1169_v42 = vshll.u32 %v4598_v49, 16  ;;  %v851_v12 = vor.u32 %v4285_v1, %v4283_v35  ;;  %v1177_v19 = vld [vmem:[#allocation2 + $0x48] sm:$0xe] }
  0xa8   : > { %v854_v28 = vshll.u32 %v4274_v25, 16  ;;  %2521 = vmatmul.mubr.bf16.gmra.mrb[56].mxu1 %v3080_v0  ;;  %v1166_v52 = vor.u32 %v1165_v32, %v1161_v17  ;;  %v4932_v22 = vshrl.u32 %v4274_v25, 16  ;;  %v864_v57 = vshll.u32 %v675_v5, 16 }
  0xa9   : > { %v3081_v48 = vcombine.low %v4581_v61, %v4588_v33  ;;  %2424 = vmatmul.mubr.bf16.gmra.mrb[56].mxu0 %v3064_v41  ;;  %v1157_v4 = vrot.slane %v1156_v56, 4  ;;  %v1171_v16 = vrot.slane %v1169_v42, 5  ;;  %v852_v18 = vrot.slane %v851_v12, 4 }
  0xaa   : > { %v860_v43 = vrot.slane %v4932_v22, 4  ;;  %v856_v21 = vrot.slane %v854_v28, 5  ;;  %2431 = vmatprep.mubr.bf16.mxu0 %v3073_v31  ;;  %v1167_v35 = vrot.slane %v1166_v52, 4  ;;  %v866_v1 = vrot.slane %v864_v57, 5  ;;  %v1180_v57 = vld [vmem:[#allocation2 + $0x6c] sm:$0xe] }
  0xab   : > { %v3018_v60 = vrot.slane %v1173_v10, 9  ;;  %v1207_v0 = vrot.slane %v4289_v53, 5  ;;  %v1162_v25 = vsel %vm3906_vm6, %v1157_v4, %v1161_v17  ;;  %v1210_v61 = vrot.slane %v4291_v34, 5  ;;  %v1176_v10 = vld [vmem:[#allocation2 + $0x3c] sm:$0xe] }
  0xac   : > { %v857_v5 = vsel %vm3906_vm6, %v852_v18, %v856_v21  ;;  %v861_v45 = vor.u32 %v860_v43, %v856_v21  ;;  %v1172_v36 = vsel %vm3906_vm6, %v1167_v35, %v1171_v16  ;;  %v3022_v37 = vrot.slane %v1177_v19, 9 }
  0xad   : > { %v1208_v63 = vsel %vm3919_vm7, %v3018_v60, %v1207_v0  ;;  %v1209_v46 = vrot.slane %v1207_v0, 4  ;;  %v3089_v53 = vcombine.low %v1162_v25, %v1172_v36  ;;  %v1235_v11 = vrot.slane %v4458_v62, 5 }
  0xae   : > { %v862_v14 = vrot.slane %v861_v45, 4  ;;  %v1238_v58 = vrot.slane %v4482_v38, 5  ;;  %v3019_v34 = vrot.slane %v1174_v50, 9  ;;  %v1214_v27 = vrot.slane %v4313_v54, 5  ;;  %v1179_v54 = vld [vmem:[#allocation2 + $0x60] sm:$0xe] }
  0xaf   : > { %v1211_v7 = vsel %vm3919_vm7, %v1209_v46, %v1210_v61  ;;  %v3023_v2 = vrot.slane %v1178_v40, 9  ;;  %2528 = vmatprep.mubr.bf16.mxu1 %v3089_v53  ;;  %v1236_v26 = vsel %vm3919_vm7, %v3022_v37, %v1235_v11  ;;  %v1237_v51 = vrot.slane %v1235_v11, 4 }
  0xb0   : > { %v867_v13 = vsel %vm3906_vm6, %v862_v14, %v866_v1  ;;  %v3090_v3 = vcombine.low %v1208_v63, %v1211_v7  ;;  %2529 = vmatmul.mubr.bf16.gmra.mrb[60].mxu1 %v3081_v48  ;;  %v1215_v38 = vsel %vm3919_vm7, %v3019_v34, %v1214_v27  ;;  %v1216_v41 = vrot.slane %v1214_v27, 4 }
  0xb1   : > { %v3065_v62 = vcombine.low %v857_v5, %v867_v13  ;;  %v1242_v31 = vrot.slane %v4518_v55, 5  ;;  %v1239_v17 = vsel %vm3919_vm7, %v1237_v51, %v1238_v58  ;;  %v3020_v32 = vrot.slane %v1175_v47, 9 }
  0xb2   : > { %v1221_v6 = vrot.slane %v4360_v39, 5  ;;  %v1224_v56 = vrot.slane %v4366_v9, 5  ;;  %v3094_v42 = vcombine.low %v1236_v26, %v1239_v17  ;;  %v1218_v12 = vsel %vm3919_vm7, %v1216_v41, %v1217_v44 }
  0xb3   : > { %2432 = vmatmul.mubr.bf16.gmra.mrb[60].mxu0 %v3065_v62  ;;  %v1243_v28 = vsel %vm3919_vm7, %v3023_v2, %v1242_v31  ;;  %v1244_v55 = vrot.slane %v1242_v31, 4  ;;  %v3091_v52 = vcombine.low %v1215_v38, %v1218_v12  ;;  %v3024_v43 = vrot.slane %v1179_v54, 9 }
  0xb4   : > { %3494 = vmatprep.mubr.bf16.mxu0 %v3090_v3  ;;  %v1223_v22 = vrot.slane %v1221_v6, 4  ;;  %3502 = vmatprep.mubr.bf16.mxu1 %v3094_v42  ;;  %v1222_v30 = vsel %vm3919_vm7, %v3020_v32, %v1221_v6  ;;  %v1249_v44 = vrot.slane %v4554_v59, 5  ;;  %v1252_v9 = vrot.slane %v4565_v20, 5 }
  0xb5   : > { %v1246_v39 = vsel %vm3919_vm7, %v1244_v55, %v1245_v23  ;;  %v3021_v16 = vrot.slane %v1176_v10, 9  ;;  %v1228_v18 = vrot.slane %v4405_v29, 5  ;;  %v1231_v23 = vrot.slane %v4415_v8, 5 }
  0xb6   : > { %v3095_v48 = vcombine.low %v1243_v28, %v1246_v39  ;;  %v1225_v4 = vsel %vm3919_vm7, %v1223_v22, %v1224_v56  ;;  %v1250_v24 = vsel %vm3919_vm7, %v3024_v43, %v1249_v44  ;;  %v1251_v21 = vrot.slane %v1249_v44, 4 }
  0xb7   : > { %v3025_v19 = vrot.slane %v1180_v57, 9  ;;  %v3092_v35 = vcombine.low %v1222_v30, %v1225_v4  ;;  %v1230_v1 = vrot.slane %v1228_v18, 4  ;;  %v1256_v59 = vrot.slane %v4588_v33, 5 }
  0xb8   : > { %v1259_v20 = vrot.slane %v4598_v49, 5  ;;  %3503 = vmatmul.mubr.bf16.vlgmr.msra.gmra.mrb[64].mxu1 %v3095_v48  ;;  %v1253_v60 = vsel %vm3919_vm7, %v1251_v21, %v1252_v9  ;;  %v1229_v8 = vsel %vm3919_vm7, %v3021_v16, %v1228_v18 }
  0xb9   : > { %v3096_v0 = vcombine.low %v1250_v24, %v1253_v60  ;;  %v1257_v29 = vsel %vm3919_vm7, %v3025_v19, %v1256_v59  ;;  %v1258_v25 = vrot.slane %v1256_v59, 4  ;;  %v1232_v33 = vsel %vm3919_vm7, %v1230_v1, %v1231_v23 }
  0xba   : > { %v3093_v45 = vcombine.low %v1229_v8, %v1232_v33 }
  0xbb   : > { %3495 = vmatmul.mubr.bf16.vlgmr.msra.gmra.mrb[64].mxu0 %v3091_v52  ;;  %3506 = vmatprep.mubr.bf16.mxu1 %v3096_v0  ;;  %v1260_v49 = vsel %vm3919_vm7, %v1258_v25, %v1259_v20 }
  0xbc   : > { %3498 = vmatprep.mubr.bf16.mxu0 %v3092_v35  ;;  %v3097_v5 = vcombine.low %v1257_v29, %v1260_v49 }
  0xc0   : > { %3507 = vmatmul.mubr.bf16.gmra.mrb[68].mxu1 %v3097_v5 }
  0xc3   : > { %3499 = vmatmul.mubr.bf16.gmra.mrb[68].mxu0 %v3093_v45 }
 0x102   : > { %v3222_v61 = vpop.f32.mrb[0].mxu0 }
 0x103   : > { %v3223_v50 = vpop.f32.mrb[1].mxu0  ;;  %v3286_v40 = vpop.f32.mrb[0].mxu1 }
 0x104   : > { %v3224_v36 = vadd.f32 %v3223_v50, %v3222_v61  ;;  %v3225_v63 = vpop.f32.mrb[2].mxu0  ;;  %v3287_v46 = vpop.f32.mrb[1].mxu1 }
 0x105   : > { %v3226_v37 = vpop.f32.mrb[3].mxu0  ;;  %v3288_v53 = vadd.f32 %v3287_v46, %v3286_v40  ;;  %v3289_v14 = vpop.f32.mrb[2].mxu1 }
 0x106   : > { %v3227_v11 = vadd.f32 %v3226_v37, %v3225_v63  ;;  %v3290_v58 = vpop.f32.mrb[3].mxu1 }
 0x107   : > { %v4672_v7 = vadd.f32 %v3288_v53, %v3224_v36  ;;  %v3291_v34 = vadd.f32 %v3290_v58, %v3289_v14 }
 0x109   : > { %v4674_v15 = vadd.f32 %v3291_v34, %v3227_v11 }
 0x10c   : > { %v3292_v27 = vpop.f32.mrb[4].mxu1  ;;  %v3228_v2 = vpop.f32.mrb[4].mxu0 }
 0x10d   : > { %v3293_v47 = vpop.f32.mrb[5].mxu1  ;;  %v3229_v13 = vpop.f32.mrb[5].mxu0 }
 0x10e   : > { %v3294_v3 = vadd.f32 %v3293_v47, %v3292_v27  ;;  %v3295_v26 = vpop.f32.mrb[6].mxu1  ;;  %v3230_v51 = vadd.f32 %v3229_v13, %v3228_v2  ;;  %v3231_v62 = vpop.f32.mrb[6].mxu0 }
 0x10f   : > { %v3296_v38 = vpop.f32.mrb[7].mxu1  ;;  %v3232_v41 = vpop.f32.mrb[7].mxu0 }
 0x110   : > { %v3297_v31 = vadd.f32 %v3296_v38, %v3295_v26  ;;  %v4676_v54 = vadd.f32 %v3294_v3, %v3230_v51  ;;  %v3233_v17 = vadd.f32 %v3232_v41, %v3231_v62 }
 0x112   : > { %v4678_v32 = vadd.f32 %v3297_v31, %v3233_v17 }
 0x114   : > { %v3298_v6 = vpop.f32.mrb[8].mxu1  ;;  %v3234_v56 = vpop.f32.mrb[8].mxu0 }
 0x115   : > { %v3299_v42 = vpop.f32.mrb[9].mxu1  ;;  %v3235_v12 = vpop.f32.mrb[9].mxu0 }
 0x116   : > { %v3300_v28 = vadd.f32 %v3299_v42, %v3298_v6  ;;  %v3301_v55 = vpop.f32.mrb[10].mxu1  ;;  %v3236_v10 = vadd.f32 %v3235_v12, %v3234_v56  ;;  %v3237_v52 = vpop.f32.mrb[10].mxu0 }
 0x117   : > { %v3302_v22 = vpop.f32.mrb[11].mxu1  ;;  %v3238_v43 = vpop.f32.mrb[11].mxu0 }
 0x118   : > { %v3303_v57 = vadd.f32 %v3302_v22, %v3301_v55  ;;  %v4680_v39 = vadd.f32 %v3300_v28, %v3236_v10  ;;  %v3239_v30 = vadd.f32 %v3238_v43, %v3237_v52 }
 0x11a   : > { %v4682_v44 = vadd.f32 %v3303_v57, %v3239_v30 }
 0x11c   : > { %v3304_v9 = vpop.f32.mrb[12].mxu1  ;;  %v3240_v48 = vpop.f32.mrb[12].mxu0 }
 0x11d   : > { %v3305_v4 = vpop.f32.mrb[13].mxu1  ;;  %v3241_v16 = vpop.f32.mrb[13].mxu0 }
 0x11e   : > { %v3306_v18 = vadd.f32 %v3305_v4, %v3304_v9  ;;  %v3307_v24 = vpop.f32.mrb[14].mxu1  ;;  %v3242_v21 = vadd.f32 %v3241_v16, %v3240_v48  ;;  %v3243_v23 = vpop.f32.mrb[14].mxu0 }
 0x11f   : > { %v3308_v19 = vpop.f32.mrb[15].mxu1  ;;  %v3244_v35 = vpop.f32.mrb[15].mxu0 }
 0x120   : > { %v3309_v1 = vadd.f32 %v3308_v19, %v3307_v24  ;;  %v4684_v59 = vadd.f32 %v3306_v18, %v3242_v21  ;;  %v3245_v20 = vadd.f32 %v3244_v35, %v3243_v23 }
 0x122   : > { %v4686_v60 = vadd.f32 %v3309_v1, %v3245_v20 }
 0x124   : > { %v3310_v0 = vpop.f32.mrb[16].mxu1  ;;  %v3246_v29 = vpop.f32.mrb[16].mxu0 }
 0x125   : > { %v3311_v25 = vpop.f32.mrb[17].mxu1  ;;  %v3247_v8 = vpop.f32.mrb[17].mxu0 }
 0x126   : > { %v3312_v33 = vadd.f32 %v3311_v25, %v3310_v0  ;;  %v3313_v49 = vpop.f32.mrb[18].mxu1  ;;  %v3248_v5 = vadd.f32 %v3247_v8, %v3246_v29  ;;  %v3249_v45 = vpop.f32.mrb[18].mxu0 }
 0x127   : > { %v3314_v61 = vpop.f32.mrb[19].mxu1  ;;  %v3250_v50 = vpop.f32.mrb[19].mxu0 }
 0x128   : > { %v3315_v40 = vadd.f32 %v3314_v61, %v3313_v49  ;;  %v4688_v36 = vadd.f32 %v3312_v33, %v3248_v5  ;;  %v3251_v63 = vadd.f32 %v3250_v50, %v3249_v45 }
 0x12a   : > { %v4690_v46 = vadd.f32 %v3315_v40, %v3251_v63 }
 0x12c   : > { %v3316_v37 = vpop.f32.mrb[20].mxu1  ;;  %v3252_v14 = vpop.f32.mrb[20].mxu0 }
 0x12d   : > { %v3317_v53 = vpop.f32.mrb[21].mxu1  ;;  %v3253_v34 = vpop.f32.mrb[21].mxu0 }
 0x12e   : > { %v3318_v11 = vadd.f32 %v3317_v53, %v3316_v37  ;;  %v3319_v58 = vpop.f32.mrb[22].mxu1  ;;  %v3254_v2 = vadd.f32 %v3253_v34, %v3252_v14  ;;  %v3255_v47 = vpop.f32.mrb[22].mxu0 }
 0x12f   : > { %v3320_v27 = vpop.f32.mrb[23].mxu1  ;;  %v3256_v3 = vpop.f32.mrb[23].mxu0 }
 0x130   : > { %v3321_v13 = vadd.f32 %v3320_v27, %v3319_v58  ;;  %v4692_v26 = vadd.f32 %v3318_v11, %v3254_v2  ;;  %v3257_v51 = vadd.f32 %v3256_v3, %v3255_v47 }
 0x132   : > { %v4694_v62 = vadd.f32 %v3321_v13, %v3257_v51 }
 0x134   : > { %v3322_v38 = vpop.f32.mrb[24].mxu1 }
 0x135   : > { %v3323_v41 = vpop.f32.mrb[25].mxu1  ;;  %v3258_v6 = vpop.f32.mrb[24].mxu0 }
 0x136   : > { %v3324_v31 = vadd.f32 %v3323_v41, %v3322_v38  ;;  %v3325_v17 = vpop.f32.mrb[26].mxu1  ;;  %v3259_v42 = vpop.f32.mrb[25].mxu0 }
 0x137   : > { %v3326_v56 = vpop.f32.mrb[27].mxu1  ;;  %v3260_v28 = vadd.f32 %v3259_v42, %v3258_v6  ;;  %v3261_v55 = vpop.f32.mrb[26].mxu0 }
 0x138   : > { %v3327_v12 = vadd.f32 %v3326_v56, %v3325_v17  ;;  %v3262_v10 = vpop.f32.mrb[27].mxu0 }
 0x139   : > { %v4696_v52 = vadd.f32 %v3324_v31, %v3260_v28  ;;  %v3263_v22 = vadd.f32 %v3262_v10, %v3261_v55 }
 0x13b   : > { %v4698_v43 = vadd.f32 %v3327_v12, %v3263_v22 }
 0x13c   : > { %v3328_v57 = vpop.f32.mrb[28].mxu1 }
 0x13d   : > { %v3329_v30 = vpop.f32.mrb[29].mxu1  ;;  %v3264_v9 = vpop.f32.mrb[28].mxu0 }
 0x13e   : > { %v3330_v48 = vadd.f32 %v3329_v30, %v3328_v57  ;;  %v3331_v4 = vpop.f32.mrb[30].mxu1  ;;  %v3265_v16 = vpop.f32.mrb[29].mxu0 }
 0x13f   : > { %v3332_v18 = vpop.f32.mrb[31].mxu1  ;;  %v3266_v24 = vadd.f32 %v3265_v16, %v3264_v9  ;;  %v3267_v21 = vpop.f32.mrb[30].mxu0 }
 0x140   : > { %v3333_v23 = vadd.f32 %v3332_v18, %v3331_v4  ;;  %v3268_v19 = vpop.f32.mrb[31].mxu0 }
 0x141   : > { %v4700_v35 = vadd.f32 %v3330_v48, %v3266_v24  ;;  %v3269_v1 = vadd.f32 %v3268_v19, %v3267_v21 }
 0x143   : > { %v4702_v20 = vadd.f32 %v3333_v23, %v3269_v1 }
 0x145   : > { %v3350_v0 = vpop.f32.mrb[32].mxu0 }
 0x146   : > { %v3351_v29 = vpop.f32.mrb[33].mxu0 }
 0x147   : > { %v3352_v25 = vadd.f32 %v3351_v29, %v3350_v0  ;;  %v3353_v8 = vpop.f32.mrb[34].mxu0 }
 0x148   : > { %v3414_v33 = vpop.f32.mrb[32].mxu1  ;;  %v3354_v49 = vpop.f32.mrb[35].mxu0 }
 0x149   : > { %v2378_v5 = vadd.f32 %v3352_v25, %v4672_v7  ;;  %v3355_v45 = vadd.f32 %v3354_v49, %v3353_v8  ;;  %v3415_v61 = vpop.f32.mrb[33].mxu1 }
 0x14a   : > { %v3416_v50 = vadd.f32 %v3415_v61, %v3414_v33  ;;  %v3417_v40 = vpop.f32.mrb[34].mxu1 }
 0x14b   : > { %v2381_v63 = vadd.f32 %v3355_v45, %v4674_v15  ;;  %v3418_v37 = vpop.f32.mrb[35].mxu1 }
 0x14c   : > { %v3419_v53 = vadd.f32 %v3418_v37, %v3417_v40  ;;  %v4706_v14 = vadd.f32 %v3416_v50, %v2378_v5 }
 0x14e   : > { %v4708_v11 = vadd.f32 %v3419_v53, %v2381_v63 }
 0x14f   : > { %v3356_v58 = vpop.f32.mrb[36].mxu0 }
 0x150   : > { %v3420_v34 = vpop.f32.mrb[36].mxu1  ;;  %v3357_v27 = vpop.f32.mrb[37].mxu0 }
 0x151   : > { %v3421_v2 = vpop.f32.mrb[37].mxu1  ;;  %v3358_v47 = vadd.f32 %v3357_v27, %v3356_v58  ;;  %v3359_v13 = vpop.f32.mrb[38].mxu0 }
 0x152   : > { %v3422_v3 = vadd.f32 %v3421_v2, %v3420_v34  ;;  %v3423_v7 = vpop.f32.mrb[38].mxu1  ;;  %v3360_v51 = vpop.f32.mrb[39].mxu0 }
 0x153   : > { %v3424_v38 = vpop.f32.mrb[39].mxu1  ;;  %v2386_v41 = vadd.f32 %v3358_v47, %v4676_v54  ;;  %v3361_v31 = vadd.f32 %v3360_v51, %v3359_v13 }
 0x154   : > { %v3425_v15 = vadd.f32 %v3424_v38, %v3423_v7 }
 0x155   : > { %v2389_v17 = vadd.f32 %v3361_v31, %v4678_v32  ;;  %v4712_v6 = vadd.f32 %v3422_v3, %v2386_v41 }
 0x157   : > { %v4714_v42 = vadd.f32 %v3425_v15, %v2389_v17 }
 0x158   : > { %v3426_v56 = vpop.f32.mrb[40].mxu1  ;;  %v3362_v12 = vpop.f32.mrb[40].mxu0 }
 0x159   : > { %v3427_v28 = vpop.f32.mrb[41].mxu1  ;;  %v3363_v55 = vpop.f32.mrb[41].mxu0 }
 0x15a   : > { %v3428_v10 = vadd.f32 %v3427_v28, %v3426_v56  ;;  %v3429_v22 = vpop.f32.mrb[42].mxu1  ;;  %v3364_v57 = vadd.f32 %v3363_v55, %v3362_v12  ;;  %v3365_v30 = vpop.f32.mrb[42].mxu0 }
 0x15b   : > { %v3430_v9 = vpop.f32.mrb[43].mxu1  ;;  %v3366_v48 = vpop.f32.mrb[43].mxu0 }
 0x15c   : > { %v3431_v4 = vadd.f32 %v3430_v9, %v3429_v22  ;;  %v2394_v54 = vadd.f32 %v3364_v57, %v4680_v39  ;;  %v3367_v16 = vadd.f32 %v3366_v48, %v3365_v30 }
 0x15e   : > { %v2397_v32 = vadd.f32 %v3367_v16, %v4682_v44  ;;  %v4718_v18 = vadd.f32 %v3428_v10, %v2394_v54 }
 0x160   : > { %v3432_v24 = vpop.f32.mrb[44].mxu1  ;;  %v4720_v23 = vadd.f32 %v3431_v4, %v2397_v32 }
 0x161   : > { %v3433_v21 = vpop.f32.mrb[45].mxu1  ;;  %v3368_v19 = vpop.f32.mrb[44].mxu0 }
 0x162   : > { %v3434_v1 = vadd.f32 %v3433_v21, %v3432_v24  ;;  %v3435_v0 = vpop.f32.mrb[46].mxu1  ;;  %v3369_v29 = vpop.f32.mrb[45].mxu0 }
 0x163   : > { %v3436_v25 = vpop.f32.mrb[47].mxu1  ;;  %v3370_v8 = vadd.f32 %v3369_v29, %v3368_v19  ;;  %v3371_v33 = vpop.f32.mrb[46].mxu0 }
 0x164   : > { %v3437_v49 = vadd.f32 %v3436_v25, %v3435_v0  ;;  %v3372_v5 = vpop.f32.mrb[47].mxu0 }
 0x165   : > { %v2402_v39 = vadd.f32 %v3370_v8, %v4684_v59  ;;  %v3373_v45 = vadd.f32 %v3372_v5, %v3371_v33 }
 0x167   : > { %v2405_v44 = vadd.f32 %v3373_v45, %v4686_v60  ;;  %v4724_v61 = vadd.f32 %v3434_v1, %v2402_v39 }
 0x168   : > { %v3438_v50 = vpop.f32.mrb[48].mxu1 }
 0x169   : > { %v3439_v40 = vpop.f32.mrb[49].mxu1  ;;  %v4726_v63 = vadd.f32 %v3437_v49, %v2405_v44 }
 0x16a   : > { %v3374_v37 = vpop.f32.mrb[48].mxu0  ;;  %v3440_v53 = vadd.f32 %v3439_v40, %v3438_v50  ;;  %v3441_v58 = vpop.f32.mrb[50].mxu1 }
 0x16b   : > { %v3375_v34 = vpop.f32.mrb[49].mxu0  ;;  %v3442_v27 = vpop.f32.mrb[51].mxu1 }
 0x16c   : > { %v3376_v2 = vadd.f32 %v3375_v34, %v3374_v37  ;;  %v3377_v47 = vpop.f32.mrb[50].mxu0  ;;  %v3443_v13 = vadd.f32 %v3442_v27, %v3441_v58 }
 0x16d   : > { %v3378_v3 = vpop.f32.mrb[51].mxu0 }
 0x16e   : > { %v2410_v59 = vadd.f32 %v3376_v2, %v4688_v36  ;;  %v3379_v7 = vadd.f32 %v3378_v3, %v3377_v47  ;;  %v4747_v47 = vld [vmem:[%s4923_s2] ss:$0 sm:$0xff] }
 0x170   : > { %v2413_v60 = vadd.f32 %v3379_v7, %v4690_v46  ;;  %v2507_v51 = vadd.f32 %v3440_v53, %v2410_v59 }
 0x171   : > { %v3444_v38 = vpop.f32.mrb[52].mxu1 }
 0x172   : > { %v3445_v41 = vpop.f32.mrb[53].mxu1  ;;  %v4730_v31 = vadd.f32 %v3443_v13, %v2413_v60 }
 0x173   : > { %v3446_v15 = vadd.f32 %v3445_v41, %v3444_v38  ;;  %v3447_v17 = vpop.f32.mrb[54].mxu1 }
 0x174   : > { %v3380_v56 = vpop.f32.mrb[52].mxu0  ;;  %v3448_v12 = vpop.f32.mrb[55].mxu1 }
 0x175   : > { %v3381_v28 = vpop.f32.mrb[53].mxu0  ;;  %v3449_v55 = vadd.f32 %v3448_v12, %v3447_v17 }
 0x176   : > { %v3382_v10 = vadd.f32 %v3381_v28, %v3380_v56  ;;  %v3383_v22 = vpop.f32.mrb[54].mxu0 }
 0x177   : > { %v3384_v57 = vpop.f32.mrb[55].mxu0 }
 0x178   : > { %v2418_v36 = vadd.f32 %v3382_v10, %v4692_v26  ;;  %v3385_v30 = vadd.f32 %v3384_v57, %v3383_v22 }
 0x17a   : > { %v2421_v46 = vadd.f32 %v3385_v30, %v4694_v62  ;;  %v2515_v9 = vadd.f32 %v3446_v15, %v2418_v36 }
 0x17b   : > { %v3450_v48 = vpop.f32.mrb[56].mxu1 }
 0x17c   : > { %v3386_v4 = vpop.f32.mrb[56].mxu0  ;;  %v3451_v54 = vpop.f32.mrb[57].mxu1  ;;  %v2518_v16 = vadd.f32 %v3449_v55, %v2421_v46 }
 0x17d   : > { %v3387_v32 = vpop.f32.mrb[57].mxu0  ;;  %v3452_v24 = vadd.f32 %v3451_v54, %v3450_v48  ;;  %v3453_v21 = vpop.f32.mrb[58].mxu1 }
 0x17e   : > { %v3388_v19 = vadd.f32 %v3387_v32, %v3386_v4  ;;  %v3389_v1 = vpop.f32.mrb[58].mxu0  ;;  %v3454_v0 = vpop.f32.mrb[59].mxu1 }
 0x17f   : > { %v3390_v29 = vpop.f32.mrb[59].mxu0  ;;  %v3455_v25 = vadd.f32 %v3454_v0, %v3453_v21 }
 0x180   : > { %v2426_v8 = vadd.f32 %v3388_v19, %v4696_v52  ;;  %v3391_v26 = vadd.f32 %v3390_v29, %v3389_v1 }
 0x182   : > { %v2429_v62 = vadd.f32 %v3391_v26, %v4698_v43  ;;  %v4737_v33 = vadd.f32 %v3452_v24, %v2426_v8 }
 0x183   : > { %v3456_v49 = vpop.f32.mrb[60].mxu1 }
 0x184   : > { %v3457_v5 = vpop.f32.mrb[61].mxu1  ;;  %v4739_v39 = vadd.f32 %v3455_v25, %v2429_v62 }
 0x185   : > { %v3458_v44 = vadd.f32 %v3457_v5, %v3456_v49  ;;  %v3459_v50 = vpop.f32.mrb[62].mxu1 }
 0x186   : > { %v3392_v45 = vpop.f32.mrb[60].mxu0  ;;  %v3460_v37 = vpop.f32.mrb[63].mxu1 }
 0x187   : > { %v3393_v40 = vpop.f32.mrb[61].mxu0  ;;  %v3461_v52 = vadd.f32 %v3460_v37, %v3459_v50 }
 0x188   : > { %v3394_v53 = vadd.f32 %v3393_v40, %v3392_v45  ;;  %v3395_v58 = vpop.f32.mrb[62].mxu0 }
 0x189   : > { %v3396_v34 = vpop.f32.mrb[63].mxu0 }
 0x18a   : > { %v2434_v43 = vadd.f32 %v3394_v53, %v4700_v35  ;;  %v3397_v27 = vadd.f32 %v3396_v34, %v3395_v58 }
 0x18b   : > { %v3504_v13 = vpop.f32.mrb[64].mxu1 }
 0x18c   : > { %v2437_v2 = vadd.f32 %v3397_v27, %v4702_v20  ;;  %v2531_v3 = vadd.f32 %v3458_v44, %v2434_v43  ;;  %v2612_v59 = vadd.f32 %v3504_v13, %v2515_v9  ;;  %v2603_v7 = vpop.f32.mrb[65].mxu1 }
 0x18d   : > { %v2604_v38 = vadd.f32 %v2603_v7, %v2507_v51  ;;  %v3505_v41 = vpop.f32.mrb[66].mxu1 }
 0x18e   : > { %v3496_v60 = vpop.f32.mrb[64].mxu0  ;;  %v4749_v15 = vadd.f32 %v3461_v52, %v2437_v2  ;;  %v2651_v20 = vadd.f32 %v4747_v47, %v2612_v59  ;;  %v2615_v56 = vadd.f32 %v3505_v41, %v2518_v16  ;;  %v2606_v12 = vpop.f32.mrb[67].mxu1 }
 0x18f   : > { %v2580_v35 = vadd.f32 %v3496_v60, %v4712_v6  ;;  %v2571_v17 = vpop.f32.mrb[65].mxu0  ;;  %v2649_v55 = vadd.f32 %v4747_v47, %v2604_v38  ;;  %v2607_v22 = vadd.f32 %v2606_v12, %v4730_v31 }
 0x190   : > { %v2572_v28 = vadd.f32 %v2571_v17, %v4706_v14  ;;  %v3497_v10 = vpop.f32.mrb[66].mxu0  ;;  %v4757_v57 = vmax.f32 %v2651_v20, 0.0  ;;  %v2652_v9 = vadd.f32 %v4747_v47, %v2615_v56 }
 0x191   : > { %v2643_v51 = vadd.f32 %v4747_v47, %v2580_v35  ;;  %v2583_v36 = vadd.f32 %v3497_v10, %v4714_v42  ;;  %v2574_v30 = vpop.f32.mrb[67].mxu0  ;;  %v4766_v6 = vmax.f32 %v2649_v55, 0.0  ;;  %v2650_v54 = vadd.f32 %v4747_v47, %v2607_v22 }
 0x192   : > { %v2641_v14 = vadd.f32 %v4747_v47, %v2572_v28  ;;  %v2575_v31 = vadd.f32 %v2574_v30, %v4708_v11  ;;  %v3200_v42 = vpack.c.bf16 %v4757_v57, %v4757_v57  ;;  %v4782_v0 = vmax.f32 %v2652_v9, 0.0 }
 0x193   : > { %v2659_v46 = vmax.f32 %v2643_v51, 0.0  ;;  %v3198_v4 = vpack.c.bf16 %v4766_v6, %v4766_v6  ;;  %v3508_v16 = vpop.f32.mrb[68].mxu1  ;;  %v2644_v1 = vadd.f32 %v4747_v47, %v2583_v36  ;;  %v4789_v62 = vmax.f32 %v2650_v54, 0.0 }
 0x194   : > { %v2657_v48 = vmax.f32 %v2641_v14, 0.0  ;;  %2842 = vst.msk [vmem:[%s4763_s7 + $0x28] sm:$0xf] %vm2831_vm8, %v3200_v42  ;;  %v2619_v24 = vpop.f32.mrb[69].mxu1  ;;  %v2642_v29 = vadd.f32 %v4747_v47, %v2575_v31  ;;  %v2628_v5 = vadd.f32 %v3508_v16, %v2531_v3  ;;  %v3201_v50 = vpack.c.bf16 %v4782_v0, %v4782_v0 }
 0x195   : > { %v3192_v32 = vpack.c.bf16 %v2659_v46, %v2659_v46  ;;  %2840 = vst.msk [vmem:[%s4763_s7 + $0x20] sm:$0xf] %vm2831_vm8, %v3198_v4  ;;  %v3509_v19 = vpop.f32.mrb[70].mxu1  ;;  %v2660_v44 = vmax.f32 %v2644_v1, 0.0  ;;  %v3199_v53 = vpack.c.bf16 %v4789_v62, %v4789_v62  ;;  %v2677_v58 = vsel %vm2673_vm9, %v2659_v46, 0.0 }
 0x196   : > { %v3190_v11 = vpack.c.bf16 %v2657_v48, %v2657_v48  ;;  %v3500_v21 = vpop.f32.mrb[68].mxu0  ;;  %v4785_v8 = vpop.f32.mrb[71].mxu1  ;;  %v2713_v26 = vmul.f32 %v2657_v48, %v2657_v48  ;;  %v2658_v37 = vmax.f32 %v2642_v29, 0.0  ;;  %v2715_v52 = vmul.f32 %v2659_v46, %v2659_v46  ;;  %2843 = vst.msk [vmem:[%s4763_s7 + $0x2c] sm:$0xf] %vm2831_vm8, %v3201_v50 }
 0x197   : > { %2834 = vst.msk [vmem:[%s4763_s7 + $0x8] sm:$0xf] %vm2831_vm8, %v3192_v32  ;;  %v2587_v25 = vpop.f32.mrb[69].mxu0  ;;  %v2596_v49 = vadd.f32 %v3500_v21, %v4724_v61  ;;  %v2674_v34 = vsel %vm2673_vm9, %v2657_v48, 0.0  ;;  %v3193_v61 = vpack.c.bf16 %v2660_v44, %v2660_v44  ;;  %2841 = vst.msk [vmem:[%s4763_s7 + $0x24] sm:$0xf] %vm2831_vm8, %v3199_v53  ;;  %v2716_v3 = vmul.f32 %v2660_v44, %v2660_v44 }
 0x198   : > { %2832 = vst.msk [vmem:[%s4763_s7] sm:$0xf] %vm2831_vm8, %v3190_v11  ;;  %v3501_v45 = vpop.f32.mrb[70].mxu0  ;;  %v2729_v43 = vsel %vm2673_vm9, %v2713_v26, 0.0  ;;  %v2675_v27 = vsel %vm2673_vm9, %v2658_v37, 0.0  ;;  %v2714_v2 = vmul.f32 %v2658_v37, %v2658_v37  ;;  %v3191_v13 = vpack.c.bf16 %v2658_v37, %v2658_v37 }
 0x199   : > { %v2590_v40 = vpop.f32.mrb[71].mxu0  ;;  %2835 = vst.msk [vmem:[%s4763_s7 + $0xc] sm:$0xf] %vm2831_vm8, %v3193_v61  ;;  %v2676_v59 = vadd.f32 %v2675_v27, %v2674_v34  ;;  %v2647_v7 = vadd.f32 %v4747_v47, %v2596_v49  ;;  %v2655_v60 = vadd.f32 %v4747_v47, %v2628_v5  ;;  %v2588_v41 = vadd.f32 %v2587_v25, %v4718_v18 }
 0x19a   : > { %v2730_v38 = vsel %vm2673_vm9, %v2714_v2, 0.0  ;;  %2833 = vst.msk [vmem:[%s4763_s7 + $0x4] sm:$0xf] %vm2831_vm8, %v3191_v13  ;;  %v2620_v35 = vadd.f32 %v2619_v24, %v4737_v33  ;;  %v2599_v20 = vadd.f32 %v3501_v45, %v4726_v63  ;;  %v2732_v55 = vsel %vm2673_vm9, %v2715_v52, 0.0 }
 0x19b   : > { %v2678_v17 = vadd.f32 %v2677_v58, %v2676_v59  ;;  %v2731_v56 = vadd.f32 %v2730_v38, %v2729_v43  ;;  %v2663_v12 = vmax.f32 %v2647_v7, 0.0  ;;  %v4814_v28 = vmax.f32 %v2655_v60, 0.0 }
 0x19c   : > { %v2645_v10 = vadd.f32 %v4747_v47, %v2588_v41  ;;  %v2653_v22 = vadd.f32 %v4747_v47, %v2620_v35  ;;  %v2631_v51 = vadd.f32 %v3509_v19, %v4749_v15  ;;  %v2679_v18 = vsel %vm2673_vm9, %v2660_v44, 0.0 }
 0x19d   : > { %v2733_v33 = vadd.f32 %v2732_v55, %v2731_v56  ;;  %v3196_v36 = vpack.c.bf16 %v2663_v12, %v2663_v12  ;;  %v2734_v63 = vsel %vm2673_vm9, %v2716_v3, 0.0  ;;  %v3204_v30 = vpack.c.bf16 %v4814_v28, %v4814_v28 }
 0x19e   : > { %v2661_v14 = vmax.f32 %v2645_v10, 0.0  ;;  %v2648_v31 = vadd.f32 %v4747_v47, %v2599_v20  ;;  %v2680_v46 = vadd.f32 %v2679_v18, %v2678_v17  ;;  %v4827_v9 = vmax.f32 %v2653_v22, 0.0 }
 0x19f   : > { %2838 = vst.msk [vmem:[%s4763_s7 + $0x18] sm:$0xf] %vm2831_vm8, %v3196_v36  ;;  %v2735_v42 = vadd.f32 %v2734_v63, %v2733_v33  ;;  %2846 = vst.msk [vmem:[%s4763_s7 + $0x38] sm:$0xf] %vm2831_vm8, %v3204_v30  ;;  %v2656_v11 = vadd.f32 %v4747_v47, %v2631_v51  ;;  %v2591_v21 = vadd.f32 %v2590_v40, %v4720_v23  ;;  %v2685_v53 = vsel %vm2673_vm9, %v2663_v12, 0.0 }
 0x1a0   : > { %v2681_v15 = vsel %vm2673_vm9, %v2661_v14, 0.0  ;;  %v2717_v48 = vmul.f32 %v2661_v14, %v2661_v14  ;;  %v3194_v4 = vpack.c.bf16 %v2661_v14, %v2661_v14  ;;  %v3202_v16 = vpack.c.bf16 %v4827_v9, %v4827_v9 }
 0x1a1   : > { %v2682_v54 = vadd.f32 %v2681_v15, %v2680_v46  ;;  %v2664_v24 = vmax.f32 %v2648_v31, 0.0  ;;  %v2623_v1 = vadd.f32 %v4785_v8, %v4739_v39  ;;  %v4843_v25 = vmax.f32 %v2656_v11, 0.0 }
 0x1a2   : > { %v2736_v32 = vsel %vm2673_vm9, %v2717_v48, 0.0  ;;  %2836 = vst.msk [vmem:[%s4763_s7 + $0x10] sm:$0xf] %vm2831_vm8, %v3194_v4  ;;  %2844 = vst.msk [vmem:[%s4763_s7 + $0x30] sm:$0xf] %vm2831_vm8, %v3202_v16  ;;  %v2646_v26 = vadd.f32 %v4747_v47, %v2591_v21  ;;  %v2719_v44 = vmul.f32 %v2663_v12, %v2663_v12  ;;  %v2721_v61 = vmul.f32 %v4766_v6, %v4766_v6 }
 0x1a3   : > { %v2737_v19 = vadd.f32 %v2736_v32, %v2735_v42  ;;  %v3197_v29 = vpack.c.bf16 %v2664_v24, %v2664_v24  ;;  %v2654_v49 = vadd.f32 %v4747_v47, %v2623_v1  ;;  %v3205_v5 = vpack.c.bf16 %v4843_v25, %v4843_v25 }
 0x1a4   : > { %v2662_v23 = vmax.f32 %v2646_v26, 0.0  ;;  %v2720_v47 = vmul.f32 %v2664_v24, %v2664_v24  ;;  %v2740_v43 = vsel %vm2673_vm9, %v2719_v44, 0.0  ;;  %v2687_v27 = vsel %vm2673_vm9, %v2664_v24, 0.0 }
 0x1a5   : > { %2839 = vst.msk [vmem:[%s4763_s7 + $0x1c] sm:$0xf] %vm2831_vm8, %v3197_v29  ;;  %v2670_v45 = vmax.f32 %v2654_v49, 0.0  ;;  %2847 = vst.msk [vmem:[%s4763_s7 + $0x3c] sm:$0xf] %vm2831_vm8, %v3205_v5  ;;  %v2689_v3 = vsel %vm2673_vm9, %v4766_v6, 0.0  ;;  %v2722_v59 = vmul.f32 %v4789_v62, %v4789_v62  ;;  %v2723_v41 = vmul.f32 %v4757_v57, %v4757_v57 }
 0x1a6   : > { %v2683_v39 = vsel %vm2673_vm9, %v2662_v23, 0.0  ;;  %v2718_v8 = vmul.f32 %v2662_v23, %v2662_v23  ;;  %v3195_v50 = vpack.c.bf16 %v2662_v23, %v2662_v23  ;;  %v2742_v7 = vsel %vm2673_vm9, %v2720_v47, 0.0 }
 0x1a7   : > { %v2684_v40 = vadd.f32 %v2683_v39, %v2682_v54  ;;  %v3203_v37 = vpack.c.bf16 %v2670_v45, %v2670_v45  ;;  %v2744_v35 = vsel %vm2673_vm9, %v2721_v61, 0.0  ;;  %v2691_v20 = vsel %vm2673_vm9, %v4789_v62, 0.0 }
 0x1a8   : > { %v2738_v58 = vsel %vm2673_vm9, %v2718_v8, 0.0  ;;  %2837 = vst.msk [vmem:[%s4763_s7 + $0x14] sm:$0xf] %vm2831_vm8, %v3195_v50  ;;  %v2693_v6 = vsel %vm2673_vm9, %v4757_v57, 0.0  ;;  %v2724_v12 = vmul.f32 %v4782_v0, %v4782_v0  ;;  %v2746_v55 = vsel %vm2673_vm9, %v2722_v59, 0.0 }
 0x1a9   : > { %v2686_v52 = vadd.f32 %v2685_v53, %v2684_v40  ;;  %v2739_v34 = vadd.f32 %v2738_v58, %v2737_v19  ;;  %2845 = vst.msk [vmem:[%s4763_s7 + $0x34] sm:$0xf] %vm2831_vm8, %v3203_v37  ;;  %v2748_v51 = vsel %vm2673_vm9, %v2723_v41, 0.0  ;;  %v2695_v18 = vsel %vm2673_vm9, %v4782_v0, 0.0 }
 0x1aa   : > { %v2725_v62 = vmul.f32 %v4827_v9, %v4827_v9  ;;  %v2750_v57 = vsel %vm2673_vm9, %v2724_v12, 0.0  ;;  %v2697_v63 = vsel %vm2673_vm9, %v4827_v9, 0.0  ;;  %v2726_v30 = vmul.f32 %v2670_v45, %v2670_v45 }
 0x1ab   : > { %v2688_v2 = vadd.f32 %v2687_v27, %v2686_v52  ;;  %v2741_v13 = vadd.f32 %v2740_v43, %v2739_v34  ;;  %v2727_v46 = vmul.f32 %v4814_v28, %v4814_v28  ;;  %v2699_v42 = vsel %vm2673_vm9, %v2670_v45, 0.0 }
 0x1ac   : > { %v2752_v0 = vsel %vm2673_vm9, %v2725_v62, 0.0  ;;  %v2701_v4 = vsel %vm2673_vm9, %v4814_v28, 0.0  ;;  %v2728_v9 = vmul.f32 %v4843_v25, %v4843_v25  ;;  %v2754_v54 = vsel %vm2673_vm9, %v2726_v30, 0.0 }
 0x1ad   : > { %v2690_v60 = vadd.f32 %v2689_v3, %v2688_v2  ;;  %v2743_v38 = vadd.f32 %v2742_v7, %v2741_v13  ;;  %v2756_v24 = vsel %vm2673_vm9, %v2727_v46, 0.0  ;;  %v2703_v11 = vsel %vm2673_vm9, %v4843_v25, 0.0 }
 0x1ae   : > { %v2758_v1 = vsel %vm2673_vm9, %v2728_v9, 0.0 }
 0x1af   : > { %v2745_v17 = vadd.f32 %v2744_v35, %v2743_v38  ;;  %v2692_v56 = vadd.f32 %v2691_v20, %v2690_v60 }
 0x1b1   : > { %v2694_v10 = vadd.f32 %v2693_v6, %v2692_v56  ;;  %v2747_v22 = vadd.f32 %v2746_v55, %v2745_v17 }
 0x1b3   : > { %v2696_v33 = vadd.f32 %v2695_v18, %v2694_v10  ;;  %v2749_v36 = vadd.f32 %v2748_v51, %v2747_v22 }
 0x1b5   : > { %v2698_v14 = vadd.f32 %v2697_v63, %v2696_v33  ;;  %v2751_v31 = vadd.f32 %v2750_v57, %v2749_v36 }
 0x1b7   : > { %v2700_v15 = vadd.f32 %v2699_v42, %v2698_v14  ;;  %v2753_v48 = vadd.f32 %v2752_v0, %v2751_v31 }
 0x1b9   : > { %v2702_v16 = vadd.f32 %v2701_v4, %v2700_v15  ;;  %v2755_v32 = vadd.f32 %v2754_v54, %v2753_v48 }
 0x1bb   : > { %v2704_v21 = vadd.f32 %v2703_v11, %v2702_v16  ;;  %v2757_v19 = vadd.f32 %v2756_v24, %v2755_v32 }
 0x1bd   : > { %v2705_v28 = vrot.slane %v2704_v21, 4  ;;  %v2759_v29 = vadd.f32 %v2758_v1, %v2757_v19 }
 0x1bf   : > { %v2706_v26 = vadd.f32 %v2705_v28, %v2704_v21  ;;  %v2760_v49 = vrot.slane %v2759_v29, 4 }
 0x1c1   : > { %v2707_v5 = vrot.slane %v2706_v26, 2  ;;  %v2761_v23 = vadd.f32 %v2760_v49, %v2759_v29 }
 0x1c3   : > { %v2708_v45 = vadd.f32 %v2707_v5, %v2706_v26  ;;  %v2762_v44 = vrot.slane %v2761_v23, 2 }
 0x1c5   : > { %v2709_v39 = vrot.slane %v2708_v45, 1  ;;  %v2763_v8 = vadd.f32 %v2762_v44, %v2761_v23 }
 0x1c7   : > { %v2710_v25 = vadd.f32 %v2709_v39, %v2708_v45  ;;  %v2764_v50 = vrot.slane %v2763_v8, 1 }
 0x1c9   : > { %2712 = vst.msk [vmem:[%s243_s13] sm:$0x1] %vm2711_vm10, %v2710_v25  ;;  %v2765_v40 = vadd.f32 %v2764_v50, %v2763_v8 }
 0x1cb   : > { %2766 = vst.msk [vmem:[%s243_s13 + $0x1] sm:$0x1] %vm2711_vm10, %v2765_v40 }
 0x1cc PF: > { %s15_s19 = sadd.s32 1, %s3695_s19   ;;  %s4933_s15 = smov %s3687_s17 }
 0x1cd   : > { %p12_p8 = scmp.ge.s32.totalorder %s15_s19, 6   ;;  %s4934_s16 = smov %s3691_s18 }
 0x1ce   : > { %s4935_s17 = smov %s4938_s20  ;;  %s4936_s18 = smov %s4942_s21 }
 0x1cf   :  { %14 = sbr.rel (!%p12_p8) target bundleno = 3 (0x3), region = 77 }

// kernel: block_forward.3
= control target key start
LH: loop header
LB: loop body
LE: loop exit
PB: predicated region body
PF: predicated region fallthrough
CT: control target
= control target key end

     0   :  { %s3999_s18 = smov 0   ;;  %s4001_s19 = smov 0   ;;  %s5209_s0 = inlined_call_operand.vmem [shape: bf16[2,16,16,8], index: 0, kind: input, shape index: {}]   ;;  %s5210_s1 = inlined_call_operand.vmem [shape: bf16[1152,128], index: 1, kind: input, shape index: {}]   ;;  %s5211_s2 = inlined_call_operand.vmem [shape: f32[1,8], index: 2, kind: input, shape index: {}]   ;;  %s5212_s3 = inlined_call_operand.vmem [shape: f32[1,8], index: 3, kind: input, shape index: {}]   ;;  %s5213_s4 = inlined_call_operand.vmem [shape: f32[1,8], index: 4, kind: input, shape index: {}]   ;;  %s5214_s5 = inlined_call_operand.vmem [shape: f32[2,16,16,8], index: 5, kind: output, shape index: {}]  }
   0x1   :  { %s4003_s20 = smov 0   ;;  %s4005_s21 = smov 0  }
   0x2   :  { %s4007_s22 = smov 0  }
   0x3 LB: > { %s24_s23 = sadd.s32 1, %s3958_s20  ;;  %s27_s24 = sadd.s32 1, %s3962_s21  ;;  %s3966_s22 = sphi %s4007_s22, %s15_s22   ;;  %s3962_s21 = sphi %s4005_s21, %s5232_s21   ;;  %s3958_s20 = sphi %s4003_s20, %s5231_s20   ;;  %s3954_s19 = sphi %s4001_s19, %s5230_s19   ;;  %s3950_s18 = sphi %s3999_s18, %s5229_s18  }
   0x4   : > { %p25_p0 = scmp.ge.s32.totalorder %s24_s23, 2  ;;  %p3186_p1 = scmp.ge.s32.totalorder %s3966_s22, 1 }
   0x5   : > { %p201_p2 = scmp.lt.s32.totalorder %s3966_s22, 5 }
   0x6   : > { %s5234_s23 = smov (%p25_p0, %s24_s23), 0  ;;  %s5236_s24 = smov (!%p25_p0, %s27_s24), %s3962_s21 }
   0x7   : > { %p202_p3 = pnand %p3186_p1, %p201_p2  ;;  %p29_p4 = scmp.ge.s32.totalorder %s5236_s24, 2 }
   0x8   : > { %p234_p5 = scmp.lt.s32.totalorder (!%p202_p3), %s3954_s19, 1  ;;  %s4035_s25 = sshll.u32 (!%p202_p3), %s3950_s18, 3  ;;  %v3968_v0 = vmov (!%p202_p3), 0   ;;  %v4051_v1 = vld [vmem:[%s5212_s3] ss:$0 sm:$0xff] (!%p202_p3)  ;;  %vm575_vm0 = vcmask (!%p202_p3), 60416  }
   0x9   : > { %s5238_s24 = smov (%p29_p4, %s5236_s24), 0  ;;  %205 = sbr.rel (%p202_p3) target bundleno = 495 (0x1ef), region = 40 }
   0xa   : > { %257 = vst [vmem:[#allocation2 + $0xc] sm:$0xf] (!%p202_p3), %v3968_v0  ;;  %254 = vst [vmem:[#allocation2] sm:$0xf] (!%p202_p3), %v3968_v0  ;;  %p242_p6 = scmp.lt.s32.totalorder (!%p202_p3), %s4035_s25, 15  ;;  %s3400_s26 = sshll.u32 (!%p202_p3), %s3950_s18, 6 }
   0xb   : > { %255 = vst [vmem:[#allocation2 + $0x4] sm:$0xf] (!%p202_p3), %v3968_v0  ;;  %256 = vst [vmem:[#allocation2 + $0x8] sm:$0x1] (!%p202_p3), %v3968_v0  ;;  %vm576_vm1 = vsmask.f32 (!%p202_p3), 7938 }
   0xc   : > { %258 = vst [vmem:[#allocation2 + $0x10] sm:$0xf] (!%p202_p3), %v3968_v0  ;;  %259 = vst [vmem:[#allocation2 + $0x14] sm:$0x1] (!%p202_p3), %v3968_v0  ;;  %vm411_vm2 = vsmask.f32 (!%p202_p3), 256 }
   0xd   : > { %260 = vst [vmem:[#allocation2 + $0x18] sm:$0xf] (!%p202_p3), %v3968_v0  ;;  %261 = vst [vmem:[#allocation2 + $0x1c] sm:$0xf] (!%p202_p3), %v3968_v0  ;;  %v4067_v9 = vld [vmem:[%s5213_s4] ss:$0 sm:$0xff] (!%p202_p3) }
   0xe   : > { %262 = vst [vmem:[#allocation2 + $0x20] sm:$0x1] (!%p202_p3), %v3968_v0  ;;  %263 = vst [vmem:[#allocation2 + $0x24] sm:$0xf] (!%p202_p3), %v3968_v0  ;;  %vm412_vm3 = vsmask.f32 (!%p202_p3), 4368 }
   0xf   : > { %264 = vst [vmem:[#allocation2 + $0x28] sm:$0xf] (!%p202_p3), %v3968_v0  ;;  %265 = vst [vmem:[#allocation2 + $0x2c] sm:$0x1] (!%p202_p3), %v3968_v0  ;;  %vm583_vm4 = vcmask (!%p202_p3), 57344   ;;  %p3214_p7 = scmp.le.s32.totalorder (!%p202_p3), %s3950_s18, 0 }
  0x10   : > { %266 = vst [vmem:[#allocation2 + $0x30] sm:$0xf] %v3968_v0  ;;  %267 = vst [vmem:[#allocation2 + $0x34] sm:$0xf] %v3968_v0  ;;  %s5240_s19 = smov (!%p234_p5, %s3954_s19), 1 }
  0x11   : > { %268 = vst [vmem:[#allocation2 + $0x38] sm:$0x1] %v3968_v0  ;;  %269 = vst [vmem:[#allocation2 + $0x3c] sm:$0xf] %v3968_v0  ;;  %s243_s27 = scalar_select %p242_p6, %s4035_s25, 15 }
  0x12   : > { %270 = vst [vmem:[#allocation2 + $0x40] sm:$0xf] %v3968_v0  ;;  %271 = vst [vmem:[#allocation2 + $0x44] sm:$0x1] %v3968_v0  ;;  %s3398_s28 = sshll.u32 %s5240_s19, 7  ;;  %s3191_s29 = sshll.u32 %s5240_s19, 5 }
  0x13   : > { %272 = vst [vmem:[#allocation2 + $0x48] sm:$0xf] %v3968_v0  ;;  %273 = vst [vmem:[#allocation2 + $0x4c] sm:$0xf] %v3968_v0  ;;  %s4046_s7 = scalar_lea.vmem %s5209_s0, %s3398_s28  ;;  %s3190_s8 = sshll.u32 %s243_s27, 1 }
  0x14   : > { %274 = vst [vmem:[#allocation2 + $0x50] sm:$0x1] %v3968_v0  ;;  %275 = vst [vmem:[#allocation2 + $0x54] sm:$0xf] %v3968_v0  ;;  %s246_s9 = sadd.s32 %s3191_s29, %s3190_s8  ;;  %s4054_s12 = scalar_lea.vmem %s4046_s7, %s3400_s26  ;;  %v578_v47 = vld [vmem:[#allocation2 + $0xc] sm:$0xf] }
  0x15   : > { %276 = vst [vmem:[#allocation2 + $0x58] sm:$0xf] %v3968_v0  ;;  %277 = vst [vmem:[#allocation2 + $0x5c] sm:$0x1] %v3968_v0  ;;  %s3192_s13 = sshll.u32 %s246_s9, 3  ;;  %v3424_v2 = vld [vmem:[%s4054_s12] sm:$0xff]  }
  0x16   : > { %278 = vst [vmem:[#allocation2 + $0x60] sm:$0xf] %v3968_v0  ;;  %279 = vst [vmem:[#allocation2 + $0x64] sm:$0xf] %v3968_v0  ;;  %v3463_v3 = vld [vmem:[%s4054_s12 + $0x8] sm:$0xff]   ;;  %v3464_v4 = vld [vmem:[%s4054_s12 + $0x10] sm:$0xff]   ;;  %s4062_s16 = scalar_lea.vmem %s5214_s5, %s3192_s13  ;;  %v3425_v5 = vunpack.c.l.bf16 %v3424_v2  ;;  %v3426_v6 = vunpack.c.h.bf16 %v3424_v2 }
  0x17   : > { %280 = vst [vmem:[#allocation2 + $0x68] sm:$0x1] %v3968_v0  ;;  %281 = vst [vmem:[#allocation2 + $0x6c] sm:$0xf] %v3968_v0  ;;  %v3429_v7 = vunpack.c.l.bf16 %v3463_v3  ;;  %v3430_v8 = vunpack.c.h.bf16 %v3463_v3  ;;  %v3433_v10 = vunpack.c.l.bf16 %v3464_v4  ;;  %v3434_v11 = vunpack.c.h.bf16 %v3464_v4  ;;  %v3465_v16 = vld [vmem:[%s4054_s12 + $0x18] sm:$0xff]   ;;  %s3215_s26 = sadd.s32 (!%p3214_p7), 4294967295, %s4035_s25 }
  0x18   : > { %282 = vst [vmem:[#allocation2 + $0x70] sm:$0xf] %v3968_v0  ;;  %283 = vst [vmem:[#allocation2 + $0x74] sm:$0x1] %v3968_v0  ;;  %v325_v12 = vmul.f32 %v3425_v5, %v4051_v1  ;;  %v326_v13 = vmul.f32 %v3426_v6, %v4051_v1  ;;  %v3437_v19 = vunpack.c.l.bf16 %v3465_v16  ;;  %v3438_v20 = vunpack.c.h.bf16 %v3465_v16  ;;  %v585_v53 = vld [vmem:[#allocation2 + $0x14] sm:$0x1] }
  0x19   : > { %v327_v14 = vmul.f32 %v3429_v7, %v4051_v1  ;;  %v328_v15 = vmul.f32 %v3430_v8, %v4051_v1  ;;  %v329_v17 = vmul.f32 %v3433_v10, %v4051_v1  ;;  %v330_v18 = vmul.f32 %v3434_v11, %v4051_v1  ;;  %vm4088_vm5 = vmand %vm575_vm0, %vm576_vm1  ;;  %v588_v62 = vld [vmem:[#allocation2 + $0x18] sm:$0xf]  ;;  %v592_v63 = vld [vmem:[#allocation2 + $0x20] sm:$0x1]  ;;  %s3417_s27 = sshll.u32 (!%p3214_p7), %s3215_s26, 3 }
  0x1a   : > { %v347_v21 = vadd.f32 %v4067_v9, %v325_v12  ;;  %v348_v22 = vadd.f32 %v4067_v9, %v326_v13  ;;  %v331_v27 = vmul.f32 %v3437_v19, %v4051_v1  ;;  %v332_v28 = vmul.f32 %v3438_v20, %v4051_v1  ;;  %vm4094_vm6 = vmor %vm411_vm2, %vm412_vm3  ;;  %v3466_v10 = vld [vmem:[%s4054_s12 + $0x20] sm:$0xff]   ;;  %s644_s28 = scalar_lea.vmem (!%p3214_p7), %s4046_s7, %s3417_s27 }
  0x1b   : > { %v349_v23 = vadd.f32 %v4067_v9, %v327_v14  ;;  %v350_v24 = vadd.f32 %v4067_v9, %v328_v15  ;;  %v351_v25 = vadd.f32 %v4067_v9, %v329_v17  ;;  %v352_v26 = vadd.f32 %v4067_v9, %v330_v18  ;;  %vm4100_vm7 = vmand %vm583_vm4, %vm411_vm2  ;;  %v595_v14 = vld [vmem:[#allocation2 + $0x24] sm:$0xf]  ;;  %v599_v18 = vld [vmem:[#allocation2 + $0x2c] sm:$0x1] }
  0x1c   : > { %v3401_v29 = vpack.c.bf16 %v347_v21, %v347_v21  ;;  %v3402_v30 = vpack.c.bf16 %v348_v22, %v348_v22  ;;  %v353_v35 = vadd.f32 %v4067_v9, %v331_v27  ;;  %v354_v36 = vadd.f32 %v4067_v9, %v332_v28 }
  0x1d   : > { %v3403_v31 = vpack.c.bf16 %v349_v23, %v349_v23  ;;  %v3404_v32 = vpack.c.bf16 %v350_v24, %v350_v24  ;;  %v3405_v33 = vpack.c.bf16 %v351_v25, %v351_v25  ;;  %v3406_v34 = vpack.c.bf16 %v352_v26, %v352_v26  ;;  %v3467_v25 = vld [vmem:[%s4054_s12 + $0x28] sm:$0xff]  }
  0x1e   : > { %v415_v37 = vshrl.u32 %v3401_v29, 16  ;;  %v418_v38 = vshll.u32 %v3401_v29, 16  ;;  %v423_v39 = vshrl.u32 %v3402_v30, 16  ;;  %v426_v40 = vshll.u32 %v3402_v30, 16  ;;  %v3468_v30 = vld [vmem:[%s4054_s12 + $0x30] sm:$0xff]  }
  0x1f   : > { %v432_v42 = vshrl.u32 %v3403_v31, 16  ;;  %v435_v43 = vshll.u32 %v3403_v31, 16  ;;  %v440_v44 = vshrl.u32 %v3404_v32, 16  ;;  %v443_v45 = vshll.u32 %v3404_v32, 16 }
  0x20   : > { %v417_v46 = vrot.slane %v415_v37, 7  ;;  %v425_v49 = vrot.slane %v423_v39, 7  ;;  %v449_v50 = vshrl.u32 %v3405_v33, 16  ;;  %v452_v51 = vshll.u32 %v3405_v33, 16  ;;  %v602_v39 = vld [vmem:[#allocation2 + $0x30] sm:$0xf] }
  0x21   : > { %v434_v54 = vrot.slane %v432_v42, 7  ;;  %v442_v55 = vrot.slane %v440_v44, 7  ;;  %v457_v56 = vshrl.u32 %v3406_v34, 16  ;;  %v460_v57 = vshll.u32 %v3406_v34, 16 }
  0x22   : > { %v420_v58 = vor.u32 %v418_v38, %v417_v46  ;;  %v421_v59 = vrot.slane %v417_v46, 4  ;;  %v428_v60 = vor.u32 %v426_v40, %v425_v49  ;;  %v430_v61 = vrot.slane %v425_v49, 4  ;;  %v606_v40 = vld [vmem:[#allocation2 + $0x38] sm:$0x1] }
  0x23   : > { %v437_v0 = vor.u32 %v435_v43, %v434_v54  ;;  %v438_v2 = vrot.slane %v434_v54, 4  ;;  %v445_v3 = vor.u32 %v443_v45, %v442_v55  ;;  %v447_v4 = vrot.slane %v442_v55, 4 }
  0x24   : > { %v579_v5 = vsel %vm4088_vm5, %v420_v58, %v578_v47  ;;  %v429_v6 = vsel %vm4094_vm6, %v421_v59, %v428_v60  ;;  %v586_v7 = vsel %vm4100_vm7, %v430_v61, %v585_v53  ;;  %v451_v8 = vrot.slane %v449_v50, 7 }
  0x25   : > { %580 = vst [vmem:[#allocation2 + $0xc] sm:$0xf] %v579_v5  ;;  %582 = vst.msk [vmem:[#allocation2 + $0x10] sm:$0xf] %vm575_vm0, %v429_v6  ;;  %v589_v11 = vsel %vm4088_vm5, %v437_v0, %v588_v62  ;;  %v446_v12 = vsel %vm4094_vm6, %v438_v2, %v445_v3  ;;  %v593_v13 = vsel %vm4100_vm7, %v447_v4, %v592_v63  ;;  %v459_v15 = vrot.slane %v457_v56, 7  ;;  %v4135_v56 = vld [vmem:[%s4054_s12 + $0x38] sm:$0xff]  }
  0x26   : > { %587 = vst [vmem:[#allocation2 + $0x14] sm:$0x1] %v586_v7  ;;  %590 = vst [vmem:[#allocation2 + $0x18] sm:$0xf] %v589_v11  ;;  %v454_v16 = vor.u32 %v452_v51, %v451_v8  ;;  %v455_v17 = vrot.slane %v451_v8, 4  ;;  %v3407_v19 = vpack.c.bf16 %v353_v35, %v353_v35  ;;  %v3408_v20 = vpack.c.bf16 %v354_v36, %v354_v36 }
  0x27   : > { %591 = vst.msk [vmem:[#allocation2 + $0x1c] sm:$0xf] %vm575_vm0, %v446_v12  ;;  %594 = vst [vmem:[#allocation2 + $0x20] sm:$0x1] %v593_v13  ;;  %v462_v21 = vor.u32 %v460_v57, %v459_v15  ;;  %v464_v22 = vrot.slane %v459_v15, 4  ;;  %v3441_v23 = vunpack.c.l.bf16 %v3466_v10  ;;  %v3442_v24 = vunpack.c.h.bf16 %v3466_v10 }
  0x28   : > { %v596_v26 = vsel %vm4088_vm5, %v454_v16, %v595_v14  ;;  %v466_v27 = vshrl.u32 %v3407_v19, 16  ;;  %v469_v28 = vshll.u32 %v3407_v19, 16  ;;  %v474_v29 = vshrl.u32 %v3408_v20, 16  ;;  %v609_v11 = vld [vmem:[#allocation2 + $0x3c] sm:$0xf] }
  0x29   : > { %597 = vst [vmem:[#allocation2 + $0x24] sm:$0xf] %v596_v26  ;;  %v463_v31 = vsel %vm4094_vm6, %v455_v17, %v462_v21  ;;  %v600_v32 = vsel %vm4100_vm7, %v464_v22, %v599_v18  ;;  %v477_v33 = vshll.u32 %v3408_v20, 16  ;;  %v333_v34 = vmul.f32 %v3441_v23, %v4051_v1  ;;  %v613_v20 = vld [vmem:[#allocation2 + $0x44] sm:$0x1] }
  0x2a   : > { %598 = vst.msk [vmem:[#allocation2 + $0x28] sm:$0xf] %vm575_vm0, %v463_v31  ;;  %601 = vst [vmem:[#allocation2 + $0x2c] sm:$0x1] %v600_v32  ;;  %v468_v35 = vrot.slane %v466_v27, 7  ;;  %v476_v36 = vrot.slane %v474_v29, 7  ;;  %v334_v37 = vmul.f32 %v3442_v24, %v4051_v1  ;;  %v3445_v38 = vunpack.c.l.bf16 %v3467_v25 }
  0x2b   : > { %v355_v42 = vadd.f32 %v4067_v9, %v333_v34  ;;  %v3446_v43 = vunpack.c.h.bf16 %v3467_v25  ;;  %v3449_v44 = vunpack.c.l.bf16 %v3468_v30  ;;  %v3450_v45 = vunpack.c.h.bf16 %v3468_v30  ;;  %v616_v29 = vld [vmem:[#allocation2 + $0x48] sm:$0xf] }
  0x2c   : > { %v471_v46 = vor.u32 %v469_v28, %v468_v35  ;;  %v472_v47 = vrot.slane %v468_v35, 4  ;;  %v479_v49 = vor.u32 %v477_v33, %v476_v36  ;;  %v481_v50 = vrot.slane %v476_v36, 4 }
  0x2d   : > { %v3409_v51 = vpack.c.bf16 %v355_v42, %v355_v42  ;;  %v356_v53 = vadd.f32 %v4067_v9, %v334_v37  ;;  %v335_v54 = vmul.f32 %v3445_v38, %v4051_v1  ;;  %v336_v55 = vmul.f32 %v3446_v43, %v4051_v1  ;;  %v620_v38 = vld [vmem:[#allocation2 + $0x50] sm:$0x1] }
  0x2e   : > { %v603_v57 = vsel %vm4088_vm5, %v471_v46, %v602_v39  ;;  %v480_v58 = vsel %vm4094_vm6, %v472_v47, %v479_v49  ;;  %v607_v59 = vsel %vm4100_vm7, %v481_v50, %v606_v40  ;;  %v337_v60 = vmul.f32 %v3449_v44, %v4051_v1  ;;  %v623_v39 = vld [vmem:[#allocation2 + $0x54] sm:$0xf] }
  0x2f   : > { %604 = vst [vmem:[#allocation2 + $0x30] sm:$0xf] %v603_v57  ;;  %605 = vst.msk [vmem:[#allocation2 + $0x34] sm:$0xf] %vm575_vm0, %v480_v58  ;;  %v483_v61 = vshrl.u32 %v3409_v51, 16  ;;  %v486_v62 = vshll.u32 %v3409_v51, 16  ;;  %v3410_v63 = vpack.c.bf16 %v356_v53, %v356_v53  ;;  %v357_v0 = vadd.f32 %v4067_v9, %v335_v54 }
  0x30   : > { %608 = vst [vmem:[#allocation2 + $0x38] sm:$0x1] %v607_v59  ;;  %v358_v2 = vadd.f32 %v4067_v9, %v336_v55  ;;  %v359_v3 = vadd.f32 %v4067_v9, %v337_v60  ;;  %v338_v4 = vmul.f32 %v3450_v45, %v4051_v1  ;;  %v3453_v5 = vunpack.c.l.bf16 %v4135_v56  ;;  %v627_v58 = vld [vmem:[#allocation2 + $0x5c] sm:$0x1] }
  0x31   : > { %v485_v6 = vrot.slane %v483_v61, 7  ;;  %v491_v7 = vshrl.u32 %v3410_v63, 16  ;;  %v494_v8 = vshll.u32 %v3410_v63, 16  ;;  %v3411_v10 = vpack.c.bf16 %v357_v0, %v357_v0 }
  0x32   : > { %v3412_v12 = vpack.c.bf16 %v358_v2, %v358_v2  ;;  %v3413_v13 = vpack.c.bf16 %v359_v3, %v359_v3  ;;  %v360_v14 = vadd.f32 %v4067_v9, %v338_v4  ;;  %v339_v15 = vmul.f32 %v3453_v5, %v4051_v1  ;;  %v630_v4 = vld [vmem:[#allocation2 + $0x60] sm:$0xf] }
  0x33   : > { %v488_v16 = vor.u32 %v486_v62, %v485_v6  ;;  %v489_v17 = vrot.slane %v485_v6, 4  ;;  %v493_v18 = vrot.slane %v491_v7, 7  ;;  %v500_v19 = vshrl.u32 %v3411_v10, 16 }
  0x34   : > { %v503_v21 = vshll.u32 %v3411_v10, 16  ;;  %v508_v22 = vshrl.u32 %v3412_v12, 16  ;;  %v511_v23 = vshll.u32 %v3412_v12, 16  ;;  %v517_v24 = vshrl.u32 %v3413_v13, 16 }
  0x35   : > { %v610_v25 = vsel %vm4088_vm5, %v488_v16, %v609_v11  ;;  %v496_v26 = vor.u32 %v494_v8, %v493_v18  ;;  %v498_v27 = vrot.slane %v493_v18, 4  ;;  %v502_v28 = vrot.slane %v500_v19, 7  ;;  %v3456_v18 = vld [vmem:[%s644_s28] sm:$0xff] (!%p3214_p7)  }
  0x36   : > { %611 = vst [vmem:[#allocation2 + $0x3c] sm:$0xf] %v610_v25  ;;  %v510_v30 = vrot.slane %v508_v22, 7  ;;  %v519_v31 = vrot.slane %v517_v24, 7  ;;  %v520_v32 = vshll.u32 %v3413_v13, 16  ;;  %v3414_v33 = vpack.c.bf16 %v360_v14, %v360_v14 }
  0x37   : > { %v497_v34 = vsel %vm4094_vm6, %v489_v17, %v496_v26  ;;  %v614_v35 = vsel %vm4100_vm7, %v498_v27, %v613_v20  ;;  %v505_v36 = vor.u32 %v503_v21, %v502_v28  ;;  %v506_v37 = vrot.slane %v502_v28, 4  ;;  %v634_v13 = vld [vmem:[#allocation2 + $0x68] sm:$0x1] }
  0x38   : > { %612 = vst.msk [vmem:[#allocation2 + $0x40] sm:$0xf] %vm575_vm0, %v497_v34  ;;  %615 = vst [vmem:[#allocation2 + $0x44] sm:$0x1] %v614_v35  ;;  %v513_v40 = vor.u32 %v511_v23, %v510_v30  ;;  %v515_v42 = vrot.slane %v510_v30, 4  ;;  %v522_v43 = vor.u32 %v520_v32, %v519_v31  ;;  %v525_v45 = vshrl.u32 %v3414_v33, 16 }
  0x39   : > { %v617_v44 = vsel %vm4088_vm5, %v505_v36, %v616_v29  ;;  %v528_v46 = vshll.u32 %v3414_v33, 16  ;;  %v361_v47 = vadd.f32 %v4067_v9, %v339_v15  ;;  %v3454_v53 = vunpack.c.h.bf16 %v4135_v56  ;;  %v679_v33 = vld [vmem:[#allocation2] sm:$0xf] (!%p3214_p7)  ;;  %v683_v34 = vld [vmem:[#allocation2 + $0x8] sm:$0x1] (!%p3214_p7) }
  0x3a   : > { %618 = vst [vmem:[#allocation2 + $0x48] sm:$0xf] %v617_v44  ;;  %v514_v49 = vsel %vm4094_vm6, %v506_v37, %v513_v40  ;;  %v621_v50 = vsel %vm4100_vm7, %v515_v42, %v620_v38  ;;  %v624_v51 = vsel %vm4088_vm5, %v522_v43, %v623_v39  ;;  %v523_v54 = vrot.slane %v519_v31, 4 }
  0x3b   : > { %619 = vst.msk [vmem:[#allocation2 + $0x4c] sm:$0xf] %vm575_vm0, %v514_v49  ;;  %622 = vst [vmem:[#allocation2 + $0x50] sm:$0x1] %v621_v50  ;;  %v527_v55 = vrot.slane %v525_v45, 7  ;;  %v3415_v57 = vpack.c.bf16 %v361_v47, %v361_v47  ;;  %v340_v59 = vmul.f32 %v3454_v53, %v4051_v1  ;;  %v3457_v19 = vunpack.c.l.bf16 (!%p3214_p7), %v3456_v18 }
  0x3c   : > { %625 = vst [vmem:[#allocation2 + $0x54] sm:$0xf] %v624_v51  ;;  %v3458_v20 = vunpack.c.h.bf16 (!%p3214_p7), %v3456_v18 }
  0x3d   : > { %v530_v60 = vor.u32 %v528_v46, %v527_v55  ;;  %v532_v61 = vrot.slane %v527_v55, 4  ;;  %v534_v62 = vshrl.u32 %v3415_v57, 16  ;;  %v537_v63 = vshll.u32 %v3415_v57, 16 }
  0x3e   : > { %v362_v0 = vadd.f32 %v4067_v9, %v340_v59  ;;  %v649_v21 = vmul.f32 (!%p3214_p7), %v3457_v19, %v4051_v1  ;;  %v650_v22 = vmul.f32 (!%p3214_p7), %v3458_v20, %v4051_v1 }
  0x3f   : > { %v531_v2 = vsel %vm4094_vm6, %v523_v54, %v530_v60  ;;  %v628_v56 = vsel %vm4100_vm7, %v532_v61, %v627_v58  ;;  %v536_v3 = vrot.slane %v534_v62, 7 }
  0x40   : > { %626 = vst.msk [vmem:[#allocation2 + $0x58] sm:$0xf] %vm575_vm0, %v531_v2  ;;  %629 = vst [vmem:[#allocation2 + $0x5c] sm:$0x1] %v628_v56  ;;  %v3416_v5 = vpack.c.bf16 %v362_v0, %v362_v0  ;;  %v651_v23 = vadd.f32 (!%p3214_p7), %v4067_v9, %v649_v21  ;;  %v652_v24 = vadd.f32 (!%p3214_p7), %v4067_v9, %v650_v22 }
  0x41   : > { %v539_v6 = vor.u32 %v537_v63, %v536_v3  ;;  %v540_v11 = vrot.slane %v536_v3, 4 }
  0x42   : > { %v542_v7 = vshrl.u32 %v3416_v5, 16  ;;  %v545_v8 = vshll.u32 %v3416_v5, 16  ;;  %v3418_v25 = vpack.c.bf16 (!%p3214_p7), %v651_v23, %v651_v23  ;;  %v3419_v26 = vpack.c.bf16 (!%p3214_p7), %v652_v24, %v652_v24 }
  0x43   : > { %v631_v10 = vsel %vm4088_vm5, %v539_v6, %v630_v4  ;;  %640 = sbr.rel (%p3214_p7) target bundleno = 77 (0x4d), region = 44 }
  0x44   : > { %632 = vst [vmem:[#allocation2 + $0x60] sm:$0xf] %v631_v10  ;;  %v544_v12 = vrot.slane %v542_v7, 7  ;;  %v660_v27 = vshrl.u32 (!%p3214_p7), %v3418_v25, 16  ;;  %v663_v28 = vshll.u32 (!%p3214_p7), %v3418_v25, 16  ;;  %v668_v29 = vshrl.u32 (!%p3214_p7), %v3419_v26, 16 }
  0x45   : > { %v671_v30 = vshll.u32 (!%p3214_p7), %v3419_v26, 16 }
  0x46   : > { %v547_v14 = vor.u32 %v545_v8, %v544_v12  ;;  %v549_v15 = vrot.slane %v544_v12, 4  ;;  %v662_v31 = vrot.slane (!%p3214_p7), %v660_v27, 7  ;;  %v670_v32 = vrot.slane (!%p3214_p7), %v668_v29, 7 }
  0x48   : > { %v548_v16 = vsel %vm4094_vm6, %v540_v11, %v547_v14  ;;  %v635_v17 = vsel %vm4100_vm7, %v549_v15, %v634_v13  ;;  %v665_v35 = vor.u32 (!%p3214_p7), %v663_v28, %v662_v31  ;;  %v666_v36 = vrot.slane (!%p3214_p7), %v662_v31, 4 }
  0x49   : > { %633 = vst.msk [vmem:[#allocation2 + $0x64] sm:$0xf] %vm575_vm0, %v548_v16  ;;  %636 = vst [vmem:[#allocation2 + $0x68] sm:$0x1] %v635_v17  ;;  %v673_v37 = vor.u32 (!%p3214_p7), %v671_v30, %v670_v32  ;;  %v675_v38 = vrot.slane (!%p3214_p7), %v670_v32, 4 }
  0x4a   : > { %v680_v39 = vsel %vm4088_vm5, %v665_v35, %v679_v33 }
  0x4b   : > { %v674_v40 = vsel %vm4094_vm6, %v666_v36, %v673_v37  ;;  %v684_v42 = vsel %vm4100_vm7, %v675_v38, %v683_v34  ;;  %681 = vst [vmem:[#allocation2] sm:$0xf] %v680_v39 }
  0x4c   : > { %682 = vst.msk [vmem:[#allocation2 + $0x4] sm:$0xf] %vm575_vm0, %v674_v40  ;;  %685 = vst [vmem:[#allocation2 + $0x8] sm:$0x1] %v684_v42 }
  0x4d PF: > { %p3220_p8 = scmp.ge.s32.totalorder %s3950_s18, 1 }
  0x4e   : > { %v3470_v43 = vld [vmem:[%s4054_s12 + $0x40] sm:$0xff] (!%p3220_p8)   ;;  %v729_v61 = vld [vmem:[#allocation2 + $0x6c] sm:$0xf] (!%p3220_p8)  ;;  %v733_v62 = vld [vmem:[#allocation2 + $0x74] sm:$0x1] (!%p3220_p8) }
  0x4f   : > { %689 = sbr.rel (%p3220_p8) target bundleno = 96 (0x60), region = 48  ;;  %v3461_v44 = vunpack.c.l.bf16 (!%p3220_p8), %v3470_v43  ;;  %v3462_v45 = vunpack.c.h.bf16 (!%p3220_p8), %v3470_v43 }
  0x51   : > { %v698_v46 = vmul.f32 (!%p3220_p8), %v3461_v44, %v4051_v1  ;;  %v699_v47 = vmul.f32 (!%p3220_p8), %v3462_v45, %v4051_v1 }
  0x53   : > { %v700_v49 = vadd.f32 (!%p3220_p8), %v4067_v9, %v698_v46  ;;  %v701_v50 = vadd.f32 (!%p3220_p8), %v4067_v9, %v699_v47 }
  0x55   : > { %v3421_v51 = vpack.c.bf16 (!%p3220_p8), %v700_v49, %v700_v49  ;;  %v3422_v53 = vpack.c.bf16 (!%p3220_p8), %v701_v50, %v701_v50 }
  0x57   : > { %v709_v54 = vshrl.u32 %v3421_v51, 16  ;;  %v712_v55 = vshll.u32 %v3421_v51, 16  ;;  %v717_v57 = vshrl.u32 %v3422_v53, 16  ;;  %v720_v58 = vshll.u32 %v3422_v53, 16 }
  0x59   : > { %v711_v59 = vrot.slane %v709_v54, 7  ;;  %v719_v60 = vrot.slane %v717_v57, 7 }
  0x5b   : > { %v714_v63 = vor.u32 %v712_v55, %v711_v59  ;;  %v715_v0 = vrot.slane %v711_v59, 4  ;;  %v722_v2 = vor.u32 %v720_v58, %v719_v60  ;;  %v724_v56 = vrot.slane %v719_v60, 4 }
  0x5d   : > { %v730_v1 = vsel %vm4088_vm5, %v714_v63, %v729_v61  ;;  %v723_v9 = vsel %vm4094_vm6, %v715_v0, %v722_v2  ;;  %v734_v3 = vsel %vm4100_vm7, %v724_v56, %v733_v62 }
  0x5e   : > { %731 = vst [vmem:[#allocation2 + $0x6c] sm:$0xf] %v730_v1  ;;  %732 = vst.msk [vmem:[#allocation2 + $0x70] sm:$0xf] %vm575_vm0, %v723_v9 }
  0x5f   : > { %735 = vst [vmem:[#allocation2 + $0x74] sm:$0x1] %v734_v3 }
  0x60 PF: > { %v3832_v4 = vld [vmem:[%s5210_s1 + $0x40] sm:$0xff]   ;;  %v3836_v5 = vld [vmem:[%s5210_s1 + $0x48] sm:$0xff]   ;;  %v3840_v10 = vld [vmem:[%s5210_s1 + $0x50] sm:$0xff]   ;;  %vm760_vm8 = vsmask.f32 3328  ;;  %vm987_vm10 = vcmask 1042432  }
  0x61   : > { %v3833_v41 = vld [vmem:[%s5210_s1 + $0xc0] sm:$0xff]   ;;  %3471 = vmatprep.subr.bf16.mxu0 %v3832_v4  ;;  %v3837_v6 = vld [vmem:[%s5210_s1 + $0xc8] sm:$0xff]   ;;  %v3841_v11 = vld [vmem:[%s5210_s1 + $0xd0] sm:$0xff]   ;;  %vm761_vm9 = vsmask.f32 7440  ;;  %vm988_vm11 = vcmask 1046532  }
  0x62   : > { %v3834_v48 = vld [vmem:[%s5210_s1] sm:$0xff]   ;;  %3535 = vmatprep.subr.bf16.mxu1 %v3833_v41  ;;  %v3838_v7 = vld [vmem:[%s5210_s1 + $0x8] sm:$0xff]   ;;  %v3842_v12 = vld [vmem:[%s5210_s1 + $0x10] sm:$0xff]   ;;  %vm3067_vm14 = vcmask 64512  }
  0x63   : > { %v3835_v52 = vld [vmem:[%s5210_s1 + $0x80] sm:$0xff]   ;;  %3472 = vmatpush3.bf16.msra.mxu0 %v3834_v48  ;;  %v3839_v8 = vld [vmem:[%s5210_s1 + $0x88] sm:$0xff]   ;;  %v3843_v13 = vld [vmem:[%s5210_s1 + $0x90] sm:$0xff]  }
  0x64   : > { %3536 = vmatpush3.bf16.msra.mxu1 %v3835_v52  ;;  %3473 = vmatprep.subr.bf16.mxu0 %v3836_v5  ;;  %v3844_v14 = vld [vmem:[%s5210_s1 + $0x58] sm:$0xff]   ;;  %v3848_v18 = vld [vmem:[%s5210_s1 + $0x60] sm:$0xff]   ;;  %v3852_v22 = vld [vmem:[%s5210_s1 + $0x68] sm:$0xff]  }
  0x65   : > { %3537 = vmatprep.subr.bf16.mxu1 %v3837_v6  ;;  %v3845_v15 = vld [vmem:[%s5210_s1 + $0xd8] sm:$0xff]   ;;  %v3849_v19 = vld [vmem:[%s5210_s1 + $0xe0] sm:$0xff]   ;;  %v3853_v23 = vld [vmem:[%s5210_s1 + $0xe8] sm:$0xff]  }
  0x66   : > { %v3846_v16 = vld [vmem:[%s5210_s1 + $0x18] sm:$0xff]   ;;  %v3850_v20 = vld [vmem:[%s5210_s1 + $0x20] sm:$0xff]   ;;  %v3854_v24 = vld [vmem:[%s5210_s1 + $0x28] sm:$0xff]  }
  0x67   : > { %3474 = vmatpush3.bf16.msra.mxu0 %v3838_v7  ;;  %v3847_v17 = vld [vmem:[%s5210_s1 + $0x98] sm:$0xff]   ;;  %v3851_v21 = vld [vmem:[%s5210_s1 + $0xa0] sm:$0xff]   ;;  %v3855_v25 = vld [vmem:[%s5210_s1 + $0xa8] sm:$0xff]  }
  0x68   : > { %3538 = vmatpush3.bf16.msra.mxu1 %v3839_v8  ;;  %3475 = vmatprep.subr.bf16.mxu0 %v3840_v10  ;;  %v3856_v26 = vld [vmem:[%s5210_s1 + $0x70] sm:$0xff]   ;;  %v3860_v30 = vld [vmem:[%s5210_s1 + $0x78] sm:$0xff]   ;;  %v4307_v34 = vld [vmem:[#allocation2] sm:$0xf] }
  0x69   : > { %3539 = vmatprep.subr.bf16.mxu1 %v3841_v11  ;;  %v3857_v27 = vld [vmem:[%s5210_s1 + $0xf0] sm:$0xff]   ;;  %v3861_v31 = vld [vmem:[%s5210_s1 + $0xf8] sm:$0xff]   ;;  %v4309_v35 = vld [vmem:[#allocation2 + $0x4] sm:$0xf]  ;;  %v764_v37 = vshrl.u32 %v4307_v34, 16  ;;  %v767_v38 = vshll.u32 %v4307_v34, 16 }
  0x6a   : > { %v3858_v28 = vld [vmem:[%s5210_s1 + $0x30] sm:$0xff]   ;;  %v3862_v32 = vld [vmem:[%s5210_s1 + $0x38] sm:$0xff]   ;;  %v4311_v36 = vld [vmem:[#allocation2 + $0x8] sm:$0x1]  ;;  %v773_v39 = vshll.u32 %v4309_v35, 16  ;;  %v777_v40 = vshrl.u32 %v4309_v35, 16 }
  0x6b   : > { %3476 = vmatpush3.bf16.msra.mxu0 %v3842_v12  ;;  %v3859_v29 = vld [vmem:[%s5210_s1 + $0xb0] sm:$0xff]   ;;  %v3863_v33 = vld [vmem:[%s5210_s1 + $0xb8] sm:$0xff]   ;;  %v783_v42 = vshll.u32 %v4311_v36, 16  ;;  %v1046_v43 = vld [vmem:[#allocation2 + $0xc] sm:$0xf]  ;;  %v766_v44 = vrot.slane %v764_v37, 4 }
  0x6c   : > { %3540 = vmatpush3.bf16.msra.mxu1 %v3843_v13  ;;  %3477 = vmatprep.subr.bf16.mxu0 %v3844_v14  ;;  %v769_v45 = vrot.slane %v767_v38, 5  ;;  %v4318_v46 = vld [vmem:[#allocation2 + $0x10] sm:$0xf]  ;;  %v1071_v47 = vshrl.u32 %v1046_v43, 16  ;;  %v1074_v49 = vshll.u32 %v1046_v43, 16  ;;  %v775_v50 = vrot.slane %v773_v39, 5  ;;  %vm4327_vm12 = vmor %vm760_vm8, %vm761_vm9 }
  0x6d   : > { %3541 = vmatprep.subr.bf16.mxu1 %v3845_v15  ;;  %v779_v51 = vrot.slane %v777_v40, 4  ;;  %v1080_v53 = vshll.u32 %v4318_v46, 16  ;;  %v955_v54 = vld [vmem:[#allocation2] sm:$0xe]  ;;  %v1084_v59 = vshrl.u32 %v4318_v46, 16  ;;  %v785_v63 = vrot.slane %v783_v42, 5  ;;  %vm4337_vm13 = vmor %vm987_vm10, %vm988_vm11 }
  0x6e   : > { %v770_v55 = vor.u32 %v769_v45, %v766_v44  ;;  %v1073_v57 = vrot.slane %v1071_v47, 4  ;;  %v1076_v58 = vrot.slane %v1074_v49, 5  ;;  %v3866_v60 = vld [vmem:[%s5210_s1 + $0x140] sm:$0xff]   ;;  %v3275_v2 = vcombine.low %v1046_v43, %v4318_v46  ;;  %v956_v42 = vld [vmem:[#allocation2 + $0xc] sm:$0xe] }
  0x6f   : > { %3478 = vmatpush3.bf16.msra.mxu0 %v3846_v16  ;;  %v780_v62 = vor.u32 %v779_v51, %v775_v50  ;;  %v4331_v0 = vrot.slane %v1080_v53, 5  ;;  %v995_v1 = vrot.slane %v4311_v36, 5  ;;  %v1086_v3 = vrot.slane %v1084_v59, 4  ;;  %v3867_v41 = vld [vmem:[%s5210_s1 + $0x1c0] sm:$0xff]   ;;  %v3874_v36 = vld [vmem:[%s5210_s1 + $0x108] sm:$0xff]  }
  0x70   : > { %3542 = vmatpush3.bf16.msra.mxu1 %v3847_v17  ;;  %3479 = vmatprep.subr.bf16.mxu0 %v3848_v18  ;;  %v771_v56 = vrot.slane %v770_v55, 4  ;;  %v1077_v9 = vor.u32 %v1076_v58, %v1073_v57  ;;  %v1296_v52 = vrot.slane %v4318_v46, 5  ;;  %v3227_v5 = vrot.slane %v955_v54, 9  ;;  %v3868_v11 = vld [vmem:[%s5210_s1 + $0x100] sm:$0xff]   ;;  %v4363_v17 = vld [vmem:[#allocation2 + $0xc] sm:$0xf] }
  0x71   : > { %3543 = vmatprep.subr.bf16.mxu1 %v3849_v19  ;;  %v781_v48 = vrot.slane %v780_v62, 4  ;;  %2672 = vmatprep.mubr.bf16.mxu1 %v3275_v2  ;;  %v992_v6 = vrot.slane %v4309_v35, 5  ;;  %v1087_v10 = vor.u32 %v1086_v3, %v4331_v0  ;;  %v3251_v13 = vcombine.low %v4307_v34, %v4309_v35  ;;  %v3869_v16 = vld [vmem:[%s5210_s1 + $0x180] sm:$0xff]   ;;  %v3872_v18 = vld [vmem:[%s5210_s1 + $0x148] sm:$0xff]   ;;  %v4385_v34 = vld [vmem:[#allocation2 + $0x1c] sm:$0xf] }
  0x72   : > { %v776_v7 = vsel %vm4327_vm12, %v771_v56, %v775_v50  ;;  %v4348_v8 = vrot.slane %v1077_v9, 4  ;;  %v3875_v43 = vld [vmem:[%s5210_s1 + $0x188] sm:$0xff]   ;;  %v1108_v47 = vshrl.u32 %v4385_v34, 16  ;;  %v3878_v50 = vld [vmem:[%s5210_s1 + $0x150] sm:$0xff]   ;;  %v3228_v57 = vrot.slane %v956_v42, 9 }
  0x73   : > { %3480 = vmatpush3.bf16.msra.mxu0 %v3850_v20  ;;  %v786_v12 = vsel %vm4327_vm12, %v781_v48, %v785_v63  ;;  %v993_v14 = vsel %vm4337_vm13, %v3227_v5, %v992_v6  ;;  %v994_v15 = vrot.slane %v992_v6, 4  ;;  %v3879_v55 = vld [vmem:[%s5210_s1 + $0x1d0] sm:$0xff]   ;;  %v4420_v48 = vld [vmem:[#allocation2 + $0x18] sm:$0xf]  ;;  %v4422_v5 = vld [vmem:[#allocation2 + $0x1c] sm:$0xf] }
  0x74   : > { %3544 = vmatpush3.bf16.msra.mxu1 %v3851_v21  ;;  %3481 = vmatprep.subr.bf16.mxu0 %v3852_v22  ;;  %v3259_v19 = vcombine.low %v776_v7, %v786_v12  ;;  %v1083_v20 = vsel %vm4327_vm12, %v4348_v8, %v4331_v0  ;;  %v4372_v21 = vrot.slane %v1087_v10, 4  ;;  %v4374_v22 = vld [vmem:[#allocation2 + $0x10] sm:$0xf]  ;;  %v754_v6 = vld [vmem:[#allocation2 + $0x20] sm:$0x1]  ;;  %v815_v12 = vshll.u32 %v4420_v48, 16 }
  0x75   : > { %3545 = vmatprep.subr.bf16.mxu1 %v3853_v23  ;;  %v753_v23 = vld [vmem:[#allocation2 + $0x14] sm:$0x1]  ;;  %v999_v58 = vrot.slane %v4374_v22, 5 }
  0x76   : > { %2575 = vmatprep.mubr.bf16.mxu0 %v3259_v19  ;;  %v1002_v59 = vrot.slane %v753_v23, 5  ;;  %v957_v19 = vld [vmem:[#allocation2 + $0x18] sm:$0xe] }
  0x77   : > { %3482 = vmatpush3.bf16.msra.mxu0 %v3854_v24  ;;  %v788_v24 = vshrl.u32 %v4363_v17, 16  ;;  %v1000_v2 = vsel %vm4337_vm13, %v3228_v57, %v999_v58  ;;  %v1001_v56 = vrot.slane %v999_v58, 4 }
  0x78   : > { %3546 = vmatpush3.bf16.msra.mxu1 %v3855_v25  ;;  %3483 = vmatprep.subr.bf16.mxu0 %v3856_v26  ;;  %v996_v25 = vsel %vm4337_vm13, %v994_v15, %v995_v1  ;;  %v791_v26 = vshll.u32 %v4363_v17, 16  ;;  %v3881_v1 = vld [vmem:[%s5210_s1 + $0x190] sm:$0xff]  }
  0x79   : > { %3547 = vmatprep.subr.bf16.mxu1 %v3857_v27  ;;  %v797_v27 = vshll.u32 %v4374_v22, 16  ;;  %v1003_v10 = vsel %vm4337_vm13, %v1001_v56, %v1002_v59 }
  0x7a   : > { %v793_v37 = vrot.slane %v791_v26, 5  ;;  %v3268_v15 = vcombine.low %v1000_v2, %v1003_v10 }
  0x7b   : > { %3484 = vmatpush3.bf16.msra.mxu0 %v3858_v28  ;;  %v801_v28 = vshrl.u32 %v4374_v22, 16  ;;  %v799_v38 = vrot.slane %v797_v27, 5 }
  0x7c   : > { %3548 = vmatpush3.bf16.msra.mxu1 %v3859_v29  ;;  %3485 = vmatprep.subr.bf16.mxu0 %v3860_v30  ;;  %v1048_v29 = vld [vmem:[#allocation2 + $0x18] sm:$0xf]  ;;  %v3873_v30 = vld [vmem:[%s5210_s1 + $0x1c8] sm:$0xff]  }
  0x7d   : > { %3549 = vmatprep.subr.bf16.mxu1 %v3861_v31  ;;  %v3267_v31 = vcombine.low %v993_v14, %v996_v25  ;;  %v1095_v35 = vshrl.u32 %v1048_v29, 16  ;;  %v803_v39 = vrot.slane %v801_v28, 4  ;;  %v1098_v40 = vshll.u32 %v1048_v29, 16  ;;  %v4428_v14 = vld [vmem:[#allocation2 + $0x28] sm:$0xf] }
  0x7e   : > { %v3276_v49 = vcombine.low %v1048_v29, %v4385_v34 }
  0x7f   : > { %3486 = vmatpush3.bf16.msra.mxu0 %v3862_v32  ;;  %v790_v32 = vrot.slane %v788_v24, 4  ;;  %v4393_v45 = vrot.slane %v1095_v35, 4  ;;  %v804_v53 = vor.u32 %v803_v39, %v799_v38  ;;  %v4400_v54 = vrot.slane %v1098_v40, 5 }
  0x80   : > { %3550 = vmatpush3.bf16.msra.mxu1 %v3863_v33  ;;  %3599 = vmatprep.subr.bf16.mxu0 %v3866_v60  ;;  %v807_v33 = vshll.u32 %v753_v23, 16  ;;  %v3880_v60 = vld [vmem:[%s5210_s1 + $0x110] sm:$0xff]   ;;  %v817_v24 = vrot.slane %v815_v12, 5  ;;  %v1009_v40 = vrot.slane %v754_v6, 5 }
  0x81   : > { %3663 = vmatprep.subr.bf16.mxu1 %v3867_v41  ;;  %v794_v51 = vor.u32 %v793_v37, %v790_v32  ;;  %v805_v63 = vrot.slane %v804_v53, 4  ;;  %v3252_v41 = vcombine.low %v4363_v17, %v4374_v22  ;;  %v825_v17 = vshrl.u32 %v4422_v5, 16  ;;  %v3884_v22 = vld [vmem:[%s5210_s1 + $0x158] sm:$0xff]  }
  0x82   : > { %2576 = vmatmul.mubr.bf16.vlgmr.msra.gmra.mrb[0].mxu0 %v3251_v13  ;;  %v809_v44 = vrot.slane %v807_v33, 5  ;;  %v1050_v13 = vld [vmem:[#allocation2 + $0x24] sm:$0xf]  ;;  %v3229_v37 = vrot.slane %v957_v19, 9 }
  0x83   : > { %2673 = vmatmul.mubr.bf16.vlgmr.msra.gmra.mrb[0].mxu1 %v3267_v31  ;;  %3600 = vmatpush3.bf16.msra.mxu0 %v3868_v11  ;;  %v795_v62 = vrot.slane %v794_v51, 4  ;;  %v812_v11 = vshrl.u32 %v4420_v48, 16  ;;  %v1119_v25 = vshrl.u32 %v1050_v13, 16  ;;  %v1122_v26 = vshll.u32 %v1050_v13, 16  ;;  %v4448_v51 = vld [vmem:[#allocation2 + $0x28] sm:$0xf] }
  0x84   : > { %3664 = vmatpush3.bf16.msra.mxu1 %v3869_v16  ;;  %3601 = vmatprep.subr.bf16.mxu0 %v3872_v18  ;;  %v810_v3 = vsel %vm4327_vm12, %v805_v63, %v809_v44  ;;  %v821_v16 = vshll.u32 %v4422_v5, 16  ;;  %v831_v18 = vshll.u32 %v754_v6, 16  ;;  %v827_v28 = vrot.slane %v825_v17, 4  ;;  %v958_v6 = vld [vmem:[#allocation2 + $0x24] sm:$0xe] }
  0x85   : > { %2680 = vmatprep.mubr.bf16.mxu1 %v3276_v49  ;;  %3665 = vmatprep.subr.bf16.mxu1 %v3873_v30  ;;  %v800_v9 = vsel %vm4327_vm12, %v795_v62, %v799_v38  ;;  %v814_v23 = vrot.slane %v812_v11, 4  ;;  %v1132_v30 = vshrl.u32 %v4428_v14, 16  ;;  %v4436_v32 = vrot.slane %v1119_v25, 4 }
  0x86   : > { %v3260_v7 = vcombine.low %v800_v9, %v810_v3  ;;  %v823_v27 = vrot.slane %v821_v16, 5  ;;  %v833_v29 = vrot.slane %v831_v18, 5  ;;  %v4438_v33 = vrot.slane %v1122_v26, 5  ;;  %v4463_v9 = vld [vmem:[#allocation2 + $0x34] sm:$0xf] }
  0x87   : > { %3602 = vmatpush3.bf16.msra.mxu0 %v3874_v36  ;;  %v818_v31 = vor.u32 %v817_v24, %v814_v23  ;;  %v3277_v35 = vcombine.low %v1050_v13, %v4428_v14  ;;  %v1006_v38 = vrot.slane %v4422_v5, 5  ;;  %v845_v59 = vshll.u32 %v4448_v51, 16 }
  0x88   : > { %3666 = vmatpush3.bf16.msra.mxu1 %v3875_v43  ;;  %3603 = vmatprep.subr.bf16.mxu0 %v3878_v50  ;;  %v828_v36 = vor.u32 %v827_v28, %v823_v27  ;;  %v3253_v43 = vcombine.low %v4420_v48, %v4422_v5  ;;  %v4446_v50 = vld [vmem:[#allocation2 + $0x24] sm:$0xf]  ;;  %v849_v2 = vshrl.u32 %v4448_v51, 16  ;;  %v1156_v16 = vshrl.u32 %v4463_v9, 16  ;;  %v3887_v28 = vld [vmem:[%s5210_s1 + $0x198] sm:$0xff]  }
  0x89   : > { %3667 = vmatprep.subr.bf16.mxu1 %v3879_v55  ;;  %2583 = vmatprep.mubr.bf16.mxu0 %v3260_v7  ;;  %v819_v39 = vrot.slane %v818_v31, 4  ;;  %v1007_v44 = vsel %vm4337_vm13, %v3229_v37, %v1006_v38  ;;  %v1008_v49 = vrot.slane %v1006_v38, 4  ;;  %v755_v55 = vld [vmem:[#allocation2 + $0x2c] sm:$0x1]  ;;  %v836_v57 = vshrl.u32 %v4446_v50, 16  ;;  %v3890_v31 = vld [vmem:[%s5210_s1 + $0x160] sm:$0xff]  }
  0x8a   : > { %2584 = vmatmul.mubr.bf16.gmra.mrb[4].mxu0 %v3252_v41  ;;  %v829_v42 = vrot.slane %v828_v36, 4  ;;  %v839_v58 = vshll.u32 %v4446_v50, 16  ;;  %v855_v56 = vshll.u32 %v755_v55, 16  ;;  %v847_v7 = vrot.slane %v845_v59, 5 }
  0x8b   : > { %3604 = vmatpush3.bf16.msra.mxu0 %v3880_v60  ;;  %2681 = vmatmul.mubr.bf16.gmra.mrb[4].mxu1 %v3268_v15  ;;  %v824_v53 = vsel %vm4327_vm12, %v819_v39, %v823_v27  ;;  %v3885_v60 = vld [vmem:[%s5210_s1 + $0x1d8] sm:$0xff]   ;;  %v1010_v63 = vsel %vm4337_vm13, %v1008_v49, %v1009_v40  ;;  %v838_v48 = vrot.slane %v836_v57, 4  ;;  %v851_v10 = vrot.slane %v849_v2, 4  ;;  %v4487_v39 = vld [vmem:[#allocation2 + $0x30] sm:$0xf] }
  0x8c   : > { %3668 = vmatpush3.bf16.msra.mxu1 %v3881_v1  ;;  %3605 = vmatprep.subr.bf16.mxu0 %v3884_v22  ;;  %v834_v62 = vsel %vm4327_vm12, %v829_v42, %v833_v29  ;;  %v1052_v1 = vld [vmem:[#allocation2 + $0x30] sm:$0xf]  ;;  %v3269_v41 = vcombine.low %v1007_v44, %v1010_v63  ;;  %v841_v5 = vrot.slane %v839_v58, 5  ;;  %v857_v11 = vrot.slane %v855_v56, 5  ;;  %v3886_v27 = vld [vmem:[%s5210_s1 + $0x118] sm:$0xff]   ;;  %v3891_v42 = vld [vmem:[%s5210_s1 + $0x1e0] sm:$0xff]  }
  0x8d   : > { %2688 = vmatprep.mubr.bf16.mxu1 %v3277_v35  ;;  %v3261_v3 = vcombine.low %v824_v53, %v834_v62  ;;  %3669 = vmatprep.subr.bf16.mxu1 %v3885_v60  ;;  %v1143_v12 = vshrl.u32 %v1052_v1, 16  ;;  %v1146_v15 = vshll.u32 %v1052_v1, 16  ;;  %v3278_v17 = vcombine.low %v1052_v1, %v4463_v9  ;;  %v4489_v40 = vld [vmem:[#allocation2 + $0x34] sm:$0xf]  ;;  %v756_v44 = vld [vmem:[#allocation2 + $0x38] sm:$0x1] }
  0x8e   : > { %v842_v13 = vor.u32 %v841_v5, %v838_v48  ;;  %v852_v18 = vor.u32 %v851_v10, %v847_v7  ;;  %v3230_v22 = vrot.slane %v958_v6, 9  ;;  %v1013_v25 = vrot.slane %v4448_v51, 5  ;;  %v3892_v53 = vld [vmem:[%s5210_s1 + $0x120] sm:$0xff]   ;;  %v1054_v60 = vld [vmem:[#allocation2 + $0x3c] sm:$0xf] }
  0x8f   : > { %2591 = vmatprep.mubr.bf16.mxu0 %v3261_v3  ;;  %v4467_v19 = vrot.slane %v1143_v12, 4  ;;  %v4469_v24 = vrot.slane %v1146_v15, 5  ;;  %v1016_v26 = vrot.slane %v755_v55, 5  ;;  %v3254_v36 = vcombine.low %v4446_v50, %v4448_v51  ;;  %3606 = vmatpush3.bf16.msra.mxu0 %v3886_v27  ;;  %v4505_v62 = vld [vmem:[#allocation2 + $0x40] sm:$0xf] }
  0x90   : > { %v843_v23 = vrot.slane %v842_v13, 4  ;;  %v853_v29 = vrot.slane %v852_v18, 4  ;;  %v1014_v37 = vsel %vm4337_vm13, %v3230_v22, %v1013_v25  ;;  %v1015_v38 = vrot.slane %v1013_v25, 4  ;;  %3670 = vmatpush3.bf16.msra.mxu1 %v3887_v28  ;;  %3607 = vmatprep.subr.bf16.mxu0 %v3890_v31  ;;  %v959_v3 = vld [vmem:[#allocation2 + $0x30] sm:$0xe]  ;;  %v3896_v13 = vld [vmem:[%s5210_s1 + $0x168] sm:$0xff]  }
  0x91   : > { %v860_v49 = vshrl.u32 %v4487_v39, 16  ;;  %v863_v50 = vshll.u32 %v4487_v39, 16  ;;  %v869_v51 = vshll.u32 %v4489_v40, 16  ;;  %v873_v58 = vshrl.u32 %v4489_v40, 16  ;;  %3671 = vmatprep.subr.bf16.mxu1 %v3891_v42  ;;  %v3898_v28 = vld [vmem:[%s5210_s1 + $0x128] sm:$0xff]   ;;  %v3902_v42 = vld [vmem:[%s5210_s1 + $0x170] sm:$0xff]  }
  0x92   : > { %2592 = vmatmul.mubr.bf16.gmra.mrb[8].mxu0 %v3253_v43  ;;  %v848_v35 = vsel %vm4327_vm12, %v843_v23, %v847_v7  ;;  %v858_v43 = vsel %vm4327_vm12, %v853_v29, %v857_v11  ;;  %v1017_v57 = vsel %vm4337_vm13, %v1015_v38, %v1016_v26  ;;  %v879_v59 = vshll.u32 %v756_v44, 16  ;;  %v3897_v23 = vld [vmem:[%s5210_s1 + $0x1e8] sm:$0xff]   ;;  %v4533_v38 = vld [vmem:[#allocation2 + $0x3c] sm:$0xf] }
  0x93   : > { %2689 = vmatmul.mubr.bf16.gmra.mrb[8].mxu1 %v3269_v41  ;;  %v3262_v55 = vcombine.low %v848_v35, %v858_v43  ;;  %v3270_v63 = vcombine.low %v1014_v37, %v1017_v57  ;;  %v862_v2 = vrot.slane %v860_v49, 4  ;;  %v865_v56 = vrot.slane %v863_v50, 5  ;;  %v3893_v41 = vld [vmem:[%s5210_s1 + $0x1a0] sm:$0xff]   ;;  %3608 = vmatpush3.bf16.msra.mxu0 %v3892_v53  ;;  %v3899_v31 = vld [vmem:[%s5210_s1 + $0x1a8] sm:$0xff]  }
  0x94   : > { %2696 = vmatprep.mubr.bf16.mxu1 %v3278_v17  ;;  %v871_v1 = vrot.slane %v869_v51, 5  ;;  %v875_v48 = vrot.slane %v873_v58, 4  ;;  %v881_v5 = vrot.slane %v879_v59, 5  ;;  %v1167_v6 = vshrl.u32 %v1054_v60, 16  ;;  %3672 = vmatpush3.bf16.msra.mxu1 %v3893_v41  ;;  %v4542_v49 = vld [vmem:[#allocation2 + $0x40] sm:$0xf] }
  0x95   : > { %2599 = vmatprep.mubr.bf16.mxu0 %v3262_v55  ;;  %v1170_v7 = vshll.u32 %v1054_v60, 16  ;;  %v866_v10 = vor.u32 %v865_v56, %v862_v2  ;;  %v3279_v12 = vcombine.low %v1054_v60, %v4505_v62  ;;  %v3231_v22 = vrot.slane %v959_v3, 9  ;;  %3609 = vmatprep.subr.bf16.mxu0 %v3896_v13  ;;  %v757_v50 = vld [vmem:[#allocation2 + $0x44] sm:$0x1]  ;;  %v1056_v60 = vld [vmem:[#allocation2 + $0x48] sm:$0xf] }
  0x96   : > { %v876_v15 = vor.u32 %v875_v48, %v871_v1  ;;  %v4515_v17 = vrot.slane %v1167_v6, 4  ;;  %v1020_v26 = vrot.slane %v4489_v40, 5  ;;  %v1023_v27 = vrot.slane %v756_v44, 5  ;;  %3673 = vmatprep.subr.bf16.mxu1 %v3897_v23  ;;  %v3903_v3 = vld [vmem:[%s5210_s1 + $0x1f0] sm:$0xff]  }
  0x97   : > { %v4517_v18 = vrot.slane %v1170_v7, 5  ;;  %v867_v25 = vrot.slane %v866_v10, 4  ;;  %3610 = vmatpush3.bf16.msra.mxu0 %v3898_v28  ;;  %v3255_v44 = vcombine.low %v4487_v39, %v4489_v40  ;;  %v884_v51 = vshrl.u32 %v4533_v38, 16 }
  0x98   : > { %v877_v29 = vrot.slane %v876_v15, 4  ;;  %v1022_v37 = vrot.slane %v1020_v26, 4  ;;  %v887_v53 = vshll.u32 %v4533_v38, 16  ;;  %3674 = vmatpush3.bf16.msra.mxu1 %v3899_v31  ;;  %v893_v58 = vshll.u32 %v4542_v49, 16  ;;  %3611 = vmatprep.subr.bf16.mxu0 %v3902_v42  ;;  %v3904_v31 = vld [vmem:[%s5210_s1 + $0x130] sm:$0xff]  }
  0x99   : > { %v872_v35 = vsel %vm4327_vm12, %v867_v25, %v871_v1  ;;  %v897_v59 = vshrl.u32 %v4542_v49, 16  ;;  %v886_v40 = vrot.slane %v884_v51, 4  ;;  %v903_v56 = vshll.u32 %v757_v50, 16  ;;  %v960_v1 = vld [vmem:[#allocation2 + $0x3c] sm:$0xe]  ;;  %3675 = vmatprep.subr.bf16.mxu1 %v3903_v3  ;;  %v3905_v51 = vld [vmem:[%s5210_s1 + $0x1b0] sm:$0xff]  }
  0x9a   : > { %2600 = vmatmul.mubr.bf16.gmra.mrb[12].mxu0 %v3254_v36  ;;  %v1021_v36 = vsel %vm4337_vm13, %v3231_v22, %v1020_v26  ;;  %v882_v43 = vsel %vm4327_vm12, %v877_v29, %v881_v5  ;;  %v1024_v57 = vsel %vm4337_vm13, %v1022_v37, %v1023_v27  ;;  %v889_v2 = vrot.slane %v887_v53, 5 }
  0x9b   : > { %2697 = vmatmul.mubr.bf16.gmra.mrb[12].mxu1 %v3270_v63  ;;  %v3263_v55 = vcombine.low %v872_v35, %v882_v43  ;;  %v4550_v63 = vld [vmem:[#allocation2 + $0x4c] sm:$0xf]  ;;  %v3271_v39 = vcombine.low %v1021_v36, %v1024_v57  ;;  %v895_v41 = vrot.slane %v893_v58, 5  ;;  %v899_v48 = vrot.slane %v897_v59, 4  ;;  %3612 = vmatpush3.bf16.msra.mxu0 %v3904_v31  ;;  %v3908_v58 = vld [vmem:[%s5210_s1 + $0x178] sm:$0xff]  }
  0x9c   : > { %2704 = vmatprep.mubr.bf16.mxu1 %v3279_v12  ;;  %v1191_v5 = vshrl.u32 %v1056_v60, 16  ;;  %v1194_v6 = vshll.u32 %v1056_v60, 16  ;;  %v890_v7 = vor.u32 %v889_v2, %v886_v40  ;;  %v905_v10 = vrot.slane %v903_v56, 5  ;;  %v1058_v2 = vld [vmem:[#allocation2 + $0x54] sm:$0xf]  ;;  %3676 = vmatpush3.bf16.msra.mxu1 %v3905_v51 }
  0x9d   : > { %2607 = vmatprep.mubr.bf16.mxu0 %v3263_v55  ;;  %v3280_v13 = vcombine.low %v1056_v60, %v4550_v63  ;;  %v900_v15 = vor.u32 %v899_v48, %v895_v41  ;;  %v3232_v26 = vrot.slane %v960_v1, 9  ;;  %v1027_v27 = vrot.slane %v4542_v49, 5  ;;  %v4582_v55 = vld [vmem:[#allocation2 + $0x50] sm:$0x1]  ;;  %v4594_v56 = vld [vmem:[#allocation2 + $0x58] sm:$0xf]  ;;  %3613 = vmatprep.subr.bf16.mxu0 %v3908_v58 }
  0x9e   : > { %v4557_v22 = vrot.slane %v1191_v5, 4  ;;  %v4559_v23 = vrot.slane %v1194_v6, 5  ;;  %v891_v25 = vrot.slane %v890_v7, 4  ;;  %v1030_v28 = vrot.slane %v757_v50, 5  ;;  %v4575_v50 = vld [vmem:[#allocation2 + $0x4c] sm:$0xf] }
  0x9f   : > { %v901_v29 = vrot.slane %v900_v15, 4  ;;  %v1101_v35 = vor.u32 %v4400_v54, %v4393_v45  ;;  %v3256_v37 = vcombine.low %v4533_v38, %v4542_v49  ;;  %v1028_v42 = vsel %vm4337_vm13, %v3232_v26, %v1027_v27  ;;  %v961_v5 = vld [vmem:[#allocation2 + $0x48] sm:$0xe]  ;;  %v3909_v6 = vld [vmem:[%s5210_s1 + $0x1f8] sm:$0xff]   ;;  %v4622_v58 = vld [vmem:[%s5210_s1 + $0x200] sm:$0xff]  }
  0xa0   : > { %v896_v36 = vsel %vm4327_vm12, %v891_v25, %v895_v41  ;;  %v1029_v43 = vrot.slane %v1027_v27, 4  ;;  %v917_v49 = vshll.u32 %v4575_v50, 16  ;;  %v927_v40 = vshll.u32 %v4582_v55, 16  ;;  %3677 = vmatprep.subr.bf16.mxu1 %v3909_v6  ;;  %v4641_v6 = vld [vmem:[#allocation2 + $0x58] sm:$0xf] }
  0xa1   : > { %v906_v53 = vsel %vm4327_vm12, %v901_v29, %v905_v10  ;;  %v1218_v15 = vshll.u32 %v1058_v2, 16  ;;  %v3281_v27 = vcombine.low %v1058_v2, %v4594_v56  ;;  %v1125_v29 = vor.u32 %v4438_v33, %v4436_v32 }
  0xa2   : > { %2608 = vmatmul.mubr.bf16.gmra.mrb[16].mxu0 %v3255_v44  ;;  %v4573_v44 = vld [vmem:[#allocation2 + $0x48] sm:$0xf]  ;;  %v3264_v59 = vcombine.low %v896_v36, %v906_v53  ;;  %v1031_v60 = vsel %vm4337_vm13, %v1029_v43, %v1030_v28  ;;  %v919_v48 = vrot.slane %v917_v49, 5  ;;  %v929_v10 = vrot.slane %v927_v40, 5  ;;  %v3910_v28 = vld [vmem:[%s5210_s1 + $0x138] sm:$0xff]  }
  0xa3   : > { %2705 = vmatmul.mubr.bf16.gmra.mrb[16].mxu1 %v3271_v39  ;;  %v908_v57 = vshrl.u32 %v4573_v44, 16  ;;  %v911_v38 = vshll.u32 %v4573_v44, 16  ;;  %v921_v39 = vshrl.u32 %v4575_v50, 16  ;;  %v3272_v1 = vcombine.low %v1028_v42, %v1031_v60  ;;  %3614 = vmatpush3.bf16.msra.mxu0 %v3910_v28 }
  0xa4   : > { %2712 = vmatprep.mubr.bf16.mxu1 %v3280_v13  ;;  %2615 = vmatprep.mubr.bf16.mxu0 %v3264_v59  ;;  %v1215_v13 = vshrl.u32 %v1058_v2, 16  ;;  %v4608_v42 = vrot.slane %v1218_v15, 5  ;;  %v3233_v43 = vrot.slane %v961_v5, 9  ;;  %v1034_v53 = vrot.slane %v4575_v50, 5 }
  0xa5   : > { %v910_v3 = vrot.slane %v908_v57, 4  ;;  %v913_v41 = vrot.slane %v911_v38, 5  ;;  %v923_v7 = vrot.slane %v921_v39, 4  ;;  %v1037_v57 = vrot.slane %v4582_v55, 5  ;;  %3743 = vmatprep.subr.bf16.mxu0 %v4622_v58 }
  0xa6   : > { %v4606_v36 = vrot.slane %v1215_v13, 4  ;;  %v4617_v38 = vrot.slane %v1296_v52, 4  ;;  %v1149_v59 = vor.u32 %v4469_v24, %v4467_v19  ;;  %v1173_v60 = vor.u32 %v4517_v18, %v4515_v17  ;;  %v4853_v24 = vld [vmem:[#allocation2 + $0x48] sm:$0xf] }
  0xa7   : > { %v914_v25 = vor.u32 %v913_v41, %v910_v3  ;;  %v924_v31 = vor.u32 %v923_v7, %v919_v48  ;;  %v1035_v40 = vsel %vm4337_vm13, %v3233_v43, %v1034_v53  ;;  %v1036_v2 = vrot.slane %v1034_v53, 4  ;;  %v759_v7 = vld [vmem:[#allocation2 + $0x5c] sm:$0x1] }
  0xa8   : > { %v1303_v3 = vrot.slane %v4385_v34, 5  ;;  %v3257_v5 = vcombine.low %v4573_v44, %v4575_v50  ;;  %v1060_v44 = vld [vmem:[#allocation2 + $0x60] sm:$0xf]  ;;  %v4651_v50 = vld [vmem:[#allocation2 + $0x64] sm:$0xf] }
  0xa9   : > { %v915_v51 = vrot.slane %v914_v25, 4  ;;  %v925_v49 = vrot.slane %v924_v31, 4  ;;  %v1038_v25 = vsel %vm4337_vm13, %v1036_v2, %v1037_v57  ;;  %v1239_v26 = vshrl.u32 %v1060_v44, 16 }
  0xaa   : > { %2616 = vmatmul.mubr.bf16.gmra.mrb[20].mxu0 %v3256_v37  ;;  %v3911_v37 = vld [vmem:[%s5210_s1 + $0x1b8] sm:$0xff]   ;;  %v3273_v28 = vcombine.low %v1035_v40, %v1038_v25  ;;  %v3282_v12 = vcombine.low %v1060_v44, %v4651_v50  ;;  %v1044_v25 = vrot.slane %v759_v7, 5 }
  0xab   : > { %2713 = vmatmul.mubr.bf16.gmra.mrb[20].mxu1 %v3272_v1  ;;  %v920_v39 = vsel %vm4327_vm12, %v915_v51, %v919_v48  ;;  %v4634_v1 = vld [vmem:[#allocation2 + $0x54] sm:$0xf]  ;;  %v930_v41 = vsel %vm4327_vm12, %v925_v49, %v929_v10  ;;  %v941_v10 = vshll.u32 %v4641_v6, 16  ;;  %v4655_v11 = vrot.slane %v1239_v26, 4 }
  0xac   : > { %2720 = vmatprep.mubr.bf16.mxu1 %v3281_v27  ;;  %3678 = vmatpush3.bf16.msra.mxu1 %v3911_v37  ;;  %v932_v13 = vshrl.u32 %v4634_v1, 16  ;;  %v935_v48 = vshll.u32 %v4634_v1, 16  ;;  %v3265_v15 = vcombine.low %v920_v39, %v930_v41  ;;  %v945_v27 = vshrl.u32 %v4641_v6, 16  ;;  %v962_v51 = vld [vmem:[#allocation2 + $0x54] sm:$0xe] }
  0xad   : > { %3775 = vmatprep.subr.bf16.mxu1 %v4622_v58  ;;  %v951_v37 = vshll.u32 %v759_v7, 16  ;;  %v943_v53 = vrot.slane %v941_v10, 5  ;;  %v1242_v39 = vshll.u32 %v1060_v44, 16  ;;  %v1252_v41 = vshrl.u32 %v4651_v50, 16 }
  0xae   : > { %v934_v31 = vrot.slane %v932_v13, 4  ;;  %v937_v43 = vrot.slane %v935_v48, 5  ;;  %2623 = vmatprep.mubr.bf16.mxu0 %v3265_v15  ;;  %v947_v49 = vrot.slane %v945_v27, 4  ;;  %v1221_v13 = vor.u32 %v4608_v42, %v4606_v36 }
  0xaf   : > { %v953_v2 = vrot.slane %v951_v37, 5  ;;  %v4657_v40 = vrot.slane %v1242_v39, 5  ;;  %v3234_v15 = vrot.slane %v962_v51, 9  ;;  %v3258_v27 = vcombine.low %v4634_v1, %v4641_v6  ;;  %v1262_v37 = vld [vmem:[#allocation2 + $0xc] sm:$0xe] }
  0xb0   : > { %v938_v57 = vor.u32 %v937_v43, %v934_v31  ;;  %v948_v55 = vor.u32 %v947_v49, %v943_v53  ;;  %v1305_v44 = vrot.slane %v1303_v3, 4  ;;  %v1062_v43 = vld [vmem:[#allocation2 + $0x14] sm:$0x1]  ;;  %v3235_v7 = vrot.slane %v1262_v37, 9  ;;  %v4679_v49 = vld [vmem:[#allocation2 + $0x18] sm:$0xf] }
  0xb1   : > { %v1245_v26 = vor.u32 %v4657_v40, %v4655_v11  ;;  %v1299_v51 = vrot.slane %v1062_v43, 5  ;;  %v1376_v45 = vshrl.u32 %v4679_v49, 16  ;;  %v1379_v54 = vshll.u32 %v4679_v49, 16  ;;  %v1263_v37 = vld [vmem:[#allocation2 + $0x18] sm:$0xe] }
  0xb2   : > { %2624 = vmatmul.mubr.bf16.gmra.mrb[24].mxu0 %v3257_v5  ;;  %v939_v48 = vrot.slane %v938_v57, 4  ;;  %v1041_v5 = vrot.slane %v4641_v6, 5  ;;  %v949_v10 = vrot.slane %v948_v55, 4  ;;  %v4675_v55 = vrot.slane %v1101_v35, 4  ;;  %v4683_v57 = vld [vmem:[#allocation2 + $0x1c] sm:$0xf] }
  0xb3   : > { %2721 = vmatmul.mubr.bf16.gmra.mrb[24].mxu1 %v3273_v28  ;;  %v1090_v6 = vshll.u32 %v1062_v43, 16  ;;  %v1063_v43 = vld [vmem:[#allocation2 + $0x20] sm:$0x1] }
  0xb4   : > { %2728 = vmatprep.mubr.bf16.mxu1 %v3282_v12  ;;  %v944_v28 = vsel %vm4327_vm12, %v939_v48, %v943_v53  ;;  %v1042_v12 = vsel %vm4337_vm13, %v3234_v15, %v1041_v5  ;;  %v1043_v31 = vrot.slane %v1041_v5, 4  ;;  %v954_v1 = vsel %vm4327_vm12, %v949_v10, %v953_v2  ;;  %v4685_v48 = vld [vmem:[#allocation2 + $0x20] sm:$0x1] }
  0xb5   : > { %v3266_v53 = vcombine.low %v944_v28, %v954_v1  ;;  %v1092_v15 = vrot.slane %v1090_v6, 5  ;;  %v1297_v2 = vsel %vm4337_vm13, %v3235_v7, %v1296_v52  ;;  %v1300_v5 = vsel %vm4337_vm13, %v4617_v38, %v1299_v51  ;;  %v4704_v1 = vld [vmem:[#allocation2 + $0x24] sm:$0xf] }
  0xb6   : > { %v1045_v39 = vsel %vm4337_vm13, %v1043_v31, %v1044_v25  ;;  %v3291_v25 = vcombine.low %v1297_v2, %v1300_v5  ;;  %v1378_v10 = vrot.slane %v1376_v45, 4  ;;  %v1381_v28 = vrot.slane %v1379_v54, 5 }
  0xb7   : > { %v3274_v35 = vcombine.low %v1042_v12, %v1045_v39  ;;  %2631 = vmatprep.mubr.bf16.mxu0 %v3266_v53  ;;  %v1385_v31 = vshll.u32 %v4683_v57, 16  ;;  %v1389_v12 = vshrl.u32 %v4683_v57, 16  ;;  %v1395_v46 = vshll.u32 %v4685_v48, 16  ;;  %v4711_v53 = vld [vmem:[#allocation2 + $0x28] sm:$0xf] }
  0xb8   : > { %v1093_v52 = vsel %vm4327_vm12, %v4372_v21, %v1092_v15  ;;  %v3299_v38 = vcombine.low %v4679_v49, %v4683_v57  ;;  %v1382_v6 = vor.u32 %v1381_v28, %v1378_v10  ;;  %v3236_v51 = vrot.slane %v1263_v37, 9  ;;  %v4713_v39 = vld [vmem:[#allocation2 + $0x2c] sm:$0x1] }
  0xb9   : > { %v1387_v7 = vrot.slane %v1385_v31, 5  ;;  %v1391_v21 = vrot.slane %v1389_v12, 4  ;;  %v1397_v45 = vrot.slane %v1395_v46, 5  ;;  %v1306_v49 = vrot.slane %v1063_v43, 5  ;;  %v4732_v46 = vld [vmem:[#allocation2 + $0x2c] sm:$0x1] }
  0xba   : > { %2632 = vmatmul.mubr.bf16.gmra.mrb[28].mxu0 %v3258_v27  ;;  %v3283_v27 = vcombine.low %v1083_v20, %v1093_v52  ;;  %v1400_v54 = vshrl.u32 %v4704_v1, 16  ;;  %v1304_v15 = vsel %vm4337_vm13, %v3236_v51, %v1303_v3  ;;  %v1403_v2 = vshll.u32 %v4704_v1, 16  ;;  %v4730_v3 = vld [vmem:[%s5210_s1 + $0x208] sm:$0xff]   ;;  %v1264_v51 = vld [vmem:[#allocation2 + $0x24] sm:$0xe] }
  0xbb   : > { %2729 = vmatmul.mubr.bf16.gmra.mrb[28].mxu1 %v3274_v35  ;;  %2769 = vmatprep.mubr.bf16.mxu0 %v3291_v25  ;;  %v1383_v35 = vrot.slane %v1382_v6, 4  ;;  %v1409_v0 = vshll.u32 %v4711_v53, 16  ;;  %v1392_v8 = vor.u32 %v1391_v21, %v1387_v7  ;;  %v1307_v20 = vsel %vm4337_vm13, %v1305_v44, %v1306_v49 }
  0xbc   : > { %v1402_v5 = vrot.slane %v1400_v54, 4  ;;  %v1413_v25 = vshrl.u32 %v4711_v53, 16  ;;  %v3292_v28 = vcombine.low %v1304_v15, %v1307_v20  ;;  %v1405_v31 = vrot.slane %v1403_v2, 5 }
  0xbd   : > { %v1388_v10 = vsel %vm4327_vm12, %v1383_v35, %v1387_v7  ;;  %v1411_v12 = vrot.slane %v1409_v0, 5  ;;  %v1393_v52 = vrot.slane %v1392_v8, 4  ;;  %v1419_v44 = vshll.u32 %v4713_v39, 16  ;;  %v4743_v8 = vld [vmem:[#allocation2 + $0x30] sm:$0xf] }
  0xbe   : > { %v1415_v37 = vrot.slane %v1413_v25, 4  ;;  %v1611_v6 = vrot.slane %v4713_v39, 5  ;;  %v1406_v21 = vor.u32 %v1405_v31, %v1402_v5  ;;  %v1104_v7 = vshll.u32 %v4385_v34, 16 }
  0xbf   : > { %v1110_v49 = vrot.slane %v1108_v47, 4  ;;  %v1114_v54 = vshll.u32 %v1063_v43, 16  ;;  %v1398_v35 = vsel %vm4327_vm12, %v1393_v52, %v1397_v45  ;;  %v1421_v2 = vrot.slane %v1419_v44, 5  ;;  %v4749_v47 = vld [vmem:[%s5210_s1 + $0x210] sm:$0xff]   ;;  %v4761_v44 = vld [vmem:[#allocation2 + $0x38] sm:$0x1] }
  0xc0   : > { %v1416_v15 = vor.u32 %v1415_v37, %v1411_v12  ;;  %v3300_v0 = vcombine.low %v4704_v1, %v4711_v53  ;;  %v3307_v20 = vcombine.low %v1388_v10, %v1398_v35  ;;  %v1407_v5 = vrot.slane %v1406_v21, 4  ;;  %v4754_v10 = vld [vmem:[#allocation2 + $0x34] sm:$0xf] }
  0xc1   : > { %v1106_v25 = vrot.slane %v1104_v7, 5  ;;  %v1116_v34 = vrot.slane %v1114_v54, 5  ;;  %v1310_v45 = vrot.slane %v4428_v14, 5  ;;  %v1313_v31 = vrot.slane %v4732_v46, 5 }
  0xc2   : > { %2770 = vmatmul.mubr.bf16.vlgmr.msra.gmra.mrb[32].mxu0 %v3283_v27  ;;  %v1417_v43 = vrot.slane %v1416_v15, 4  ;;  %v3237_v27 = vrot.slane %v1264_v51, 9  ;;  %2866 = vmatprep.mubr.bf16.mxu1 %v3307_v20  ;;  %v1424_v21 = vshrl.u32 %v4743_v8, 16  ;;  %v1427_v35 = vshll.u32 %v4743_v8, 16 }
  0xc3   : > { %3744 = vmatpush3.bf16.msra.mxu0 %v4622_v58  ;;  %2777 = vmatprep.mubr.bf16.mxu0 %v3292_v28  ;;  %v1412_v28 = vsel %vm4327_vm12, %v1407_v5, %v1411_v12  ;;  %v1107_v52 = vsel %vm4327_vm12, %v4675_v55, %v1106_v25  ;;  %v1111_v37 = vor.u32 %v1110_v49, %v1106_v25  ;;  %v1312_v54 = vrot.slane %v1310_v45, 4 }
  0xc4   : > { %3745 = vmatprep.subr.bf16.mxu0 %v4730_v3  ;;  %2867 = vmatmul.mubr.bf16.vlgmr.msra.gmra.mrb[32].mxu1 %v3299_v38  ;;  %v1422_v51 = vsel %vm4327_vm12, %v1417_v43, %v1421_v2  ;;  %v1311_v7 = vsel %vm4337_vm13, %v3237_v27, %v1310_v45  ;;  %v1426_v55 = vrot.slane %v1424_v21, 4  ;;  %v1433_v49 = vshll.u32 %v4754_v10, 16 }
  0xc5   : > { %3783 = vmatpush3.bf16.msra.mxu1 %v4622_v58  ;;  %v3308_v12 = vcombine.low %v1412_v28, %v1422_v51  ;;  %v1112_v15 = vrot.slane %v1111_v37, 4  ;;  %v1314_v38 = vsel %vm4337_vm13, %v1312_v54, %v1313_v31  ;;  %v1429_v2 = vrot.slane %v1427_v35, 5  ;;  %v4781_v58 = vld [vmem:[%s5210_s1 + $0x218] sm:$0xff]   ;;  %v1265_v28 = vld [vmem:[#allocation2 + $0x30] sm:$0xe] }
  0xc6   : > { %3776 = vmatprep.subr.bf16.mxu1 %v4730_v3  ;;  %v1437_v20 = vshrl.u32 %v4754_v10, 16  ;;  %v1443_v5 = vshll.u32 %v4761_v44, 16  ;;  %v3293_v43 = vcombine.low %v1311_v7, %v1314_v38  ;;  %v1435_v27 = vrot.slane %v1433_v49, 5  ;;  %v4790_v31 = vld [vmem:[#allocation2 + $0x38] sm:$0x1] }
  0xc7   : > { %3746 = vmatpush3.bf16.msra.mxu0 %v4730_v3  ;;  %2874 = vmatprep.mubr.bf16.mxu1 %v3308_v12  ;;  %v1117_v25 = vsel %vm4327_vm12, %v1112_v15, %v1116_v34  ;;  %v4788_v45 = vrot.slane %v1125_v29, 4  ;;  %v1430_v21 = vor.u32 %v1429_v2, %v1426_v55  ;;  %v4792_v35 = vld [vmem:[#allocation2 + $0x3c] sm:$0xf]  ;;  %v1128_v34 = vshll.u32 %v4428_v14, 16  ;;  %v4807_v14 = vld [vmem:[%s5210_s1 + $0x220] sm:$0xff]  }
  0xc8   : > { %3747 = vmatprep.subr.bf16.mxu0 %v4749_v47  ;;  %v3284_v37 = vcombine.low %v1107_v52, %v1117_v25  ;;  %v1439_v51 = vrot.slane %v1437_v20, 4  ;;  %v1445_v54 = vrot.slane %v1443_v5, 5  ;;  %v1134_v7 = vrot.slane %v1132_v30, 4  ;;  %v4810_v55 = vld [vmem:[#allocation2 + $0x40] sm:$0xf] }
  0xc9   : > { %3784 = vmatpush3.bf16.msra.mxu1 %v4730_v3  ;;  %v1138_v32 = vshll.u32 %v4732_v46, 16  ;;  %v3301_v33 = vcombine.low %v4743_v8, %v4754_v10  ;;  %v1431_v29 = vrot.slane %v1430_v21, 4  ;;  %v3238_v12 = vrot.slane %v1265_v28, 9  ;;  %v4825_v28 = vld [vmem:[#allocation2 + $0x44] sm:$0x1] }
  0xca   : > { %2778 = vmatmul.mubr.bf16.gmra.mrb[36].mxu0 %v3284_v37  ;;  %v1440_v52 = vor.u32 %v1439_v51, %v1435_v27  ;;  %3777 = vmatprep.subr.bf16.mxu1 %v4749_v47  ;;  %v1317_v3 = vrot.slane %v4463_v9, 5  ;;  %v1130_v30 = vrot.slane %v1128_v34, 5  ;;  %v1320_v15 = vrot.slane %v4790_v31, 5 }
  0xcb   : > { %3748 = vmatpush3.bf16.msra.mxu0 %v4749_v47  ;;  %2785 = vmatprep.mubr.bf16.mxu0 %v3293_v43  ;;  %v1140_v46 = vrot.slane %v1138_v32, 5  ;;  %v1448_v49 = vshrl.u32 %v4792_v35, 16  ;;  %v1436_v38 = vsel %vm4327_vm12, %v1431_v29, %v1435_v27  ;;  %v1451_v1 = vshll.u32 %v4792_v35, 16  ;;  %v3923_v32 = vld [vmem:[%s5210_s1 + $0x228] sm:$0xff]  }
  0xcc   : > { %3749 = vmatprep.subr.bf16.mxu0 %v4781_v58  ;;  %2875 = vmatmul.mubr.bf16.gmra.mrb[36].mxu1 %v3300_v0  ;;  %v1441_v2 = vrot.slane %v1440_v52, 4  ;;  %v1318_v20 = vsel %vm4337_vm13, %v3238_v12, %v1317_v3  ;;  %v1319_v5 = vrot.slane %v1317_v3, 4  ;;  %v1131_v25 = vsel %vm4327_vm12, %v4788_v45, %v1130_v30  ;;  %v1266_v3 = vld [vmem:[#allocation2 + $0x3c] sm:$0xe] }
  0xcd   : > { %v1135_v43 = vor.u32 %v1134_v7, %v1130_v30  ;;  %3785 = vmatpush3.bf16.msra.mxu1 %v4749_v47  ;;  %v1450_v37 = vrot.slane %v1448_v49, 4  ;;  %v1457_v21 = vshll.u32 %v4810_v55, 16  ;;  %v1461_v45 = vshrl.u32 %v4810_v55, 16 }
  0xce   : > { %v1446_v0 = vsel %vm4327_vm12, %v1441_v2, %v1445_v54  ;;  %v1321_v27 = vsel %vm4337_vm13, %v1319_v5, %v1320_v15  ;;  %3778 = vmatprep.subr.bf16.mxu1 %v4781_v58  ;;  %v1453_v7 = vrot.slane %v1451_v1, 5  ;;  %v1467_v52 = vshll.u32 %v4825_v28, 16  ;;  %v4850_v2 = vld [vmem:[#allocation2 + $0x44] sm:$0x1] }
  0xcf   : > { %3750 = vmatpush3.bf16.msra.mxu0 %v4781_v58  ;;  %v3309_v47 = vcombine.low %v1436_v38, %v1446_v0  ;;  %v1136_v51 = vrot.slane %v1135_v43, 4  ;;  %v3294_v34 = vcombine.low %v1318_v20, %v1321_v27  ;;  %v1459_v54 = vrot.slane %v1457_v21, 5  ;;  %v4867_v0 = vld [vmem:[#allocation2 + $0x4c] sm:$0xf] }
  0xd0   : > { %3751 = vmatprep.subr.bf16.mxu0 %v4807_v14  ;;  %v1463_v29 = vrot.slane %v1461_v45, 4  ;;  %v1150_v12 = vrot.slane %v1149_v59, 4  ;;  %v1454_v15 = vor.u32 %v1453_v7, %v1450_v37  ;;  %v1152_v49 = vshll.u32 %v4463_v9, 16  ;;  %v4873_v45 = vld [vmem:[#allocation2 + $0x50] sm:$0x1] }
  0xd1   : > { %2882 = vmatprep.mubr.bf16.mxu1 %v3309_v47  ;;  %v1141_v30 = vsel %vm4327_vm12, %v1136_v51, %v1140_v46  ;;  %v1158_v38 = vrot.slane %v1156_v16, 4  ;;  %3786 = vmatpush3.bf16.msra.mxu1 %v4781_v58  ;;  %v1469_v43 = vrot.slane %v1467_v52, 5  ;;  %v1162_v19 = vshll.u32 %v4790_v31, 16  ;;  %v3925_v58 = vld [vmem:[%s5210_s1 + $0x230] sm:$0xff]  }
  0xd2   : > { %v3285_v20 = vcombine.low %v1131_v25, %v1141_v30  ;;  %v1464_v5 = vor.u32 %v1463_v29, %v1459_v54  ;;  %3779 = vmatprep.subr.bf16.mxu1 %v4807_v14  ;;  %v1455_v59 = vrot.slane %v1454_v15, 4  ;;  %v1154_v46 = vrot.slane %v1152_v49, 5 }
  0xd3   : > { %3752 = vmatpush3.bf16.msra.mxu0 %v4807_v14  ;;  %v3302_v9 = vcombine.low %v4792_v35, %v4810_v55  ;;  %v3239_v16 = vrot.slane %v1266_v3, 9  ;;  %v1164_v25 = vrot.slane %v1162_v19, 5  ;;  %v1324_v37 = vrot.slane %v4505_v62, 5 }
  0xd4   : > { %3753 = vmatprep.subr.bf16.mxu0 %v3923_v32  ;;  %2786 = vmatmul.mubr.bf16.gmra.mrb[40].mxu0 %v3285_v20  ;;  %v1465_v31 = vrot.slane %v1464_v5, 4  ;;  %v1327_v1 = vrot.slane %v4850_v2, 5  ;;  %v1460_v35 = vsel %vm4327_vm12, %v1455_v59, %v1459_v54  ;;  %v1155_v27 = vsel %vm4327_vm12, %v1150_v12, %v1154_v46 }
  0xd5   : > { %2883 = vmatmul.mubr.bf16.gmra.mrb[40].mxu1 %v3301_v33  ;;  %2793 = vmatprep.mubr.bf16.mxu0 %v3294_v34  ;;  %v1159_v21 = vor.u32 %v1158_v38, %v1154_v46  ;;  %v1472_v8 = vshrl.u32 %v4853_v24, 16  ;;  %v1325_v47 = vsel %vm4337_vm13, %v3239_v16, %v1324_v37  ;;  %v1326_v51 = vrot.slane %v1324_v37, 4  ;;  %v4897_v37 = vld [vmem:[#allocation2 + $0x54] sm:$0xf] }
  0xd6   : > { %3787 = vmatpush3.bf16.msra.mxu1 %v4807_v14  ;;  %v1470_v33 = vsel %vm4327_vm12, %v1465_v31, %v1469_v43  ;;  %v1475_v34 = vshll.u32 %v4853_v24, 16  ;;  %v1481_v52 = vshll.u32 %v4867_v0, 16  ;;  %v3927_v14 = vld [vmem:[%s5210_s1 + $0x238] sm:$0xff]   ;;  %v1485_v30 = vshrl.u32 %v4867_v0, 16  ;;  %v1267_v43 = vld [vmem:[#allocation2 + $0x48] sm:$0xe] }
  0xd7   : > { %3780 = vmatprep.subr.bf16.mxu1 %v3923_v32  ;;  %3754 = vmatpush3.bf16.msra.mxu0 %v3923_v32  ;;  %v3310_v7 = vcombine.low %v1460_v35, %v1470_v33  ;;  %v1160_v54 = vrot.slane %v1159_v21, 4  ;;  %v1474_v29 = vrot.slane %v1472_v8, 4  ;;  %v1328_v12 = vsel %vm4337_vm13, %v1326_v51, %v1327_v1  ;;  %v4895_v31 = vld [vmem:[#allocation2 + $0x50] sm:$0x1] }
  0xd8   : > { %3755 = vmatprep.subr.bf16.mxu0 %v3925_v58  ;;  %v1477_v3 = vrot.slane %v1475_v34, 5  ;;  %v1491_v15 = vshll.u32 %v4873_v45, 16  ;;  %v3295_v38 = vcombine.low %v1325_v47, %v1328_v12  ;;  %v1483_v20 = vrot.slane %v1481_v52, 5 }
  0xd9   : > { %2890 = vmatprep.mubr.bf16.mxu1 %v3310_v7  ;;  %v1165_v49 = vsel %vm4327_vm12, %v1160_v54, %v1164_v25  ;;  %v1174_v5 = vrot.slane %v1173_v60, 4  ;;  %v1487_v46 = vrot.slane %v1485_v30, 4  ;;  %v1176_v25 = vshll.u32 %v4505_v62, 16 }
  0xda   : > { %3788 = vmatpush3.bf16.msra.mxu1 %v3923_v32  ;;  %v3286_v19 = vcombine.low %v1155_v27, %v1165_v49  ;;  %v1478_v59 = vor.u32 %v1477_v3, %v1474_v29  ;;  %v1493_v16 = vrot.slane %v1491_v15, 5  ;;  %v5225_v1 = vshrl.u32 %v4505_v62, 16  ;;  %v4907_v62 = vld [vmem:[#allocation2 + $0x58] sm:$0xf]  ;;  %v4916_v29 = vld [vmem:[#allocation2 + $0x5c] sm:$0x1] }
  0xdb   : > { %3781 = vmatprep.subr.bf16.mxu1 %v3925_v58  ;;  %3756 = vmatpush3.bf16.msra.mxu0 %v3925_v58  ;;  %v1186_v17 = vshll.u32 %v4850_v2, 16  ;;  %v3303_v18 = vcombine.low %v4853_v24, %v4867_v0  ;;  %v1488_v32 = vor.u32 %v1487_v46, %v1483_v20  ;;  %v3240_v27 = vrot.slane %v1267_v43, 9 }
  0xdc   : > { %v1182_v35 = vrot.slane %v5225_v1, 4  ;;  %3757 = vmatprep.subr.bf16.mxu0 %v3927_v14  ;;  %2794 = vmatmul.mubr.bf16.gmra.mrb[44].mxu0 %v3286_v19  ;;  %v1479_v60 = vrot.slane %v1478_v59, 4  ;;  %v1331_v21 = vrot.slane %v4550_v63, 5  ;;  %v1178_v8 = vrot.slane %v1176_v25, 5 }
  0xdd   : > { %2891 = vmatmul.mubr.bf16.gmra.mrb[44].mxu1 %v3302_v9  ;;  %2801 = vmatprep.mubr.bf16.mxu0 %v3295_v38  ;;  %v1188_v33 = vrot.slane %v1186_v17, 5  ;;  %v1334_v47 = vrot.slane %v4895_v31, 5  ;;  %v1496_v2 = vshrl.u32 %v4897_v37, 16  ;;  %v1489_v51 = vrot.slane %v1488_v32, 4  ;;  %v1268_v32 = vld [vmem:[#allocation2 + $0x54] sm:$0xe] }
  0xde   : > { %3789 = vmatpush3.bf16.msra.mxu1 %v3925_v58  ;;  %v1484_v24 = vsel %vm4327_vm12, %v1479_v60, %v1483_v20  ;;  %v1332_v9 = vsel %vm4337_vm13, %v3240_v27, %v1331_v21  ;;  %v1333_v34 = vrot.slane %v1331_v21, 4  ;;  %v1179_v7 = vsel %vm4327_vm12, %v1174_v5, %v1178_v8  ;;  %v1068_v60 = vld [vmem:[#allocation2 + $0x5c] sm:$0x1] }
  0xdf   : > { %3782 = vmatprep.subr.bf16.mxu1 %v3927_v14  ;;  %3758 = vmatpush3.bf16.msra.mxu0 %v3927_v14  ;;  %v1183_v54 = vor.u32 %v1182_v35, %v1178_v8  ;;  %v1498_v52 = vrot.slane %v1496_v2, 4  ;;  %v1499_v12 = vshll.u32 %v4897_v37, 16  ;;  %v1494_v58 = vsel %vm4327_vm12, %v1489_v51, %v1493_v16 }
  0xe0   : > { %v1335_v3 = vsel %vm4337_vm13, %v1333_v34, %v1334_v47  ;;  %v1505_v30 = vshll.u32 %v4907_v62, 16  ;;  %v1509_v15 = vshrl.u32 %v4907_v62, 16  ;;  %v3311_v49 = vcombine.low %v1484_v24, %v1494_v58 }
  0xe1   : > { %v1184_v38 = vrot.slane %v1183_v54, 4  ;;  %v3296_v20 = vcombine.low %v1332_v9, %v1335_v3  ;;  %v1501_v5 = vrot.slane %v1499_v12, 5  ;;  %v1515_v59 = vshll.u32 %v4916_v29, 16 }
  0xe2   : > { %3790 = vmatpush3.bf16.msra.mxu1 %v3927_v14  ;;  %v1507_v43 = vrot.slane %v1505_v30, 5  ;;  %v1511_v19 = vrot.slane %v1509_v15, 4  ;;  %v1639_v46 = vrot.slane %v4916_v29, 5  ;;  %2898 = vmatprep.mubr.bf16.mxu1 %v3311_v49  ;;  %v5226_v1 = vor.u32 %v4559_v23, %v4557_v22  ;;  %v4938_v22 = vld [vmem:[#allocation2 + $0x60] sm:$0xf] }
  0xe3   : > { %v1189_v16 = vsel %vm4327_vm12, %v1184_v38, %v1188_v33  ;;  %v1502_v25 = vor.u32 %v1501_v5, %v1498_v52  ;;  %v1200_v17 = vshll.u32 %v4550_v63, 16  ;;  %v1517_v21 = vrot.slane %v1515_v59, 5 }
  0xe4   : > { %v1198_v35 = vrot.slane %v5226_v1, 4  ;;  %v3287_v14 = vcombine.low %v1179_v7, %v1189_v16  ;;  %v1512_v27 = vor.u32 %v1511_v19, %v1507_v43  ;;  %v5227_v8 = vshrl.u32 %v4550_v63, 16  ;;  %v4941_v7 = vld [vmem:[#allocation2 + $0x64] sm:$0xf] }
  0xe5   : > { %2899 = vmatmul.mubr.bf16.gmra.mrb[48].mxu1 %v3303_v18  ;;  %v1503_v2 = vrot.slane %v1502_v25, 4  ;;  %v1202_v24 = vrot.slane %v1200_v17, 5  ;;  %v1210_v33 = vshll.u32 %v4895_v31, 16  ;;  %v3304_v51 = vcombine.low %v4897_v37, %v4907_v62  ;;  %v4947_v37 = vld [vmem:[#allocation2 + $0x68] sm:$0x1] }
  0xe6   : > { %v1206_v47 = vrot.slane %v5227_v8, 4  ;;  %2802 = vmatmul.mubr.bf16.gmra.mrb[48].mxu0 %v3287_v14  ;;  %v1513_v23 = vrot.slane %v1512_v27, 4  ;;  %v3241_v9 = vrot.slane %v1268_v32, 9  ;;  %v1338_v34 = vrot.slane %v4594_v56, 5  ;;  %v1269_v17 = vld [vmem:[#allocation2 + $0x60] sm:$0xe] }
  0xe7   : > { %v1341_v18 = vrot.slane %v1068_v60, 5  ;;  %2809 = vmatprep.mubr.bf16.mxu0 %v3296_v20  ;;  %v1508_v63 = vsel %vm4327_vm12, %v1503_v2, %v1507_v43  ;;  %v1203_v31 = vsel %vm4327_vm12, %v1198_v35, %v1202_v24  ;;  %v1212_v52 = vrot.slane %v1210_v33, 5  ;;  %v1069_v8 = vld [vmem:[#allocation2 + $0x68] sm:$0x1] }
  0xe8   : > { %v1207_v54 = vor.u32 %v1206_v47, %v1202_v24  ;;  %v1518_v12 = vsel %vm4327_vm12, %v1513_v23, %v1517_v21  ;;  %v1339_v58 = vsel %vm4337_vm13, %v3241_v9, %v1338_v34  ;;  %v1340_v3 = vrot.slane %v1338_v34, 4  ;;  %v4968_v9 = vld [vmem:[#allocation2 + $0x6c] sm:$0xf] }
  0xe9   : > { %v1520_v30 = vshrl.u32 %v4938_v22, 16  ;;  %v3312_v15 = vcombine.low %v1508_v63, %v1518_v12  ;;  %v1523_v38 = vshll.u32 %v4938_v22, 16  ;;  %v1529_v20 = vshll.u32 %v4941_v7, 16 }
  0xea   : > { %v1208_v49 = vrot.slane %v1207_v54, 4  ;;  %v1342_v5 = vsel %vm4337_vm13, %v1340_v3, %v1341_v18  ;;  %v1533_v19 = vshrl.u32 %v4941_v7, 16  ;;  %v1539_v59 = vshll.u32 %v4947_v37, 16  ;;  %v4973_v54 = vld [vmem:[#allocation2 + $0x70] sm:$0xf] }
  0xeb   : > { %v1522_v43 = vrot.slane %v1520_v30, 4  ;;  %2906 = vmatprep.mubr.bf16.mxu1 %v3312_v15  ;;  %v3297_v25 = vcombine.low %v1339_v58, %v1342_v5  ;;  %v1525_v1 = vrot.slane %v1523_v38, 5  ;;  %v1531_v35 = vrot.slane %v1529_v20, 5  ;;  %v4982_v30 = vld [vmem:[#allocation2 + $0x74] sm:$0x1] }
  0xec   : > { %v1213_v16 = vsel %vm4327_vm12, %v1208_v49, %v1212_v52  ;;  %v1535_v14 = vrot.slane %v1533_v19, 4  ;;  %v1541_v27 = vrot.slane %v1539_v59, 5  ;;  %v1222_v21 = vrot.slane %v1221_v13, 4 }
  0xed   : > { %v3288_v32 = vcombine.low %v1203_v31, %v1213_v16  ;;  %2907 = vmatmul.mubr.bf16.gmra.mrb[52].mxu1 %v3304_v51  ;;  %v1526_v47 = vor.u32 %v1525_v1, %v1522_v43  ;;  %v1224_v2 = vshll.u32 %v4594_v56, 16  ;;  %v5228_v24 = vshrl.u32 %v4594_v56, 16 }
  0xee   : > { %v1234_v23 = vshll.u32 %v1068_v60, 16  ;;  %v1536_v34 = vor.u32 %v1535_v14, %v1531_v35  ;;  %v3305_v51 = vcombine.low %v4938_v22, %v4941_v7  ;;  %v3242_v18 = vrot.slane %v1269_v17, 9 }
  0xef   : > { %v1230_v33 = vrot.slane %v5228_v24, 4  ;;  %2810 = vmatmul.mubr.bf16.gmra.mrb[52].mxu0 %v3288_v32  ;;  %v1345_v63 = vrot.slane %v4651_v50, 5  ;;  %v1527_v36 = vrot.slane %v1526_v47, 4  ;;  %v1226_v42 = vrot.slane %v1224_v2, 5  ;;  %v1567_v32 = vld [vmem:[#allocation2 + $0x18] sm:$0xe] }
  0xf0   : > { %2817 = vmatprep.mubr.bf16.mxu0 %v3297_v25  ;;  %v1236_v13 = vrot.slane %v1234_v23, 5  ;;  %v1348_v31 = vrot.slane %v1069_v8, 5  ;;  %v1537_v56 = vrot.slane %v1536_v34, 4  ;;  %v1544_v12 = vshrl.u32 %v4968_v9, 16  ;;  %v1571_v34 = vld [vmem:[#allocation2 + $0x48] sm:$0xe] }
  0xf1   : > { %v1346_v60 = vsel %vm4337_vm13, %v3242_v18, %v1345_v63  ;;  %v1347_v52 = vrot.slane %v1345_v63, 4  ;;  %v1532_v22 = vsel %vm4327_vm12, %v1527_v36, %v1531_v35  ;;  %v1227_v58 = vsel %vm4327_vm12, %v1222_v21, %v1226_v42 }
  0xf2   : > { %v1231_v3 = vor.u32 %v1230_v33, %v1226_v42  ;;  %v1547_v15 = vshll.u32 %v4968_v9, 16  ;;  %v1542_v49 = vsel %vm4327_vm12, %v1537_v56, %v1541_v27  ;;  %v1546_v20 = vrot.slane %v1544_v12, 4 }
  0xf3   : > { %v1349_v38 = vsel %vm4337_vm13, %v1347_v52, %v1348_v31  ;;  %v1553_v5 = vshll.u32 %v4973_v54, 16  ;;  %v3313_v43 = vcombine.low %v1532_v22, %v1542_v49  ;;  %v1557_v1 = vshrl.u32 %v4973_v54, 16 }
  0xf4   : > { %v1232_v19 = vrot.slane %v1231_v3, 4  ;;  %v3298_v59 = vcombine.low %v1346_v60, %v1349_v38  ;;  %v1549_v16 = vrot.slane %v1547_v15, 5  ;;  %v1563_v35 = vshll.u32 %v4982_v30, 16 }
  0xf5   : > { %v1555_v25 = vrot.slane %v1553_v5, 5  ;;  %v1246_v17 = vrot.slane %v1245_v26, 4  ;;  %2914 = vmatprep.mubr.bf16.mxu1 %v3313_v43  ;;  %v1248_v21 = vshll.u32 %v4651_v50, 16  ;;  %v1254_v47 = vrot.slane %v1252_v41, 4  ;;  %v1568_v41 = vld [vmem:[#allocation2 + $0x24] sm:$0xe] }
  0xf6   : > { %v1237_v14 = vsel %vm4327_vm12, %v1232_v19, %v1236_v13  ;;  %v1550_v27 = vor.u32 %v1549_v16, %v1546_v20  ;;  %2915 = vmatmul.mubr.bf16.gmra.mrb[56].mxu1 %v3305_v51  ;;  %v1559_v24 = vrot.slane %v1557_v1, 4  ;;  %v1565_v33 = vrot.slane %v1563_v35, 5  ;;  %v1569_v20 = vld [vmem:[#allocation2 + $0x30] sm:$0xe]  ;;  %v1573_v43 = vld [vmem:[#allocation2 + $0x60] sm:$0xe] }
  0xf7   : > { %v3289_v2 = vcombine.low %v1227_v58, %v1237_v14  ;;  %v1258_v23 = vshll.u32 %v1069_v8, 16  ;;  %v1250_v11 = vrot.slane %v1248_v21, 5  ;;  %v3306_v40 = vcombine.low %v4968_v9, %v4973_v54  ;;  %v1572_v58 = vld [vmem:[#allocation2 + $0x54] sm:$0xe] }
  0xf8   : > { %v1551_v18 = vrot.slane %v1550_v27, 4  ;;  %v3243_v26 = vrot.slane %v1567_v32, 9  ;;  %v1560_v63 = vor.u32 %v1559_v24, %v1555_v25  ;;  %v1601_v42 = vrot.slane %v4683_v57, 5 }
  0xf9   : > { %2818 = vmatmul.mubr.bf16.gmra.mrb[56].mxu0 %v3289_v2  ;;  %v1260_v36 = vrot.slane %v1258_v23, 5  ;;  %v1604_v50 = vrot.slane %v4685_v48, 5  ;;  %v1251_v8 = vsel %vm4327_vm12, %v1246_v17, %v1250_v11  ;;  %v1255_v13 = vor.u32 %v1254_v47, %v1250_v11  ;;  %v1570_v47 = vld [vmem:[#allocation2 + $0x3c] sm:$0xe]  ;;  %v1574_v23 = vld [vmem:[#allocation2 + $0x6c] sm:$0xe] }
  0xfa   : > { %2825 = vmatprep.mubr.bf16.mxu0 %v3298_v59  ;;  %v1556_v51 = vsel %vm4327_vm12, %v1551_v18, %v1555_v25  ;;  %v3247_v31 = vrot.slane %v1571_v34, 9  ;;  %v1561_v56 = vrot.slane %v1560_v63, 4  ;;  %v1602_v9 = vsel %vm4337_vm13, %v3243_v26, %v1601_v42 }
  0xfb   : > { %v1603_v60 = vrot.slane %v1601_v42, 4  ;;  %v1629_v52 = vrot.slane %v4867_v0, 5  ;;  %v1256_v57 = vrot.slane %v1255_v13, 4  ;;  %v1632_v48 = vrot.slane %v4873_v45, 5 }
  0xfc   : > { %v3244_v12 = vrot.slane %v1568_v41, 9  ;;  %v1608_v22 = vrot.slane %v4711_v53, 5  ;;  %v1566_v3 = vsel %vm4327_vm12, %v1561_v56, %v1565_v33  ;;  %v3248_v25 = vrot.slane %v1572_v58, 9 }
  0xfd   : > { %v1605_v15 = vsel %vm4337_vm13, %v1603_v60, %v1604_v50  ;;  %v1630_v49 = vsel %vm4337_vm13, %v3247_v31, %v1629_v52  ;;  %v1631_v38 = vrot.slane %v1629_v52, 4  ;;  %v3314_v5 = vcombine.low %v1556_v51, %v1566_v3 }
  0xfe   : > { %v1261_v0 = vsel %vm4327_vm12, %v1256_v57, %v1260_v36  ;;  %v3315_v45 = vcombine.low %v1602_v9, %v1605_v15  ;;  %v1609_v53 = vsel %vm4337_vm13, %v3244_v12, %v1608_v22  ;;  %v1610_v16 = vrot.slane %v1608_v22, 4 }
  0xff   : > { %v3290_v19 = vcombine.low %v1251_v8, %v1261_v0  ;;  %v1633_v59 = vsel %vm4337_vm13, %v1631_v38, %v1632_v48  ;;  %2922 = vmatprep.mubr.bf16.mxu1 %v3314_v5  ;;  %v1636_v35 = vrot.slane %v4907_v62, 5  ;;  %v3245_v17 = vrot.slane %v1569_v20, 9 }
 0x100   : > { %v3319_v1 = vcombine.low %v1630_v49, %v1633_v59  ;;  %v1615_v32 = vrot.slane %v4754_v10, 5  ;;  %2923 = vmatmul.mubr.bf16.gmra.mrb[60].mxu1 %v3306_v40  ;;  %v1612_v61 = vsel %vm4337_vm13, %v1610_v16, %v1611_v6  ;;  %v1618_v14 = vrot.slane %v4761_v44, 5 }
 0x101   : > { %2826 = vmatmul.mubr.bf16.gmra.mrb[60].mxu0 %v3290_v19  ;;  %v3249_v27 = vrot.slane %v1573_v43, 9  ;;  %v1643_v21 = vrot.slane %v4941_v7, 5  ;;  %v3316_v2 = vcombine.low %v1609_v53, %v1612_v61  ;;  %v1637_v62 = vsel %vm4337_vm13, %v3248_v25, %v1636_v35 }
 0x102   : > { %3759 = vmatprep.mubr.bf16.mxu0 %v3315_v45  ;;  %3767 = vmatprep.mubr.bf16.mxu1 %v3319_v1  ;;  %v1638_v10 = vrot.slane %v1636_v35, 4  ;;  %v1616_v24 = vsel %vm4337_vm13, %v3245_v17, %v1615_v32  ;;  %v1617_v39 = vrot.slane %v1615_v32, 4  ;;  %v1646_v44 = vrot.slane %v4947_v37, 5 }
 0x103   : > { %v1644_v6 = vsel %vm4337_vm13, %v3249_v27, %v1643_v21  ;;  %v1645_v33 = vrot.slane %v1643_v21, 4  ;;  %v3246_v34 = vrot.slane %v1570_v47, 9  ;;  %v1622_v18 = vrot.slane %v4810_v55, 5 }
 0x104   : > { %v1640_v7 = vsel %vm4337_vm13, %v1638_v10, %v1639_v46  ;;  %v1619_v40 = vsel %vm4337_vm13, %v1617_v39, %v1618_v14  ;;  %v1625_v63 = vrot.slane %v4825_v28, 5  ;;  %v3250_v50 = vrot.slane %v1574_v23, 9 }
 0x105   : > { %v3320_v11 = vcombine.low %v1637_v62, %v1640_v7  ;;  %v1647_v26 = vsel %vm4337_vm13, %v1645_v33, %v1646_v44  ;;  %v3317_v36 = vcombine.low %v1616_v24, %v1619_v40  ;;  %v1624_v42 = vrot.slane %v1622_v18, 4 }
 0x106   : > { %v3321_v37 = vcombine.low %v1644_v6, %v1647_v26  ;;  %v1650_v29 = vrot.slane %v4973_v54, 5  ;;  %v1653_v46 = vrot.slane %v4982_v30, 5  ;;  %v1623_v41 = vsel %vm4337_vm13, %v3246_v34, %v1622_v18 }
 0x107   : > { %v1626_v51 = vsel %vm4337_vm13, %v1624_v42, %v1625_v63 }
 0x108   : > { %3768 = vmatmul.mubr.bf16.vlgmr.msra.gmra.mrb[64].mxu1 %v3320_v11  ;;  %v1652_v55 = vrot.slane %v1650_v29, 4  ;;  %v1651_v28 = vsel %vm4337_vm13, %v3250_v50, %v1650_v29  ;;  %v3318_v54 = vcombine.low %v1623_v41, %v1626_v51 }
 0x109   : > { %3760 = vmatmul.mubr.bf16.vlgmr.msra.gmra.mrb[64].mxu0 %v3316_v2  ;;  %3771 = vmatprep.mubr.bf16.mxu1 %v3321_v37 }
 0x10a   : > { %3763 = vmatprep.mubr.bf16.mxu0 %v3317_v36  ;;  %v1654_v8 = vsel %vm4337_vm13, %v1652_v55, %v1653_v46 }
 0x10b   : > { %v3322_v13 = vcombine.low %v1651_v28, %v1654_v8 }
 0x110   : > { %3772 = vmatmul.mubr.bf16.gmra.mrb[68].mxu1 %v3322_v13 }
 0x111   : > { %3764 = vmatmul.mubr.bf16.gmra.mrb[68].mxu0 %v3318_v54 }
 0x155   : > { %v3487_v30 = vpop.f32.mrb[0].mxu0 }
 0x156   : > { %v3551_v31 = vpop.f32.mrb[0].mxu1  ;;  %v3488_v56 = vpop.f32.mrb[1].mxu0 }
 0x157   : > { %v3489_v9 = vadd.f32 %v3488_v56, %v3487_v30  ;;  %v3552_v60 = vpop.f32.mrb[1].mxu1  ;;  %v3490_v52 = vpop.f32.mrb[2].mxu0 }
 0x158   : > { %v3553_v57 = vadd.f32 %v3552_v60, %v3551_v31  ;;  %v3554_v48 = vpop.f32.mrb[2].mxu1  ;;  %v3491_v12 = vpop.f32.mrb[3].mxu0 }
 0x159   : > { %v3492_v22 = vadd.f32 %v3491_v12, %v3490_v52  ;;  %v3555_v58 = vpop.f32.mrb[3].mxu1 }
 0x15a   : > { %v5060_v3 = vadd.f32 %v3553_v57, %v3489_v9  ;;  %v3556_v15 = vadd.f32 %v3555_v58, %v3554_v48 }
 0x15c   : > { %v5062_v4 = vadd.f32 %v3556_v15, %v3492_v22 }
 0x15d   : > { %v3493_v49 = vpop.f32.mrb[4].mxu0 }
 0x15e   : > { %v3557_v38 = vpop.f32.mrb[4].mxu1  ;;  %v3494_v20 = vpop.f32.mrb[5].mxu0 }
 0x15f   : > { %v3558_v5 = vpop.f32.mrb[5].mxu1  ;;  %v3495_v0 = vadd.f32 %v3494_v20, %v3493_v49  ;;  %v3496_v53 = vpop.f32.mrb[6].mxu0 }
 0x160   : > { %v3559_v45 = vadd.f32 %v3558_v5, %v3557_v38  ;;  %v3560_v43 = vpop.f32.mrb[6].mxu1  ;;  %v3497_v19 = vpop.f32.mrb[7].mxu0 }
 0x161   : > { %v3561_v59 = vpop.f32.mrb[7].mxu1  ;;  %v3498_v25 = vadd.f32 %v3497_v19, %v3496_v53 }
 0x162   : > { %v5064_v16 = vadd.f32 %v3559_v45, %v3495_v0  ;;  %v3562_v1 = vadd.f32 %v3561_v59, %v3560_v43 }
 0x164   : > { %v5066_v35 = vadd.f32 %v3562_v1, %v3498_v25 }
 0x165   : > { %v3499_v32 = vpop.f32.mrb[8].mxu0 }
 0x166   : > { %v3563_v17 = vpop.f32.mrb[8].mxu1  ;;  %v3500_v14 = vpop.f32.mrb[9].mxu0 }
 0x167   : > { %v3564_v61 = vpop.f32.mrb[9].mxu1  ;;  %v3501_v47 = vadd.f32 %v3500_v14, %v3499_v32  ;;  %v3502_v2 = vpop.f32.mrb[10].mxu0 }
 0x168   : > { %v3565_v27 = vadd.f32 %v3564_v61, %v3563_v17  ;;  %v3566_v21 = vpop.f32.mrb[10].mxu1  ;;  %v3503_v10 = vpop.f32.mrb[11].mxu0 }
 0x169   : > { %v3567_v62 = vpop.f32.mrb[11].mxu1  ;;  %v3504_v6 = vadd.f32 %v3503_v10, %v3502_v2 }
 0x16a   : > { %v3568_v24 = vadd.f32 %v3567_v62, %v3566_v21  ;;  %v5068_v39 = vadd.f32 %v3565_v27, %v3501_v47 }
 0x16c   : > { %v5070_v33 = vadd.f32 %v3568_v24, %v3504_v6 }
 0x16d   : > { %v3505_v44 = vpop.f32.mrb[12].mxu0 }
 0x16e   : > { %v3569_v23 = vpop.f32.mrb[12].mxu1  ;;  %v3506_v7 = vpop.f32.mrb[13].mxu0 }
 0x16f   : > { %v3570_v34 = vpop.f32.mrb[13].mxu1  ;;  %v3507_v18 = vadd.f32 %v3506_v7, %v3505_v44  ;;  %v3508_v40 = vpop.f32.mrb[14].mxu0 }
 0x170   : > { %v3571_v11 = vadd.f32 %v3570_v34, %v3569_v23  ;;  %v3572_v26 = vpop.f32.mrb[14].mxu1  ;;  %v3509_v63 = vpop.f32.mrb[15].mxu0 }
 0x171   : > { %v3573_v36 = vpop.f32.mrb[15].mxu1  ;;  %v3510_v42 = vadd.f32 %v3509_v63, %v3508_v40 }
 0x172   : > { %v5072_v37 = vadd.f32 %v3571_v11, %v3507_v18  ;;  %v3574_v50 = vadd.f32 %v3573_v36, %v3572_v26 }
 0x174   : > { %v5074_v29 = vadd.f32 %v3574_v50, %v3510_v42 }
 0x175   : > { %v3511_v46 = vpop.f32.mrb[16].mxu0 }
 0x176   : > { %v3575_v55 = vpop.f32.mrb[16].mxu1  ;;  %v3512_v41 = vpop.f32.mrb[17].mxu0 }
 0x177   : > { %v3576_v51 = vpop.f32.mrb[17].mxu1  ;;  %v3513_v28 = vadd.f32 %v3512_v41, %v3511_v46  ;;  %v3514_v54 = vpop.f32.mrb[18].mxu0 }
 0x178   : > { %v3577_v8 = vadd.f32 %v3576_v51, %v3575_v55  ;;  %v3578_v13 = vpop.f32.mrb[18].mxu1  ;;  %v3515_v30 = vpop.f32.mrb[19].mxu0 }
 0x179   : > { %v3579_v31 = vpop.f32.mrb[19].mxu1  ;;  %v3516_v9 = vadd.f32 %v3515_v30, %v3514_v54 }
 0x17a   : > { %v5076_v56 = vadd.f32 %v3577_v8, %v3513_v28  ;;  %v3580_v60 = vadd.f32 %v3579_v31, %v3578_v13 }
 0x17c   : > { %v5078_v52 = vadd.f32 %v3580_v60, %v3516_v9 }
 0x17d   : > { %v3517_v57 = vpop.f32.mrb[20].mxu0 }
 0x17e   : > { %v3581_v48 = vpop.f32.mrb[20].mxu1  ;;  %v3518_v12 = vpop.f32.mrb[21].mxu0 }
 0x17f   : > { %v3582_v22 = vpop.f32.mrb[21].mxu1  ;;  %v3519_v58 = vadd.f32 %v3518_v12, %v3517_v57  ;;  %v3520_v49 = vpop.f32.mrb[22].mxu0 }
 0x180   : > { %v3583_v15 = vadd.f32 %v3582_v22, %v3581_v48  ;;  %v3584_v38 = vpop.f32.mrb[22].mxu1  ;;  %v3521_v20 = vpop.f32.mrb[23].mxu0 }
 0x181   : > { %v3585_v5 = vpop.f32.mrb[23].mxu1  ;;  %v3522_v45 = vadd.f32 %v3521_v20, %v3520_v49 }
 0x182   : > { %v5080_v0 = vadd.f32 %v3583_v15, %v3519_v58  ;;  %v3586_v53 = vadd.f32 %v3585_v5, %v3584_v38 }
 0x184   : > { %v5082_v43 = vadd.f32 %v3586_v53, %v3522_v45 }
 0x185   : > { %v3523_v19 = vpop.f32.mrb[24].mxu0 }
 0x186   : > { %v3587_v59 = vpop.f32.mrb[24].mxu1  ;;  %v3524_v25 = vpop.f32.mrb[25].mxu0 }
 0x187   : > { %v3588_v1 = vpop.f32.mrb[25].mxu1  ;;  %v3525_v17 = vadd.f32 %v3524_v25, %v3523_v19  ;;  %v3526_v61 = vpop.f32.mrb[26].mxu0 }
 0x188   : > { %v3589_v32 = vadd.f32 %v3588_v1, %v3587_v59  ;;  %v3590_v14 = vpop.f32.mrb[26].mxu1  ;;  %v3527_v27 = vpop.f32.mrb[27].mxu0 }
 0x189   : > { %v3591_v21 = vpop.f32.mrb[27].mxu1  ;;  %v3528_v2 = vadd.f32 %v3527_v27, %v3526_v61 }
 0x18a   : > { %v5084_v47 = vadd.f32 %v3589_v32, %v3525_v17  ;;  %v3592_v62 = vadd.f32 %v3591_v21, %v3590_v14 }
 0x18c   : > { %v5086_v10 = vadd.f32 %v3592_v62, %v3528_v2 }
 0x18d   : > { %v3529_v24 = vpop.f32.mrb[28].mxu0 }
 0x18e   : > { %v3593_v6 = vpop.f32.mrb[28].mxu1  ;;  %v3530_v44 = vpop.f32.mrb[29].mxu0 }
 0x18f   : > { %v3594_v23 = vpop.f32.mrb[29].mxu1  ;;  %v3531_v7 = vadd.f32 %v3530_v44, %v3529_v24  ;;  %v3532_v18 = vpop.f32.mrb[30].mxu0 }
 0x190   : > { %v3595_v34 = vadd.f32 %v3594_v23, %v3593_v6  ;;  %v3596_v11 = vpop.f32.mrb[30].mxu1  ;;  %v3533_v40 = vpop.f32.mrb[31].mxu0 }
 0x191   : > { %v3597_v26 = vpop.f32.mrb[31].mxu1  ;;  %v3534_v36 = vadd.f32 %v3533_v40, %v3532_v18 }
 0x192   : > { %v5088_v63 = vadd.f32 %v3595_v34, %v3531_v7  ;;  %v3598_v42 = vadd.f32 %v3597_v26, %v3596_v11 }
 0x194   : > { %v5090_v50 = vadd.f32 %v3598_v42, %v3534_v36 }
 0x195   : > { %v3615_v46 = vpop.f32.mrb[32].mxu0 }
 0x196   : > { %v3616_v55 = vpop.f32.mrb[33].mxu0 }
 0x197   : > { %v3617_v41 = vadd.f32 %v3616_v55, %v3615_v46  ;;  %v3618_v51 = vpop.f32.mrb[34].mxu0  ;;  %v3679_v8 = vpop.f32.mrb[32].mxu1 }
 0x198   : > { %v3619_v28 = vpop.f32.mrb[35].mxu0  ;;  %v3680_v30 = vpop.f32.mrb[33].mxu1 }
 0x199   : > { %v2772_v54 = vadd.f32 %v3617_v41, %v5060_v3  ;;  %v3620_v13 = vadd.f32 %v3619_v28, %v3618_v51  ;;  %v3681_v31 = vadd.f32 %v3680_v30, %v3679_v8  ;;  %v3682_v9 = vpop.f32.mrb[34].mxu1 }
 0x19a   : > { %v3683_v57 = vpop.f32.mrb[35].mxu1 }
 0x19b   : > { %v2775_v60 = vadd.f32 %v3620_v13, %v5062_v4  ;;  %v3684_v48 = vadd.f32 %v3683_v57, %v3682_v9  ;;  %v5094_v12 = vadd.f32 %v3681_v31, %v2772_v54 }
 0x19d   : > { %v3621_v22 = vpop.f32.mrb[36].mxu0  ;;  %v5096_v58 = vadd.f32 %v3684_v48, %v2775_v60 }
 0x19e   : > { %v3622_v15 = vpop.f32.mrb[37].mxu0 }
 0x19f   : > { %v3685_v49 = vpop.f32.mrb[36].mxu1  ;;  %v3623_v38 = vadd.f32 %v3622_v15, %v3621_v22  ;;  %v3624_v20 = vpop.f32.mrb[38].mxu0 }
 0x1a0   : > { %v3686_v5 = vpop.f32.mrb[37].mxu1  ;;  %v3625_v45 = vpop.f32.mrb[39].mxu0 }
 0x1a1   : > { %v2780_v3 = vadd.f32 %v3623_v38, %v5064_v16  ;;  %v3687_v53 = vadd.f32 %v3686_v5, %v3685_v49  ;;  %v3688_v19 = vpop.f32.mrb[38].mxu1  ;;  %v3626_v59 = vadd.f32 %v3625_v45, %v3624_v20 }
 0x1a2   : > { %v3689_v25 = vpop.f32.mrb[39].mxu1 }
 0x1a3   : > { %v2783_v4 = vadd.f32 %v3626_v59, %v5066_v35  ;;  %v3690_v1 = vadd.f32 %v3689_v25, %v3688_v19  ;;  %v5100_v17 = vadd.f32 %v3687_v53, %v2780_v3 }
 0x1a5   : > { %v5102_v32 = vadd.f32 %v3690_v1, %v2783_v4 }
 0x1a7   : > { %v3627_v61 = vpop.f32.mrb[40].mxu0 }
 0x1a8   : > { %v3691_v14 = vpop.f32.mrb[40].mxu1  ;;  %v3628_v27 = vpop.f32.mrb[41].mxu0 }
 0x1a9   : > { %v3692_v21 = vpop.f32.mrb[41].mxu1  ;;  %v3629_v2 = vadd.f32 %v3628_v27, %v3627_v61  ;;  %v3630_v24 = vpop.f32.mrb[42].mxu0 }
 0x1aa   : > { %v3693_v62 = vadd.f32 %v3692_v21, %v3691_v14  ;;  %v3694_v6 = vpop.f32.mrb[42].mxu1  ;;  %v3631_v16 = vpop.f32.mrb[43].mxu0 }
 0x1ab   : > { %v3695_v44 = vpop.f32.mrb[43].mxu1  ;;  %v2788_v23 = vadd.f32 %v3629_v2, %v5068_v39  ;;  %v3632_v7 = vadd.f32 %v3631_v16, %v3630_v24 }
 0x1ac   : > { %v3696_v34 = vadd.f32 %v3695_v44, %v3694_v6 }
 0x1ad   : > { %v2791_v35 = vadd.f32 %v3632_v7, %v5070_v33  ;;  %v5106_v18 = vadd.f32 %v3693_v62, %v2788_v23 }
 0x1af   : > { %v3633_v11 = vpop.f32.mrb[44].mxu0  ;;  %v5108_v26 = vadd.f32 %v3696_v34, %v2791_v35 }
 0x1b0   : > { %v3697_v40 = vpop.f32.mrb[44].mxu1  ;;  %v3634_v36 = vpop.f32.mrb[45].mxu0 }
 0x1b1   : > { %v3698_v42 = vpop.f32.mrb[45].mxu1  ;;  %v3635_v46 = vadd.f32 %v3634_v36, %v3633_v11  ;;  %v3636_v41 = vpop.f32.mrb[46].mxu0 }
 0x1b2   : > { %v3699_v55 = vadd.f32 %v3698_v42, %v3697_v40  ;;  %v3700_v51 = vpop.f32.mrb[46].mxu1  ;;  %v3637_v28 = vpop.f32.mrb[47].mxu0 }
 0x1b3   : > { %v3701_v8 = vpop.f32.mrb[47].mxu1  ;;  %v2796_v39 = vadd.f32 %v3635_v46, %v5072_v37  ;;  %v3638_v54 = vadd.f32 %v3637_v28, %v3636_v41 }
 0x1b4   : > { %v3702_v13 = vadd.f32 %v3701_v8, %v3700_v51 }
 0x1b5   : > { %v2799_v33 = vadd.f32 %v3638_v54, %v5074_v29  ;;  %v5112_v30 = vadd.f32 %v3699_v55, %v2796_v39 }
 0x1b7   : > { %v5114_v9 = vadd.f32 %v3702_v13, %v2799_v33 }
 0x1b8   : > { %v3703_v31 = vpop.f32.mrb[48].mxu1 }
 0x1b9   : > { %v3704_v60 = vpop.f32.mrb[49].mxu1  ;;  %v3639_v57 = vpop.f32.mrb[48].mxu0 }
 0x1ba   : > { %v3705_v48 = vadd.f32 %v3704_v60, %v3703_v31  ;;  %v3706_v22 = vpop.f32.mrb[50].mxu1  ;;  %v3640_v15 = vpop.f32.mrb[49].mxu0 }
 0x1bb   : > { %v3707_v49 = vpop.f32.mrb[51].mxu1  ;;  %v3641_v38 = vadd.f32 %v3640_v15, %v3639_v57  ;;  %v3642_v20 = vpop.f32.mrb[50].mxu0 }
 0x1bc   : > { %v3708_v5 = vadd.f32 %v3707_v49, %v3706_v22  ;;  %v3643_v45 = vpop.f32.mrb[51].mxu0 }
 0x1bd   : > { %v2804_v37 = vadd.f32 %v3641_v38, %v5076_v56  ;;  %v3644_v3 = vadd.f32 %v3643_v45, %v3642_v20  ;;  %v5133_v45 = vld [vmem:[%s5211_s2] ss:$0 sm:$0xff] }
 0x1bf   : > { %v2807_v29 = vadd.f32 %v3644_v3, %v5078_v52  ;;  %v2901_v19 = vadd.f32 %v3705_v48, %v2804_v37 }
 0x1c0   : > { %v3709_v53 = vpop.f32.mrb[52].mxu1 }
 0x1c1   : > { %v3710_v59 = vpop.f32.mrb[53].mxu1  ;;  %v5118_v61 = vadd.f32 %v3708_v5, %v2807_v29 }
 0x1c2   : > { %v3645_v25 = vpop.f32.mrb[52].mxu0  ;;  %v3711_v4 = vadd.f32 %v3710_v59, %v3709_v53  ;;  %v3712_v1 = vpop.f32.mrb[54].mxu1 }
 0x1c3   : > { %v3646_v14 = vpop.f32.mrb[53].mxu0  ;;  %v3713_v27 = vpop.f32.mrb[55].mxu1 }
 0x1c4   : > { %v3647_v21 = vadd.f32 %v3646_v14, %v3645_v25  ;;  %v3648_v2 = vpop.f32.mrb[54].mxu0  ;;  %v3714_v62 = vadd.f32 %v3713_v27, %v3712_v1 }
 0x1c5   : > { %v3649_v24 = vpop.f32.mrb[55].mxu0 }
 0x1c6   : > { %v2812_v6 = vadd.f32 %v3647_v21, %v5080_v0  ;;  %v3650_v56 = vadd.f32 %v3649_v24, %v3648_v2 }
 0x1c8   : > { %v2815_v16 = vadd.f32 %v3650_v56, %v5082_v43  ;;  %v2909_v52 = vadd.f32 %v3711_v4, %v2812_v6 }
 0x1c9   : > { %v3715_v44 = vpop.f32.mrb[56].mxu1 }
 0x1ca   : > { %v2912_v23 = vadd.f32 %v3714_v62, %v2815_v16  ;;  %v3716_v7 = vpop.f32.mrb[57].mxu1 }
 0x1cb   : > { %v3717_v35 = vadd.f32 %v3716_v7, %v3715_v44  ;;  %v3718_v11 = vpop.f32.mrb[58].mxu1 }
 0x1cc   : > { %v3651_v34 = vpop.f32.mrb[56].mxu0  ;;  %v3719_v36 = vpop.f32.mrb[59].mxu1 }
 0x1cd   : > { %v3652_v40 = vpop.f32.mrb[57].mxu0  ;;  %v3720_v55 = vadd.f32 %v3719_v36, %v3718_v11 }
 0x1ce   : > { %v3653_v42 = vadd.f32 %v3652_v40, %v3651_v34  ;;  %v3654_v46 = vpop.f32.mrb[58].mxu0 }
 0x1cf   : > { %v3655_v41 = vpop.f32.mrb[59].mxu0 }
 0x1d0   : > { %v2820_v51 = vadd.f32 %v3653_v42, %v5084_v47  ;;  %v3656_v28 = vadd.f32 %v3655_v41, %v3654_v46 }
 0x1d2   : > { %v2823_v0 = vadd.f32 %v3656_v28, %v5086_v10  ;;  %v5124_v8 = vadd.f32 %v3717_v35, %v2820_v51 }
 0x1d3   : > { %v3721_v39 = vpop.f32.mrb[60].mxu1 }
 0x1d4   : > { %v3657_v43 = vpop.f32.mrb[60].mxu0  ;;  %v5126_v54 = vadd.f32 %v3720_v55, %v2823_v0  ;;  %v3722_v33 = vpop.f32.mrb[61].mxu1 }
 0x1d5   : > { %v3658_v13 = vpop.f32.mrb[61].mxu0  ;;  %v3723_v60 = vadd.f32 %v3722_v33, %v3721_v39  ;;  %v3724_v48 = vpop.f32.mrb[62].mxu1 }
 0x1d6   : > { %v3659_v31 = vadd.f32 %v3658_v13, %v3657_v43  ;;  %v3660_v57 = vpop.f32.mrb[62].mxu0  ;;  %v3725_v15 = vpop.f32.mrb[63].mxu1 }
 0x1d7   : > { %v3661_v22 = vpop.f32.mrb[63].mxu0  ;;  %v3726_v38 = vadd.f32 %v3725_v15, %v3724_v48 }
 0x1d8   : > { %v2828_v49 = vadd.f32 %v3659_v31, %v5088_v63  ;;  %v3662_v47 = vadd.f32 %v3661_v22, %v3660_v57 }
 0x1da   : > { %v2831_v10 = vadd.f32 %v3662_v47, %v5090_v50  ;;  %v2925_v20 = vadd.f32 %v3723_v60, %v2828_v49 }
 0x1db   : > { %v3769_v37 = vpop.f32.mrb[64].mxu1 }
 0x1dc   : > { %v3761_v5 = vpop.f32.mrb[64].mxu0  ;;  %v2928_v3 = vadd.f32 %v3726_v38, %v2831_v10  ;;  %v3006_v53 = vadd.f32 %v3769_v37, %v2909_v52  ;;  %v2997_v25 = vpop.f32.mrb[65].mxu1 }
 0x1dd   : > { %v2974_v29 = vadd.f32 %v3761_v5, %v5100_v17  ;;  %v2965_v59 = vpop.f32.mrb[65].mxu0  ;;  %v2998_v4 = vadd.f32 %v2997_v25, %v2901_v19  ;;  %v3770_v50 = vpop.f32.mrb[66].mxu1 }
 0x1de   : > { %v2966_v63 = vadd.f32 %v2965_v59, %v5094_v12  ;;  %v3762_v1 = vpop.f32.mrb[66].mxu0  ;;  %v3045_v27 = vadd.f32 %v5133_v45, %v3006_v53  ;;  %v3009_v2 = vadd.f32 %v3770_v50, %v2912_v23  ;;  %v3000_v17 = vpop.f32.mrb[67].mxu1 }
 0x1df   : > { %v3037_v14 = vadd.f32 %v5133_v45, %v2974_v29  ;;  %v2977_v21 = vadd.f32 %v3762_v1, %v5102_v32  ;;  %v2968_v62 = vpop.f32.mrb[67].mxu0  ;;  %v3043_v6 = vadd.f32 %v5133_v45, %v2998_v4  ;;  %v3001_v19 = vadd.f32 %v3000_v17, %v5118_v61 }
 0x1e0   : > { %v3035_v24 = vadd.f32 %v5133_v45, %v2966_v63  ;;  %v2969_v12 = vadd.f32 %v2968_v62, %v5096_v58  ;;  %v3061_v16 = vmax.f32 %v3045_v27, 0.0  ;;  %v3046_v32 = vadd.f32 %v5133_v45, %v3009_v2 }
 0x1e1   : > { %v3053_v56 = vmax.f32 %v3037_v14, 0.0  ;;  %v3038_v52 = vadd.f32 %v5133_v45, %v2977_v21  ;;  %v3059_v23 = vmax.f32 %v3043_v6, 0.0  ;;  %v3044_v34 = vadd.f32 %v5133_v45, %v3001_v19 }
 0x1e2   : > { %v3051_v44 = vmax.f32 %v3035_v24, 0.0  ;;  %v3036_v7 = vadd.f32 %v5133_v45, %v2969_v12  ;;  %3078 = vst.msk [vmem:[%s4062_s16 + $0x50] sm:$0xff] %vm3067_vm14, %v3061_v16  ;;  %v3062_v61 = vmax.f32 %v3046_v32, 0.0 }
 0x1e3   : > { %3070 = vst.msk [vmem:[%s4062_s16 + $0x10] sm:$0xff] %vm3067_vm14, %v3053_v56  ;;  %v3054_v58 = vmax.f32 %v3038_v52, 0.0  ;;  %3076 = vst.msk [vmem:[%s4062_s16 + $0x40] sm:$0xff] %vm3067_vm14, %v3059_v23  ;;  %v3060_v11 = vmax.f32 %v3044_v34, 0.0  ;;  %v3773_v36 = vpop.f32.mrb[68].mxu1 }
 0x1e4   : > { %3068 = vst.msk [vmem:[%s4062_s16] sm:$0xff] %vm3067_vm14, %v3051_v44  ;;  %v3052_v35 = vmax.f32 %v3036_v7, 0.0  ;;  %v3765_v40 = vpop.f32.mrb[68].mxu0  ;;  %3079 = vst.msk [vmem:[%s4062_s16 + $0x58] sm:$0xff] %vm3067_vm14, %v3062_v61  ;;  %v3022_v46 = vadd.f32 %v3773_v36, %v2925_v20  ;;  %v3013_v41 = vpop.f32.mrb[69].mxu1 }
 0x1e5   : > { %3071 = vst.msk [vmem:[%s4062_s16 + $0x18] sm:$0xff] %vm3067_vm14, %v3054_v58  ;;  %v2990_v42 = vadd.f32 %v3765_v40, %v5112_v30  ;;  %v2981_v55 = vpop.f32.mrb[69].mxu0  ;;  %3077 = vst.msk [vmem:[%s4062_s16 + $0x48] sm:$0xff] %vm3067_vm14, %v3060_v11  ;;  %v3014_v28 = vadd.f32 %v3013_v41, %v5124_v8  ;;  %v3774_v43 = vpop.f32.mrb[70].mxu1 }
 0x1e6   : > { %3069 = vst.msk [vmem:[%s4062_s16 + $0x8] sm:$0xff] %vm3067_vm14, %v3052_v35  ;;  %v2982_v51 = vadd.f32 %v2981_v55, %v5106_v18  ;;  %v3766_v0 = vpop.f32.mrb[70].mxu0  ;;  %v3049_v13 = vadd.f32 %v5133_v45, %v3022_v46  ;;  %v3025_v30 = vadd.f32 %v3774_v43, %v2928_v3  ;;  %v3016_v60 = vpop.f32.mrb[71].mxu1 }
 0x1e7   : > { %v3041_v39 = vadd.f32 %v5133_v45, %v2990_v42  ;;  %v2993_v33 = vadd.f32 %v3766_v0, %v5114_v9  ;;  %v2984_v31 = vpop.f32.mrb[71].mxu0  ;;  %v3047_v18 = vadd.f32 %v5133_v45, %v3014_v28  ;;  %v3017_v48 = vadd.f32 %v3016_v60, %v5126_v54 }
 0x1e8   : > { %v3039_v57 = vadd.f32 %v5133_v45, %v2982_v51  ;;  %v2985_v8 = vadd.f32 %v2984_v31, %v5108_v26  ;;  %v3065_v15 = vmax.f32 %v3049_v13, 0.0  ;;  %v3050_v49 = vadd.f32 %v5133_v45, %v3025_v30 }
 0x1e9   : > { %v3057_v22 = vmax.f32 %v3041_v39, 0.0  ;;  %v3042_v9 = vadd.f32 %v5133_v45, %v2993_v33  ;;  %v3063_v38 = vmax.f32 %v3047_v18, 0.0  ;;  %v3048_v20 = vadd.f32 %v5133_v45, %v3017_v48 }
 0x1ea   : > { %v3055_v47 = vmax.f32 %v3039_v57, 0.0  ;;  %v3040_v10 = vadd.f32 %v5133_v45, %v2985_v8  ;;  %3082 = vst.msk [vmem:[%s4062_s16 + $0x70] sm:$0xff] %vm3067_vm14, %v3065_v15  ;;  %v3066_v54 = vmax.f32 %v3050_v49, 0.0 }
 0x1eb   : > { %3074 = vst.msk [vmem:[%s4062_s16 + $0x30] sm:$0xff] %vm3067_vm14, %v3057_v22  ;;  %v3058_v26 = vmax.f32 %v3042_v9, 0.0  ;;  %3080 = vst.msk [vmem:[%s4062_s16 + $0x60] sm:$0xff] %vm3067_vm14, %v3063_v38  ;;  %v3064_v37 = vmax.f32 %v3048_v20, 0.0 }
 0x1ec   : > { %3072 = vst.msk [vmem:[%s4062_s16 + $0x20] sm:$0xff] %vm3067_vm14, %v3055_v47  ;;  %v3056_v5 = vmax.f32 %v3040_v10, 0.0  ;;  %3083 = vst.msk [vmem:[%s4062_s16 + $0x78] sm:$0xff] %vm3067_vm14, %v3066_v54 }
 0x1ed   : > { %3075 = vst.msk [vmem:[%s4062_s16 + $0x38] sm:$0xff] %vm3067_vm14, %v3058_v26  ;;  %3081 = vst.msk [vmem:[%s4062_s16 + $0x68] sm:$0xff] %vm3067_vm14, %v3064_v37 }
 0x1ee   : > { %3073 = vst.msk [vmem:[%s4062_s16 + $0x28] sm:$0xff] %vm3067_vm14, %v3056_v5 }
 0x1ef PF: > { %s15_s22 = sadd.s32 1, %s3966_s22   ;;  %s5229_s18 = smov %s3958_s20 }
 0x1f0   : > { %p12_p9 = scmp.ge.s32.totalorder %s15_s22, 6   ;;  %s5230_s19 = smov %s3962_s21 }
 0x1f1   : > { %s5231_s20 = smov %s5234_s23  ;;  %s5232_s21 = smov %s5238_s24 }
 0x1f2   :  { %14 = sbr.rel (!%p12_p9) target bundleno = 3 (0x3), region = 84 }

</bundles_post_ra>
